<compile_context>
chip_gen: v7x
topology: tpu7x:2x2x1
jax: 0.10.0
libtpu: 0.0.40
codegen_flags: <defaults>
</compile_context>

<pallas_src>
import functools

import jax
import jax.numpy as jnp
from jax.experimental import pallas as pl
from jax.experimental.pallas import tpu as pltpu


# ---------------------------------------------------------------------------
# Kernel 1: fused QKV projection   y = x @ [Wq|Wk|Wv]^T + [bq|bk|bv]
# ---------------------------------------------------------------------------
def qkv_proj_kernel(x_ref, w_ref, b_ref, q_ref, k_ref, v_ref, *, embed_dim):
    x = x_ref[...]                                                   # (TILE_M, C)
    y = jnp.dot(x, w_ref[...], preferred_element_type=jnp.float32) + b_ref[...]
    C = embed_dim
    q_ref[...] = y[:, 0 * C:1 * C].astype(q_ref.dtype)
    k_ref[...] = y[:, 1 * C:2 * C].astype(k_ref.dtype)
    v_ref[...] = y[:, 2 * C:3 * C].astype(v_ref.dtype)


# ---------------------------------------------------------------------------
# Kernel 2: attention for one (batch, head-group) block.  Heads stay in the
# natural (B, N, C) layout; head selection happens in the BlockSpec, so the
# kernel refs are (N, heads_per_block * head_dim).
# ---------------------------------------------------------------------------
def attn_kernel(q_ref, k_ref, v_ref, o_ref, *, scale, heads_per_block, head_dim):
    for g in range(heads_per_block):                   # small static unroll
        lo, hi = g * head_dim, (g + 1) * head_dim
        q = q_ref[:, lo:hi] * scale                    # fold scale into q (N*D mul)
        k = k_ref[:, lo:hi]
        v = v_ref[:, lo:hi]
        # q @ k^T without materializing a transposed copy of k.
        s = jax.lax.dot_general(q, k, (((1,), (1,)), ((), ())),
                                preferred_element_type=jnp.float32)  # (N, N)
        s = s - jnp.max(s, axis=-1, keepdims=True)
        p = jnp.exp(s)
        # Multiply by reciprocal of the row sums instead of an N*N divide.
        # (pl.reciprocal(..., approx=True) is an option for more EUP speed.)
        inv = pl.reciprocal(jnp.sum(p, axis=-1, keepdims=True))
        o = jnp.dot(p, v, preferred_element_type=jnp.float32) * inv
        o_ref[:, lo:hi] = o.astype(o_ref.dtype)


# ---------------------------------------------------------------------------
# Wrapper
# ---------------------------------------------------------------------------
def multi_head_attention(x, params, num_heads, *, heads_per_block=None,
                         row_tile=128):
    """x: (B, N, C) float32; params hold PyTorch-convention Linear weights."""
    B, N, C = x.shape
    assert C % num_heads == 0
    D = C // num_heads
    scale = float(C) ** -0.5          # matches PyTorch: embed_dim ** -0.5

    # --- head grouping: block width must be a multiple of 128 lanes ----------
    if heads_per_block is None:
        heads_per_block = num_heads   # fallback: one block covers all heads (=C)
        for g in range(1, num_heads + 1):
            if num_heads % g == 0 and (g * D) % 128 == 0:
                heads_per_block = g
                break
    G = heads_per_block
    assert num_heads % G == 0
    assert (G * D) % 128 == 0 or G * D == C, (
        "head-group width must be a multiple of 128 lanes (or cover all of C)")

    # --- fused QKV projection (row-tiled, pipelined) --------------------------
    # PyTorch nn.Linear stores weight as (out, in): y = x @ W.T + b.
    w_qkv = jnp.concatenate(
        [params["wq"].T, params["wk"].T, params["wv"].T], axis=1)       # (C, 3C)
    b_qkv = jnp.concatenate(
        [params["bq"], params["bk"], params["bv"]]).reshape(1, 3 * C)   # (1, 3C)

    M = B * N
    tile_m = min(row_tile, ((M + 7) // 8) * 8)          # multiple of 8, capped
    m_pad = pl.cdiv(M, tile_m) * tile_m
    xf = x.reshape(M, C)
    if m_pad != M:
        xf = jnp.pad(xf, ((0, m_pad - M), (0, 0)))

    q2, k2, v2 = pl.pallas_call(
        functools.partial(qkv_proj_kernel, embed_dim=C),
        grid=(m_pad // tile_m,),
        in_specs=[
            pl.BlockSpec((tile_m, C), lambda i: (i, 0)),
            pl.BlockSpec((C, 3 * C), lambda i: (0, 0)),   # weights stay resident
            pl.BlockSpec((1, 3 * C), lambda i: (0, 0)),
        ],
        out_specs=[
            pl.BlockSpec((tile_m, C), lambda i: (i, 0)),
            pl.BlockSpec((tile_m, C), lambda i: (i, 0)),
            pl.BlockSpec((tile_m, C), lambda i: (i, 0)),
        ],
        out_shape=(
            jax.ShapeDtypeStruct((m_pad, C), x.dtype),
            jax.ShapeDtypeStruct((m_pad, C), x.dtype),
            jax.ShapeDtypeStruct((m_pad, C), x.dtype),
        ),
        compiler_params=pltpu.CompilerParams(
            dimension_semantics=("parallel",)),
    )(xf, w_qkv, b_qkv)

    def to_bnc(t):                      # free reshape, no transpose / HBM shuffle
        if m_pad != M:
            t = t[:M]
        return t.reshape(B, N, C)

    qb, kb, vb = (to_bnc(t) for t in (q2, k2, v2))

    # --- attention: grid over (batch, head-group); heads picked by index_map --
    # TODO(synk): for ragged N (e.g. ViT's N=197) pad N to a multiple of 8 and
    # mask padded keys to -inf; for very long N, switch to a KV-tiled
    # (flash-style) inner loop so the (N, N) score tile stays within VMEM.
    GD = G * D
    blk = pl.BlockSpec((None, N, GD), lambda b, g: (b, 0, g))
    out = pl.pallas_call(
        functools.partial(attn_kernel, scale=scale,
                          heads_per_block=G, head_dim=D),
        grid=(B, num_heads // G),
        in_specs=[blk, blk, blk],
        out_specs=pl.BlockSpec((None, N, GD), lambda b, g: (b, 0, g)),
        out_shape=jax.ShapeDtypeStruct((B, N, C), x.dtype),
        compiler_params=pltpu.CompilerParams(
            dimension_semantics=("parallel", "parallel")),
    )(qb, kb, vb)
    return out


# ---------------------------------------------------------------------------
# Pure-JAX reference (mirrors the PyTorch forward) for a correctness check
# ---------------------------------------------------------------------------
def reference_mha(x, params, num_heads):
    B, N, C = x.shape
    D = C // num_heads
    scale = float(C) ** -0.5
    hp = jax.lax.Precision.HIGHEST
    q = jnp.dot(x, params["wq"].T, precision=hp) + params["bq"]
    k = jnp.dot(x, params["wk"].T, precision=hp) + params["bk"]
    v = jnp.dot(x, params["wv"].T, precision=hp) + params["bv"]
    q = q.reshape(B, N, num_heads, D).transpose(0, 2, 1, 3)
    k = k.reshape(B, N, num_heads, D).transpose(0, 2, 1, 3)
    v = v.reshape(B, N, num_heads, D).transpose(0, 2, 1, 3)
    attn = jnp.einsum("bhnd,bhmd->bhnm", q, k, precision=hp) * scale
    attn = jax.nn.softmax(attn, axis=-1)
    out = jnp.einsum("bhnm,bhmd->bhnd", attn, v, precision=hp)
    return out.transpose(0, 2, 1, 3).reshape(B, N, C)


if __name__ == "__main__":
    # Small, lane-aligned config: head_dim = 128, two heads per attention block.
    B, N, C, H = 2, 32, 512, 4

    key = jax.random.PRNGKey(0)
    kx, kwq, kwk, kwv, kbq, kbk, kbv = jax.random.split(key, 7)

    x = jax.random.normal(kx, (B, N, C), dtype=jnp.float32)
    params = {
        "wq": jax.random.normal(kwq, (C, C), dtype=jnp.float32) * 0.05,
        "wk": jax.random.normal(kwk, (C, C), dtype=jnp.float32) * 0.05,
        "wv": jax.random.normal(kwv, (C, C), dtype=jnp.float32) * 0.05,
        "bq": jax.random.normal(kbq, (C,), dtype=jnp.float32) * 0.01,
        "bk": jax.random.normal(kbk, (C,), dtype=jnp.float32) * 0.01,
        "bv": jax.random.normal(kbv, (C,), dtype=jnp.float32) * 0.01,
    }

    out = multi_head_attention(x, params, H, heads_per_block=2)
    out = jax.block_until_ready(out)

    ref = reference_mha(x, params, H)
    assert out.shape == (B, N, C)
    max_err = float(jnp.max(jnp.abs(out - ref)))
    assert jnp.allclose(out, ref, atol=1e-3, rtol=1e-3), (
        f"mismatch vs reference, max abs err = {max_err}")

    print("KERNEL_OK")
</pallas_src>

<mosaic_0001>
module attributes {stable_mosaic.version = 11 : i64} {
  func.func @qkv_proj_kernel(%arg0: i32, %arg1: memref<64x512xf32, #tpu.memory_space<vmem>>, %arg2: memref<512x1536xf32, #tpu.memory_space<vmem>>, %arg3: memref<1x1536xf32, #tpu.memory_space<vmem>>, %arg4: memref<64x512xf32, #tpu.memory_space<vmem>>, %arg5: memref<64x512xf32, #tpu.memory_space<vmem>>, %arg6: memref<64x512xf32, #tpu.memory_space<vmem>>) attributes {dimension_semantics = [#tpu.dimension_semantics<parallel>], iteration_bounds = array<i64: 1>, scalar_prefetch = 0 : i64, scratch_operands = 0 : i64, tpu.core_type = #tpu.core_type<tc>, window_params = [{transform_indices = @transform_0, window_bounds = array<i64: 64, 512>}, {pipeline_mode = #tpu.pipeline_mode<synchronous>, transform_indices = @transform_1, window_bounds = array<i64: 512, 1536>}, {pipeline_mode = #tpu.pipeline_mode<synchronous>, transform_indices = @transform_2, window_bounds = array<i64: 1, 1536>}, {transform_indices = @transform_3, window_bounds = array<i64: 64, 512>}, {transform_indices = @transform_4, window_bounds = array<i64: 64, 512>}, {transform_indices = @transform_5, window_bounds = array<i64: 64, 512>}]} {
    %c0 = arith.constant 0 : index
    %c0_0 = arith.constant 0 : index
    %0 = vector.load %arg1[%c0, %c0_0] : memref<64x512xf32, #tpu.memory_space<vmem>>, vector<64x512xf32>
    %c0_1 = arith.constant 0 : index
    %c0_2 = arith.constant 0 : index
    %1 = vector.load %arg2[%c0_1, %c0_2] : memref<512x1536xf32, #tpu.memory_space<vmem>>, vector<512x1536xf32>
    %cst = arith.constant dense<0.000000e+00> : vector<64x1536xf32>
    %2 = tpu.matmul %0, %1, %cst {dimension_numbers = #tpu.dot_dimension_numbers<[1], [0], [0], [1], [0, 0, 1, 1], [], []>} : vector<64x512xf32>, vector<512x1536xf32>, vector<64x1536xf32> -> vector<64x1536xf32>
    %c0_3 = arith.constant 0 : index
    %c0_4 = arith.constant 0 : index
    %3 = vector.load %arg3[%c0_3, %c0_4] : memref<1x1536xf32, #tpu.memory_space<vmem>>, vector<1x1536xf32>
    %4 = vector.broadcast %3 : vector<1x1536xf32> to vector<64x1536xf32>
    %5 = arith.addf %2, %4 : vector<64x1536xf32>
    %6 = vector.extract_strided_slice %5 {offsets = [0, 0], sizes = [64, 512], strides = [1, 1]} : vector<64x1536xf32> to vector<64x512xf32>
    %c0_5 = arith.constant 0 : index
    %c0_6 = arith.constant 0 : index
    %7 = vector.load %arg4[%c0_5, %c0_6] : memref<64x512xf32, #tpu.memory_space<vmem>>, vector<64x512xf32>
    tpu.vector_store %arg4[%c0_5, %c0_6], %6 {strides = array<i32>} : memref<64x512xf32, #tpu.memory_space<vmem>>, vector<64x512xf32>,
    %8 = vector.extract_strided_slice %5 {offsets = [0, 512], sizes = [64, 512], strides = [1, 1]} : vector<64x1536xf32> to vector<64x512xf32>
    %c0_7 = arith.constant 0 : index
    %c0_8 = arith.constant 0 : index
    %9 = vector.load %arg5[%c0_7, %c0_8] : memref<64x512xf32, #tpu.memory_space<vmem>>, vector<64x512xf32>
    tpu.vector_store %arg5[%c0_7, %c0_8], %8 {strides = array<i32>} : memref<64x512xf32, #tpu.memory_space<vmem>>, vector<64x512xf32>,
    %10 = vector.extract_strided_slice %5 {offsets = [0, 1024], sizes = [64, 512], strides = [1, 1]} : vector<64x1536xf32> to vector<64x512xf32>
    %c0_9 = arith.constant 0 : index
    %c0_10 = arith.constant 0 : index
    %11 = vector.load %arg6[%c0_9, %c0_10] : memref<64x512xf32, #tpu.memory_space<vmem>>, vector<64x512xf32>
    tpu.vector_store %arg6[%c0_9, %c0_10], %10 {strides = array<i32>} : memref<64x512xf32, #tpu.memory_space<vmem>>, vector<64x512xf32>,
    return
  }
  func.func @transform_0(%arg0: i32) -> (i32, i32) {
    %c0_i32 = arith.constant 0 : i32
    %c0_i32_0 = arith.constant 0 : i32
    return %arg0, %c0_i32 : i32, i32
  }
  func.func @transform_1(%arg0: i32) -> (i32, i32) {
    %c0_i32 = arith.constant 0 : i32
    %c0_i32_0 = arith.constant 0 : i32
    %c0_i32_1 = arith.constant 0 : i32
    return %c0_i32, %c0_i32_0 : i32, i32
  }
  func.func @transform_2(%arg0: i32) -> (i32, i32) {
    %c0_i32 = arith.constant 0 : i32
    %c0_i32_0 = arith.constant 0 : i32
    %c0_i32_1 = arith.constant 0 : i32
    return %c0_i32, %c0_i32_0 : i32, i32
  }
  func.func @transform_3(%arg0: i32) -> (i32, i32) {
    %c0_i32 = arith.constant 0 : i32
    %c0_i32_0 = arith.constant 0 : i32
    return %arg0, %c0_i32 : i32, i32
  }
  func.func @transform_4(%arg0: i32) -> (i32, i32) {
    %c0_i32 = arith.constant 0 : i32
    %c0_i32_0 = arith.constant 0 : i32
    return %arg0, %c0_i32 : i32, i32
  }
  func.func @transform_5(%arg0: i32) -> (i32, i32) {
    %c0_i32 = arith.constant 0 : i32
    %c0_i32_0 = arith.constant 0 : i32
    return %arg0, %c0_i32 : i32, i32
  }
}

</mosaic_0001>

<bundles_post_ra>
// kernel: tpu_custom_call.1
= control target key start
LH: loop header
LB: loop body
LE: loop exit
PB: predicated region body
PF: predicated region fallthrough
CT: control target
= control target key end

     0   :  { %11 = vsyncpa [#allocation3], 0  ;;  %s3884_s0 = inlined_call_operand.hbm [shape: f32[64,512], index: 0, kind: input, shape index: {}]   ;;  %s3885_s1 = inlined_call_operand.hbm [shape: f32[512,1536], index: 1, kind: input, shape index: {}]   ;;  %s3886_s2 = inlined_call_operand.hbm [shape: f32[1,1536], index: 2, kind: input, shape index: {}]   ;;  %s3887_s3 = inlined_call_operand.hbm [shape: f32[64,512], index: 3, kind: output, shape index: {0}]   ;;  %s3888_s4 = inlined_call_operand.hbm [shape: f32[64,512], index: 4, kind: output, shape index: {1}]   ;;  %s3889_s5 = inlined_call_operand.hbm [shape: f32[64,512], index: 5, kind: output, shape index: {2}]  }
   0x1   :  { %12 = vsyncpa [#allocation6], 0 }
   0x2   :  { %13 = vsyncpa [#allocation4], 0 }
   0x3   :  { %14 = vsyncpa [#allocation10], 0  ;;  %s3597_s18 = smov [#allocation5]   ;;  %s3457_s22 = scalar_lea.hbm %s3885_s1, 98304 }
   0x4   :  { %s32_s19 = sshll.u32 %s3597_s18, 4  ;;  %p3458_p0 = scmp.ne.s32.totalorder %s3885_s1, %s3457_s22  ;;  %s33_s19 = int_to_ptr.vmem [resolvable:$true] %s32_s19 }
   0x5   :  { %p3461_p1 = scmp.lt.u32.totalorder %s3457_s22, %s3885_s1 }
   0x7   :  { %p3463_p2 = pnand %p3461_p1, %p3458_p0 }
   0x9   :  { %3466 = shalt.err (!%p3463_p2)
}
   0xa   :  { %s3467_s27 = scalar_lea.vmem %s33_s19, 98304  ;;  %p3472_p4 = scmp.lt.s32.totalorder %s33_s19, %s33_s19 }
   0xb   :  { %p3468_p3 = scmp.ne.s32.totalorder %s33_s19, %s3467_s27  ;;  %p3473_p5 = scmp.lt.s32.totalorder %s3467_s27, %s3467_s27 }
   0xd   :  { %p3474_p6 = por %p3473_p5, %p3472_p4 }
   0xf   :  { %p3475_p7 = pnand %p3474_p6, %p3468_p3 }
  0x11   :  { %3478 = shalt.err (!%p3475_p7)
}
  0x12   :  { %s3598_s28 = smov 1536   ;;  %s3599_s29 = smov 96  }
  0x13   :  { %38 = dma.hbm_to_vmem [thread:$0]  %s3885_s1, 98304, %s33_s19, [#allocation6], %s3598_s28, %s3598_s28, %s3599_s29  }
  0x14   :  { %s3600_s7 = smov [#allocation2]   ;;  %s3479_s11 = scalar_lea.hbm %s3884_s0, 4096 }
  0x15   :  { %s20_s8 = sshll.u32 %s3600_s7, 4  ;;  %p3480_p8 = scmp.ne.s32.totalorder %s3884_s0, %s3479_s11  ;;  %s21_s8 = int_to_ptr.vmem [resolvable:$true] %s20_s8 }
  0x16   :  { %p3483_p9 = scmp.lt.u32.totalorder %s3479_s11, %s3884_s0 }
  0x18   :  { %p3485_p10 = pnand %p3483_p9, %p3480_p8 }
  0x1a   :  { %3488 = shalt.err (!%p3485_p10)
}
  0x1b   :  { %s3489_s16 = scalar_lea.vmem %s21_s8, 4096  ;;  %p3494_p12 = scmp.lt.s32.totalorder %s21_s8, %s21_s8 }
  0x1c   :  { %p3490_p11 = scmp.ne.s32.totalorder %s21_s8, %s3489_s16  ;;  %p3495_p13 = scmp.lt.s32.totalorder %s3489_s16, %s3489_s16 }
  0x1e   :  { %p3496_p0 = por %p3495_p13, %p3494_p12 }
  0x20   :  { %p3497_p1 = pnand %p3496_p0, %p3490_p11 }
  0x22   :  { %3500 = shalt.err (!%p3497_p1)
}
  0x23   :  { %s3601_s1 = smov 512   ;;  %s3602_s17 = smov 32  }
  0x24   :  { %26 = dma.hbm_to_vmem [thread:$0]  %s3884_s0, 4096, %s21_s8, [#allocation3], %s3601_s1, %s3601_s1, %s3602_s17  }
  0x25   :  { %s3603_s20 = smov [#allocation7]   ;;  %s3501_s24 = scalar_lea.hbm %s3886_s2, 192 }
  0x26   :  { %s45_s21 = sshll.u32 %s3603_s20, 4  ;;  %p3502_p2 = scmp.ne.s32.totalorder %s3886_s2, %s3501_s24  ;;  %s46_s21 = int_to_ptr.vmem [resolvable:$true] %s45_s21 }
  0x27   :  { %p3505_p3 = scmp.lt.u32.totalorder %s3501_s24, %s3886_s2 }
  0x29   :  { %p3507_p4 = pnand %p3505_p3, %p3502_p2 }
  0x2b   :  { %3510 = shalt.err (!%p3507_p4)
}
  0x2c   :  { %s3511_s29 = scalar_lea.vmem %s46_s21, 192  ;;  %p3516_p6 = scmp.lt.s32.totalorder %s46_s21, %s46_s21 }
  0x2d   :  { %p3512_p5 = scmp.ne.s32.totalorder %s46_s21, %s3511_s29  ;;  %p3517_p7 = scmp.lt.s32.totalorder %s3511_s29, %s3511_s29 }
  0x2f   :  { %p3518_p8 = por %p3517_p7, %p3516_p6 }
  0x31   :  { %p3519_p9 = pnand %p3518_p8, %p3512_p5 }
  0x33   :  { %3522 = shalt.err (!%p3519_p9)
}
  0x34   :  { %48 = dma.hbm_to_vmem [thread:$0]  %s3886_s2, 192, %s46_s21, [#allocation6]  }
  0x35   :  { %3589 = dma.done.wait [#allocation3], 4096  }
  0x36   :  { %3590 = vsyncadd [#allocation3], 4294963200 }
  0x37   :  { %3591 = dma.done.wait [#allocation6], 98496  }
  0x38   :  { %3592 = vsyncadd [#allocation6], 4294868800  ;;  %v91_v0 = vld [vmem:[#allocation5 + $0x8] sm:$0xff]  ;;  %v93_v2 = vld [vmem:[#allocation5 + $0x18] sm:$0xff]  ;;  %s3604_s2 = smov [#allocation9]   ;;  %s3605_s7 = smov [#allocation8]  }
  0x39   :  { %v103_v1 = vld [vmem:[#allocation5 + $0x68] sm:$0xff]  ;;  %v105_v4 = vld [vmem:[#allocation5 + $0x78] sm:$0xff]  ;;  %v90_v5 = vld [vmem:[#allocation5] sm:$0xff]  ;;  %s2391_s6 = sshll.u32 %s3604_s2, 4  ;;  %s2379_s8 = sshll.u32 %s3605_s7, 4  ;;  %s2392_s6 = int_to_ptr.vmem [resolvable:$true] %s2391_s6  ;;  %s3784_s8 = int_to_ptr.vmem [resolvable:$true] %s2379_s8 }
  0x3a   :  { %v2423_v3 = vpack.c.bf16 %v103_v1, %v91_v0  ;;  %v102_v6 = vld [vmem:[#allocation5 + $0x60] sm:$0xff]  ;;  %v2551_v7 = vpack.c.bf16 %v105_v4, %v93_v2  ;;  %v92_v9 = vld [vmem:[#allocation5 + $0x10] sm:$0xff]  ;;  %v115_v11 = vld [vmem:[#allocation5 + $0xc8] sm:$0xff]  ;;  %s3523_s9 = scalar_lea.vmem %s2392_s6, 4096  ;;  %p3528_p11 = scmp.lt.s32.totalorder %s2392_s6, %s2392_s6 }
  0x3b   :  { %v2425_v8 = vpack.c.bf16 %v102_v6, %v90_v5  ;;  %v104_v10 = vld [vmem:[#allocation5 + $0x70] sm:$0xff]  ;;  %v127_v13 = vld [vmem:[#allocation5 + $0x128] sm:$0xff]  ;;  %v117_v14 = vld [vmem:[#allocation5 + $0xd8] sm:$0xff]  ;;  %p3524_p10 = scmp.ne.s32.totalorder %s2392_s6, %s3523_s9  ;;  %p3529_p12 = scmp.lt.s32.totalorder %s3523_s9, %s3523_s9 }
  0x3c   :  { %2424 = vmatprep.subr.bf16.mxu0 %v2423_v3  ;;  %v2553_v12 = vpack.c.bf16 %v104_v10, %v92_v9  ;;  %v129_v15 = vld [vmem:[#allocation5 + $0x138] sm:$0xff]  ;;  %2552 = vmatprep.subr.bf16.mxu1 %v2551_v7  ;;  %v2427_v16 = vpack.c.bf16 %v127_v13, %v115_v11  ;;  %v114_v18 = vld [vmem:[#allocation5 + $0xc0] sm:$0xff]  ;;  %v116_v20 = vld [vmem:[#allocation5 + $0xd0] sm:$0xff] }
  0x3d   :  { %2426 = vmatpush1.bf16.msra.mxu0 %v2425_v8  ;;  %v2555_v17 = vpack.c.bf16 %v129_v15, %v117_v14  ;;  %v126_v19 = vld [vmem:[#allocation5 + $0x120] sm:$0xff]  ;;  %v128_v22 = vld [vmem:[#allocation5 + $0x130] sm:$0xff]  ;;  %v139_v23 = vld [vmem:[#allocation5 + $0x188] sm:$0xff]  ;;  %p3530_p13 = por %p3529_p12, %p3528_p11 }
  0x3e   :  { %2554 = vmatpush1.bf16.msra.mxu1 %v2553_v12  ;;  %v2429_v21 = vpack.c.bf16 %v126_v19, %v114_v18  ;;  %v151_v24 = vld [vmem:[#allocation5 + $0x1e8] sm:$0xff]  ;;  %2428 = vmatprep.subr.bf16.mxu0 %v2427_v16  ;;  %v2557_v25 = vpack.c.bf16 %v128_v22, %v116_v20  ;;  %v141_v27 = vld [vmem:[#allocation5 + $0x198] sm:$0xff]  ;;  %v138_v29 = vld [vmem:[#allocation5 + $0x180] sm:$0xff] }
  0x3f   :  { %2556 = vmatprep.subr.bf16.mxu1 %v2555_v17  ;;  %v2431_v26 = vpack.c.bf16 %v151_v24, %v139_v23  ;;  %v153_v28 = vld [vmem:[#allocation5 + $0x1f8] sm:$0xff]  ;;  %v150_v31 = vld [vmem:[#allocation5 + $0x1e0] sm:$0xff]  ;;  %v140_v32 = vld [vmem:[#allocation5 + $0x190] sm:$0xff]  ;;  %p3531_p0 = pnand %p3530_p13, %p3524_p10 }
  0x40   :  { %v2559_v30 = vpack.c.bf16 %v153_v28, %v141_v27  ;;  %v152_v33 = vld [vmem:[#allocation5 + $0x1f0] sm:$0xff]  ;;  %v2433_v34 = vpack.c.bf16 %v150_v31, %v138_v29  ;;  %v163_v35 = vld [vmem:[#allocation5 + $0x248] sm:$0xff]  ;;  %v165_v37 = vld [vmem:[#allocation5 + $0x258] sm:$0xff] }
  0x41   :  { %2430 = vmatpush1.bf16.msra.mxu0 %v2429_v21  ;;  %v175_v36 = vld [vmem:[#allocation5 + $0x2a8] sm:$0xff]  ;;  %v2561_v38 = vpack.c.bf16 %v152_v33, %v140_v32  ;;  %v177_v40 = vld [vmem:[#allocation5 + $0x2b8] sm:$0xff]  ;;  %v162_v41 = vld [vmem:[#allocation5 + $0x240] sm:$0xff] }
  0x42   :  { %2558 = vmatpush1.bf16.msra.mxu1 %v2557_v25  ;;  %2432 = vmatprep.subr.bf16.mxu0 %v2431_v26  ;;  %v2435_v39 = vpack.c.bf16 %v175_v36, %v163_v35  ;;  %v174_v42 = vld [vmem:[#allocation5 + $0x2a0] sm:$0xff]  ;;  %v2563_v43 = vpack.c.bf16 %v177_v40, %v165_v37  ;;  %v164_v44 = vld [vmem:[#allocation5 + $0x250] sm:$0xff]  ;;  %v187_v46 = vld [vmem:[#allocation5 + $0x308] sm:$0xff] }
  0x43   :  { %2560 = vmatprep.subr.bf16.mxu1 %v2559_v30  ;;  %v176_v45 = vld [vmem:[#allocation5 + $0x2b0] sm:$0xff]  ;;  %v199_v47 = vld [vmem:[#allocation5 + $0x368] sm:$0xff]  ;;  %v189_v48 = vld [vmem:[#allocation5 + $0x318] sm:$0xff]  ;;  %v2437_v50 = vpack.c.bf16 %v174_v42, %v162_v41 }
  0x44   :  { %v201_v49 = vld [vmem:[#allocation5 + $0x378] sm:$0xff]  ;;  %v2565_v51 = vpack.c.bf16 %v176_v45, %v164_v44  ;;  %v2439_v52 = vpack.c.bf16 %v199_v47, %v187_v46  ;;  %v186_v53 = vld [vmem:[#allocation5 + $0x300] sm:$0xff]  ;;  %v188_v55 = vld [vmem:[#allocation5 + $0x310] sm:$0xff] }
  0x45   :  { %2434 = vmatpush1.bf16.msra.mxu0 %v2433_v34  ;;  %v198_v54 = vld [vmem:[#allocation5 + $0x360] sm:$0xff]  ;;  %v2567_v56 = vpack.c.bf16 %v201_v49, %v189_v48  ;;  %v200_v57 = vld [vmem:[#allocation5 + $0x370] sm:$0xff]  ;;  %v211_v58 = vld [vmem:[#allocation5 + $0x3c8] sm:$0xff] }
  0x46   :  { %2562 = vmatpush1.bf16.msra.mxu1 %v2561_v38  ;;  %2436 = vmatprep.subr.bf16.mxu0 %v2435_v39  ;;  %v223_v59 = vld [vmem:[#allocation5 + $0x428] sm:$0xff]  ;;  %v213_v60 = vld [vmem:[#allocation5 + $0x3d8] sm:$0xff]  ;;  %v2441_v62 = vpack.c.bf16 %v198_v54, %v186_v53  ;;  %v2569_v63 = vpack.c.bf16 %v200_v57, %v188_v55  ;;  %v210_v1 = vld [vmem:[#allocation5 + $0x3c0] sm:$0xff] }
  0x47   :  { %2564 = vmatprep.subr.bf16.mxu1 %v2563_v43  ;;  %v225_v61 = vld [vmem:[#allocation5 + $0x438] sm:$0xff]  ;;  %v2443_v0 = vpack.c.bf16 %v223_v59, %v211_v58  ;;  %v222_v2 = vld [vmem:[#allocation5 + $0x420] sm:$0xff]  ;;  %v212_v3 = vld [vmem:[#allocation5 + $0x3d0] sm:$0xff] }
  0x48   :  { %v2571_v4 = vpack.c.bf16 %v225_v61, %v213_v60  ;;  %v224_v5 = vld [vmem:[#allocation5 + $0x430] sm:$0xff]  ;;  %v235_v6 = vld [vmem:[#allocation5 + $0x488] sm:$0xff]  ;;  %v237_v8 = vld [vmem:[#allocation5 + $0x498] sm:$0xff]  ;;  %v2445_v10 = vpack.c.bf16 %v222_v2, %v210_v1 }
  0x49   :  { %2438 = vmatpush1.bf16.msra.mxu0 %v2437_v50  ;;  %v247_v7 = vld [vmem:[#allocation5 + $0x4e8] sm:$0xff]  ;;  %v249_v9 = vld [vmem:[#allocation5 + $0x4f8] sm:$0xff]  ;;  %v2573_v11 = vpack.c.bf16 %v224_v5, %v212_v3  ;;  %v234_v13 = vld [vmem:[#allocation5 + $0x480] sm:$0xff] }
  0x4a   :  { %2566 = vmatpush1.bf16.msra.mxu1 %v2565_v51  ;;  %2440 = vmatprep.subr.bf16.mxu0 %v2439_v52  ;;  %v2447_v12 = vpack.c.bf16 %v247_v7, %v235_v6  ;;  %v246_v14 = vld [vmem:[#allocation5 + $0x4e0] sm:$0xff]  ;;  %v236_v15 = vld [vmem:[#allocation5 + $0x490] sm:$0xff]  ;;  %v2575_v16 = vpack.c.bf16 %v249_v9, %v237_v8  ;;  %v259_v18 = vld [vmem:[#allocation5 + $0x548] sm:$0xff] }
  0x4b   :  { %2568 = vmatprep.subr.bf16.mxu1 %v2567_v56  ;;  %v248_v17 = vld [vmem:[#allocation5 + $0x4f0] sm:$0xff]  ;;  %v271_v19 = vld [vmem:[#allocation5 + $0x5a8] sm:$0xff]  ;;  %v261_v20 = vld [vmem:[#allocation5 + $0x558] sm:$0xff]  ;;  %v2449_v22 = vpack.c.bf16 %v246_v14, %v234_v13 }
  0x4c   :  { %v273_v21 = vld [vmem:[#allocation5 + $0x5b8] sm:$0xff]  ;;  %v2577_v23 = vpack.c.bf16 %v248_v17, %v236_v15  ;;  %v2451_v24 = vpack.c.bf16 %v271_v19, %v259_v18  ;;  %v258_v25 = vld [vmem:[#allocation5 + $0x540] sm:$0xff]  ;;  %v260_v27 = vld [vmem:[#allocation5 + $0x550] sm:$0xff] }
  0x4d   :  { %2442 = vmatpush1.bf16.msra.mxu0 %v2441_v62  ;;  %v270_v26 = vld [vmem:[#allocation5 + $0x5a0] sm:$0xff]  ;;  %v2579_v28 = vpack.c.bf16 %v273_v21, %v261_v20  ;;  %v272_v29 = vld [vmem:[#allocation5 + $0x5b0] sm:$0xff]  ;;  %v283_v30 = vld [vmem:[#allocation5 + $0x608] sm:$0xff] }
  0x4e   :  { %2570 = vmatpush1.bf16.msra.mxu1 %v2569_v63  ;;  %2444 = vmatprep.subr.bf16.mxu0 %v2443_v0  ;;  %v295_v31 = vld [vmem:[#allocation5 + $0x668] sm:$0xff]  ;;  %v285_v32 = vld [vmem:[#allocation5 + $0x618] sm:$0xff]  ;;  %v2453_v34 = vpack.c.bf16 %v270_v26, %v258_v25  ;;  %v2581_v35 = vpack.c.bf16 %v272_v29, %v260_v27  ;;  %v282_v37 = vld [vmem:[#allocation5 + $0x600] sm:$0xff] }
  0x4f   :  { %2572 = vmatprep.subr.bf16.mxu1 %v2571_v4  ;;  %v297_v33 = vld [vmem:[#allocation5 + $0x678] sm:$0xff]  ;;  %v2455_v36 = vpack.c.bf16 %v295_v31, %v283_v30  ;;  %v294_v38 = vld [vmem:[#allocation5 + $0x660] sm:$0xff]  ;;  %v284_v39 = vld [vmem:[#allocation5 + $0x610] sm:$0xff] }
  0x50   :  { %v2583_v40 = vpack.c.bf16 %v297_v33, %v285_v32  ;;  %v296_v41 = vld [vmem:[#allocation5 + $0x670] sm:$0xff]  ;;  %v307_v42 = vld [vmem:[#allocation5 + $0x6c8] sm:$0xff]  ;;  %v309_v44 = vld [vmem:[#allocation5 + $0x6d8] sm:$0xff]  ;;  %v2457_v46 = vpack.c.bf16 %v294_v38, %v282_v37 }
  0x51   :  { %2446 = vmatpush1.bf16.msra.mxu0 %v2445_v10  ;;  %v319_v43 = vld [vmem:[#allocation5 + $0x728] sm:$0xff]  ;;  %v321_v45 = vld [vmem:[#allocation5 + $0x738] sm:$0xff]  ;;  %v2585_v47 = vpack.c.bf16 %v296_v41, %v284_v39  ;;  %v306_v49 = vld [vmem:[#allocation5 + $0x6c0] sm:$0xff] }
  0x52   :  { %2574 = vmatpush1.bf16.msra.mxu1 %v2573_v11  ;;  %2448 = vmatprep.subr.bf16.mxu0 %v2447_v12  ;;  %v2459_v48 = vpack.c.bf16 %v319_v43, %v307_v42  ;;  %v318_v50 = vld [vmem:[#allocation5 + $0x720] sm:$0xff]  ;;  %v308_v51 = vld [vmem:[#allocation5 + $0x6d0] sm:$0xff]  ;;  %v2587_v52 = vpack.c.bf16 %v321_v45, %v309_v44  ;;  %v331_v54 = vld [vmem:[#allocation5 + $0x788] sm:$0xff] }
  0x53   :  { %2576 = vmatprep.subr.bf16.mxu1 %v2575_v16  ;;  %v320_v53 = vld [vmem:[#allocation5 + $0x730] sm:$0xff]  ;;  %v343_v55 = vld [vmem:[#allocation5 + $0x7e8] sm:$0xff]  ;;  %v333_v56 = vld [vmem:[#allocation5 + $0x798] sm:$0xff]  ;;  %v2461_v58 = vpack.c.bf16 %v318_v50, %v306_v49 }
  0x54   :  { %v345_v57 = vld [vmem:[#allocation5 + $0x7f8] sm:$0xff]  ;;  %v2589_v59 = vpack.c.bf16 %v320_v53, %v308_v51  ;;  %v2463_v60 = vpack.c.bf16 %v343_v55, %v331_v54  ;;  %v330_v61 = vld [vmem:[#allocation5 + $0x780] sm:$0xff]  ;;  %v332_v63 = vld [vmem:[#allocation5 + $0x790] sm:$0xff] }
  0x55   :  { %2450 = vmatpush1.bf16.msra.mxu0 %v2449_v22  ;;  %v342_v62 = vld [vmem:[#allocation5 + $0x7e0] sm:$0xff]  ;;  %v2591_v0 = vpack.c.bf16 %v345_v57, %v333_v56  ;;  %v344_v1 = vld [vmem:[#allocation5 + $0x7f0] sm:$0xff]  ;;  %v355_v2 = vld [vmem:[#allocation5 + $0x848] sm:$0xff] }
  0x56   :  { %2578 = vmatpush1.bf16.msra.mxu1 %v2577_v23  ;;  %2452 = vmatprep.subr.bf16.mxu0 %v2451_v24  ;;  %v367_v3 = vld [vmem:[#allocation5 + $0x8a8] sm:$0xff]  ;;  %v357_v4 = vld [vmem:[#allocation5 + $0x858] sm:$0xff]  ;;  %v2465_v6 = vpack.c.bf16 %v342_v62, %v330_v61  ;;  %v354_v7 = vld [vmem:[#allocation5 + $0x840] sm:$0xff]  ;;  %v2593_v8 = vpack.c.bf16 %v344_v1, %v332_v63 }
  0x57   :  { %2580 = vmatprep.subr.bf16.mxu1 %v2579_v28  ;;  %v369_v5 = vld [vmem:[#allocation5 + $0x8b8] sm:$0xff]  ;;  %v2467_v9 = vpack.c.bf16 %v367_v3, %v355_v2  ;;  %v366_v10 = vld [vmem:[#allocation5 + $0x8a0] sm:$0xff]  ;;  %v356_v11 = vld [vmem:[#allocation5 + $0x850] sm:$0xff] }
  0x58   :  { %v368_v12 = vld [vmem:[#allocation5 + $0x8b0] sm:$0xff]  ;;  %v2595_v13 = vpack.c.bf16 %v369_v5, %v357_v4  ;;  %v379_v14 = vld [vmem:[#allocation5 + $0x908] sm:$0xff]  ;;  %v381_v17 = vld [vmem:[#allocation5 + $0x918] sm:$0xff]  ;;  %v2469_v19 = vpack.c.bf16 %v366_v10, %v354_v7 }
  0x59   :  { %2454 = vmatpush1.bf16.msra.mxu0 %v2453_v34  ;;  %v391_v15 = vld [vmem:[#allocation5 + $0x968] sm:$0xff]  ;;  %v393_v18 = vld [vmem:[#allocation5 + $0x978] sm:$0xff]  ;;  %v2597_v20 = vpack.c.bf16 %v368_v12, %v356_v11  ;;  %v378_v22 = vld [vmem:[#allocation5 + $0x900] sm:$0xff] }
  0x5a   :  { %2582 = vmatpush1.bf16.msra.mxu1 %v2581_v35  ;;  %2456 = vmatprep.subr.bf16.mxu0 %v2455_v36  ;;  %v59_v16 = vld [vmem:[#allocation2 + $0x8] sm:$0xff]  ;;  %v2471_v21 = vpack.c.bf16 %v391_v15, %v379_v14  ;;  %v390_v23 = vld [vmem:[#allocation5 + $0x960] sm:$0xff]  ;;  %v380_v24 = vld [vmem:[#allocation5 + $0x910] sm:$0xff]  ;;  %v2599_v25 = vpack.c.bf16 %v393_v18, %v381_v17 }
  0x5b   :  { %2584 = vmatprep.subr.bf16.mxu1 %v2583_v40  ;;  %986 = vmatprep.mubr.f32.mxu0 %v59_v16  ;;  %v392_v26 = vld [vmem:[#allocation5 + $0x970] sm:$0xff]  ;;  %v403_v27 = vld [vmem:[#allocation5 + $0x9c8] sm:$0xff]  ;;  %v405_v29 = vld [vmem:[#allocation5 + $0x9d8] sm:$0xff]  ;;  %v2473_v31 = vpack.c.bf16 %v390_v23, %v378_v22 }
  0x5c   :  { %1212 = vmatprep.mubr.f32.mxu1 %v59_v16  ;;  %v415_v28 = vld [vmem:[#allocation5 + $0xa28] sm:$0xff]  ;;  %v417_v30 = vld [vmem:[#allocation5 + $0xa38] sm:$0xff]  ;;  %v2601_v32 = vpack.c.bf16 %v392_v26, %v380_v24  ;;  %v402_v34 = vld [vmem:[#allocation5 + $0x9c0] sm:$0xff] }
  0x5d   :  { %2458 = vmatpush1.bf16.msra.mxu0 %v2457_v46  ;;  %v2475_v33 = vpack.c.bf16 %v415_v28, %v403_v27  ;;  %v414_v35 = vld [vmem:[#allocation5 + $0xa20] sm:$0xff]  ;;  %v404_v36 = vld [vmem:[#allocation5 + $0x9d0] sm:$0xff]  ;;  %v2603_v37 = vpack.c.bf16 %v417_v30, %v405_v29  ;;  %v427_v39 = vld [vmem:[#allocation5 + $0xa88] sm:$0xff] }
  0x5e   :  { %2586 = vmatpush1.bf16.msra.mxu1 %v2585_v47  ;;  %2460 = vmatprep.subr.bf16.mxu0 %v2459_v48  ;;  %v416_v38 = vld [vmem:[#allocation5 + $0xa30] sm:$0xff]  ;;  %v439_v40 = vld [vmem:[#allocation5 + $0xae8] sm:$0xff]  ;;  %v429_v41 = vld [vmem:[#allocation5 + $0xa98] sm:$0xff]  ;;  %v2477_v43 = vpack.c.bf16 %v414_v35, %v402_v34 }
  0x5f   :  { %2588 = vmatprep.subr.bf16.mxu1 %v2587_v52  ;;  %v441_v42 = vld [vmem:[#allocation5 + $0xaf8] sm:$0xff]  ;;  %v2605_v44 = vpack.c.bf16 %v416_v38, %v404_v36  ;;  %v2479_v45 = vpack.c.bf16 %v439_v40, %v427_v39  ;;  %v426_v46 = vld [vmem:[#allocation5 + $0xa80] sm:$0xff]  ;;  %v428_v48 = vld [vmem:[#allocation5 + $0xa90] sm:$0xff] }
  0x60   :  { %v438_v47 = vld [vmem:[#allocation5 + $0xae0] sm:$0xff]  ;;  %v2607_v49 = vpack.c.bf16 %v441_v42, %v429_v41  ;;  %v440_v50 = vld [vmem:[#allocation5 + $0xaf0] sm:$0xff]  ;;  %v451_v51 = vld [vmem:[#allocation5 + $0xb48] sm:$0xff] }
  0x61   :  { %2462 = vmatpush1.bf16.msra.mxu0 %v2461_v58  ;;  %v463_v52 = vld [vmem:[#allocation5 + $0xba8] sm:$0xff]  ;;  %v453_v53 = vld [vmem:[#allocation5 + $0xb58] sm:$0xff]  ;;  %v2481_v55 = vpack.c.bf16 %v438_v47, %v426_v46  ;;  %v2609_v56 = vpack.c.bf16 %v440_v50, %v428_v48  ;;  %v450_v58 = vld [vmem:[#allocation5 + $0xb40] sm:$0xff] }
  0x62   :  { %2590 = vmatpush1.bf16.msra.mxu1 %v2589_v59  ;;  %2464 = vmatprep.subr.bf16.mxu0 %v2463_v60  ;;  %v465_v54 = vld [vmem:[#allocation5 + $0xbb8] sm:$0xff]  ;;  %v2483_v57 = vpack.c.bf16 %v463_v52, %v451_v51  ;;  %v462_v59 = vld [vmem:[#allocation5 + $0xba0] sm:$0xff]  ;;  %v452_v60 = vld [vmem:[#allocation5 + $0xb50] sm:$0xff] }
  0x63   :  { %2592 = vmatprep.subr.bf16.mxu1 %v2591_v0  ;;  %v2611_v61 = vpack.c.bf16 %v465_v54, %v453_v53  ;;  %v464_v62 = vld [vmem:[#allocation5 + $0xbb0] sm:$0xff]  ;;  %v475_v63 = vld [vmem:[#allocation5 + $0xc08] sm:$0xff]  ;;  %v477_v1 = vld [vmem:[#allocation5 + $0xc18] sm:$0xff]  ;;  %v2485_v3 = vpack.c.bf16 %v462_v59, %v450_v58 }
  0x64   :  { %v487_v0 = vld [vmem:[#allocation5 + $0xc68] sm:$0xff]  ;;  %v489_v2 = vld [vmem:[#allocation5 + $0xc78] sm:$0xff]  ;;  %v2613_v4 = vpack.c.bf16 %v464_v62, %v452_v60  ;;  %v486_v7 = vld [vmem:[#allocation5 + $0xc60] sm:$0xff] }
  0x65   :  { %2466 = vmatpush1.bf16.msra.mxu0 %v2465_v6  ;;  %v2487_v5 = vpack.c.bf16 %v487_v0, %v475_v63  ;;  %v474_v6 = vld [vmem:[#allocation5 + $0xc00] sm:$0xff]  ;;  %v488_v10 = vld [vmem:[#allocation5 + $0xc70] sm:$0xff]  ;;  %v499_v11 = vld [vmem:[#allocation5 + $0xcc8] sm:$0xff] }
  0x66   :  { %2594 = vmatpush1.bf16.msra.mxu1 %v2593_v8  ;;  %2468 = vmatprep.subr.bf16.mxu0 %v2467_v9  ;;  %v476_v8 = vld [vmem:[#allocation5 + $0xc10] sm:$0xff]  ;;  %v2615_v9 = vpack.c.bf16 %v489_v2, %v477_v1  ;;  %v511_v12 = vld [vmem:[#allocation5 + $0xd28] sm:$0xff]  ;;  %v513_v14 = vld [vmem:[#allocation5 + $0xd38] sm:$0xff]  ;;  %v2489_v16 = vpack.c.bf16 %v486_v7, %v474_v6 }
  0x67   :  { %2596 = vmatprep.subr.bf16.mxu1 %v2595_v13  ;;  %v501_v13 = vld [vmem:[#allocation5 + $0xcd8] sm:$0xff]  ;;  %v58_v15 = vld [vmem:[#allocation2] sm:$0xff]  ;;  %v2617_v17 = vpack.c.bf16 %v488_v10, %v476_v8  ;;  %v2491_v18 = vpack.c.bf16 %v511_v12, %v499_v11  ;;  %v512_v23 = vld [vmem:[#allocation5 + $0xd30] sm:$0xff] }
  0x68   :  { %v2619_v22 = vpack.c.bf16 %v513_v14, %v501_v13  ;;  %v523_v24 = vld [vmem:[#allocation5 + $0xd88] sm:$0xff]  ;;  %v525_v26 = vld [vmem:[#allocation5 + $0xd98] sm:$0xff]  ;;  %v62_v30 = vld [vmem:[#allocation2 + $0x20] sm:$0xff] }
  0x69   :  { %2470 = vmatpush1.bf16.msra.mxu0 %v2469_v19  ;;  %v498_v19 = vld [vmem:[#allocation5 + $0xcc0] sm:$0xff]  ;;  %v537_v27 = vld [vmem:[#allocation5 + $0xdf8] sm:$0xff]  ;;  %v63_v28 = vld [vmem:[#allocation2 + $0x28] sm:$0xff] }
  0x6a   :  { %2598 = vmatpush1.bf16.msra.mxu1 %v2597_v20  ;;  %2472 = vmatprep.subr.bf16.mxu0 %v2471_v21  ;;  %v510_v20 = vld [vmem:[#allocation5 + $0xd20] sm:$0xff]  ;;  %v500_v21 = vld [vmem:[#allocation5 + $0xcd0] sm:$0xff]  ;;  %v2623_v36 = vpack.c.bf16 %v537_v27, %v525_v26  ;;  %v547_v38 = vld [vmem:[#allocation5 + $0xe48] sm:$0xff] }
  0x6b   :  { %2600 = vmatprep.subr.bf16.mxu1 %v2599_v25  ;;  %v535_v25 = vld [vmem:[#allocation5 + $0xde8] sm:$0xff]  ;;  %v2493_v29 = vpack.c.bf16 %v510_v20, %v498_v19  ;;  %v534_v34 = vld [vmem:[#allocation5 + $0xde0] sm:$0xff]  ;;  %v524_v35 = vld [vmem:[#allocation5 + $0xd90] sm:$0xff] }
  0x6c   :  { %v559_v39 = vld [vmem:[#allocation5 + $0xea8] sm:$0xff]  ;;  %v549_v40 = vld [vmem:[#allocation5 + $0xe58] sm:$0xff]  ;;  %v546_v47 = vld [vmem:[#allocation5 + $0xe40] sm:$0xff] }
  0x6d   :  { %2474 = vmatpush1.bf16.msra.mxu0 %v2473_v31  ;;  %v2621_v31 = vpack.c.bf16 %v512_v23, %v500_v21  ;;  %v561_v41 = vld [vmem:[#allocation5 + $0xeb8] sm:$0xff]  ;;  %v67_v42 = vld [vmem:[#allocation2 + $0x48] sm:$0xff]  ;;  %v2499_v46 = vpack.c.bf16 %v559_v39, %v547_v38  ;;  %v558_v48 = vld [vmem:[#allocation5 + $0xea0] sm:$0xff] }
  0x6e   :  { %2602 = vmatpush1.bf16.msra.mxu1 %v2601_v32  ;;  %2476 = vmatprep.subr.bf16.mxu0 %v2475_v33  ;;  %v2495_v32 = vpack.c.bf16 %v535_v25, %v523_v24  ;;  %v522_v33 = vld [vmem:[#allocation5 + $0xd80] sm:$0xff]  ;;  %v2627_v50 = vpack.c.bf16 %v561_v41, %v549_v40  ;;  %v560_v51 = vld [vmem:[#allocation5 + $0xeb0] sm:$0xff]  ;;  %v571_v52 = vld [vmem:[#allocation5 + $0xf08] sm:$0xff] }
  0x6f   :  { %2604 = vmatprep.subr.bf16.mxu1 %v2603_v37  ;;  %v536_v37 = vld [vmem:[#allocation5 + $0xdf0] sm:$0xff]  ;;  %v583_v53 = vld [vmem:[#allocation5 + $0xf68] sm:$0xff]  ;;  %v573_v54 = vld [vmem:[#allocation5 + $0xf18] sm:$0xff] }
  0x70   :  { %v70_v58 = vld [vmem:[#allocation2 + $0x60] sm:$0xff]  ;;  %v2503_v60 = vpack.c.bf16 %v583_v53, %v571_v52  ;;  %v572_v63 = vld [vmem:[#allocation5 + $0xf10] sm:$0xff]  ;;  %v595_v2 = vld [vmem:[#allocation5 + $0xfc8] sm:$0xff] }
  0x71   :  { %2478 = vmatpush1.bf16.msra.mxu0 %v2477_v43  ;;  %v2497_v43 = vpack.c.bf16 %v534_v34, %v522_v33  ;;  %v582_v62 = vld [vmem:[#allocation5 + $0xf60] sm:$0xff]  ;;  %v584_v1 = vld [vmem:[#allocation5 + $0xf70] sm:$0xff]  ;;  %v75_v6 = vld [vmem:[#allocation2 + $0x88] sm:$0xff] }
  0x72   :  { %2606 = vmatpush1.bf16.msra.mxu1 %v2605_v44  ;;  %2480 = vmatprep.subr.bf16.mxu0 %v2479_v45  ;;  %v66_v44 = vld [vmem:[#allocation2 + $0x40] sm:$0xff]  ;;  %v2625_v45 = vpack.c.bf16 %v536_v37, %v524_v35  ;;  %v596_v13 = vld [vmem:[#allocation5 + $0xfd0] sm:$0xff]  ;;  %v633_v19 = vld [vmem:[#allocation5 + $0x10f8] sm:$0xff] }
  0x73   :  { %2608 = vmatprep.subr.bf16.mxu1 %v2607_v49  ;;  %v548_v49 = vld [vmem:[#allocation5 + $0xe50] sm:$0xff]  ;;  %v74_v8 = vld [vmem:[#allocation2 + $0x80] sm:$0xff]  ;;  %v79_v20 = vld [vmem:[#allocation2 + $0xa8] sm:$0xff] }
  0x74   :  { %v2629_v59 = vpack.c.bf16 %v560_v51, %v548_v49  ;;  %v594_v11 = vld [vmem:[#allocation5 + $0xfc0] sm:$0xff]  ;;  %v620_v27 = vld [vmem:[#allocation5 + $0x1090] sm:$0xff]  ;;  %v657_v33 = vld [vmem:[#allocation5 + $0x11b8] sm:$0xff] }
  0x75   :  { %2482 = vmatpush1.bf16.msra.mxu0 %v2481_v55  ;;  %v585_v55 = vld [vmem:[#allocation5 + $0xf78] sm:$0xff]  ;;  %v606_v12 = vld [vmem:[#allocation5 + $0x1020] sm:$0xff]  ;;  %v83_v34 = vld [vmem:[#allocation2 + $0xc8] sm:$0xff] }
  0x76   :  { %2610 = vmatpush1.bf16.msra.mxu1 %v2609_v56  ;;  %2484 = vmatprep.subr.bf16.mxu0 %v2483_v57  ;;  %v71_v56 = vld [vmem:[#allocation2 + $0x68] sm:$0xff]  ;;  %v2501_v57 = vpack.c.bf16 %v558_v48, %v546_v47  ;;  %v2631_v0 = vpack.c.bf16 %v585_v55, %v573_v54  ;;  %v2509_v21 = vpack.c.bf16 %v606_v12, %v594_v11  ;;  %v618_v25 = vld [vmem:[#allocation5 + $0x1080] sm:$0xff]  ;;  %v644_v41 = vld [vmem:[#allocation5 + $0x1150] sm:$0xff] }
  0x77   :  { %2612 = vmatprep.subr.bf16.mxu1 %v2611_v61  ;;  %v570_v61 = vld [vmem:[#allocation5 + $0xf00] sm:$0xff]  ;;  %v681_v47 = vld [vmem:[#allocation5 + $0x1278] sm:$0xff]  ;;  %v87_v48 = vld [vmem:[#allocation2 + $0xe8] sm:$0xff] }
  0x78   :  { %v2505_v7 = vpack.c.bf16 %v582_v62, %v570_v61  ;;  %v630_v26 = vld [vmem:[#allocation5 + $0x10e0] sm:$0xff]  ;;  %v668_v55 = vld [vmem:[#allocation5 + $0x1210] sm:$0xff]  ;;  %v705_v61 = vld [vmem:[#allocation5 + $0x1338] sm:$0xff] }
  0x79   :  { %2486 = vmatpush1.bf16.msra.mxu0 %v2485_v3  ;;  %v607_v3 = vld [vmem:[#allocation5 + $0x1028] sm:$0xff]  ;;  %v2513_v35 = vpack.c.bf16 %v630_v26, %v618_v25  ;;  %v642_v39 = vld [vmem:[#allocation5 + $0x1140] sm:$0xff]  ;;  %v61_v62 = vld [vmem:[#allocation2 + $0x18] sm:$0xff] }
  0x7a   :  { %2614 = vmatpush1.bf16.msra.mxu1 %v2613_v4  ;;  %2488 = vmatprep.subr.bf16.mxu0 %v2487_v5  ;;  %v597_v4 = vld [vmem:[#allocation5 + $0xfd8] sm:$0xff]  ;;  %v2507_v10 = vpack.c.bf16 %v607_v3, %v595_v2  ;;  %v654_v40 = vld [vmem:[#allocation5 + $0x11a0] sm:$0xff] }
  0x7b   :  { %2616 = vmatprep.subr.bf16.mxu1 %v2615_v9  ;;  %v609_v5 = vld [vmem:[#allocation5 + $0x1038] sm:$0xff]  ;;  %v2633_v9 = vpack.c.bf16 %v584_v1, %v572_v63  ;;  %v2517_v49 = vpack.c.bf16 %v654_v40, %v642_v39  ;;  %v666_v53 = vld [vmem:[#allocation5 + $0x1200] sm:$0xff]  ;;  %v764_v40 = vld [vmem:[#allocation5 + $0x1510] sm:$0xff] }
  0x7c   :  { %987 = vmatmul.mubr.f32.vlgmr.msra.gmra.mrb[0].mxu0 %v58_v15  ;;  %v2635_v14 = vpack.c.bf16 %v609_v5, %v597_v4  ;;  %v678_v54 = vld [vmem:[#allocation5 + $0x1260] sm:$0xff]  ;;  %v692_v4 = vld [vmem:[#allocation5 + $0x12d0] sm:$0xff] }
  0x7d   :  { %2490 = vmatpush1.bf16.msra.mxu0 %v2489_v16  ;;  %1213 = vmatmul.mubr.f32.vlgmr.msra.gmra.mrb[0].mxu1 %v58_v15  ;;  %v608_v15 = vld [vmem:[#allocation5 + $0x1030] sm:$0xff]  ;;  %v619_v16 = vld [vmem:[#allocation5 + $0x1088] sm:$0xff]  ;;  %v2521_v63 = vpack.c.bf16 %v678_v54, %v666_v53  ;;  %v690_v2 = vld [vmem:[#allocation5 + $0x12c0] sm:$0xff] }
  0x7e   :  { %2618 = vmatpush1.bf16.msra.mxu1 %v2617_v17  ;;  %2492 = vmatprep.subr.bf16.mxu0 %v2491_v18  ;;  %v631_v17 = vld [vmem:[#allocation5 + $0x10e8] sm:$0xff]  ;;  %v621_v18 = vld [vmem:[#allocation5 + $0x1098] sm:$0xff]  ;;  %v2637_v23 = vpack.c.bf16 %v608_v15, %v596_v13  ;;  %v702_v3 = vld [vmem:[#allocation5 + $0x1320] sm:$0xff] }
  0x7f   :  { %2620 = vmatprep.subr.bf16.mxu1 %v2619_v22  ;;  %992 = vmatprep.mubr.f32.mxu0 %v63_v28  ;;  %v78_v22 = vld [vmem:[#allocation2 + $0xa0] sm:$0xff]  ;;  %v2511_v24 = vpack.c.bf16 %v631_v17, %v619_v16  ;;  %v2525_v11 = vpack.c.bf16 %v702_v3, %v690_v2  ;;  %v716_v16 = vld [vmem:[#allocation5 + $0x1390] sm:$0xff]  ;;  %v835_v3 = vld [vmem:[#allocation5 + $0x1748] sm:$0xff] }
  0x80   :  { %1218 = vmatprep.mubr.f32.mxu1 %v63_v28  ;;  %993 = vmatmul.mubr.f32.gmra.mrb[2].mxu0 %v62_v30  ;;  %v2639_v28 = vpack.c.bf16 %v633_v19, %v621_v18  ;;  %v726_v15 = vld [vmem:[#allocation5 + $0x13e0] sm:$0xff]  ;;  %v728_v18 = vld [vmem:[#allocation5 + $0x13f0] sm:$0xff]  ;;  %v739_v19 = vld [vmem:[#allocation5 + $0x1448] sm:$0xff] }
  0x81   :  { %2494 = vmatpush1.bf16.msra.mxu0 %v2493_v29  ;;  %1219 = vmatmul.mubr.f32.gmra.mrb[2].mxu1 %v62_v30  ;;  %v632_v29 = vld [vmem:[#allocation5 + $0x10f0] sm:$0xff]  ;;  %v643_v30 = vld [vmem:[#allocation5 + $0x1148] sm:$0xff]  ;;  %v738_v26 = vld [vmem:[#allocation5 + $0x1440] sm:$0xff] }
  0x82   :  { %2622 = vmatpush1.bf16.msra.mxu1 %v2621_v31  ;;  %2496 = vmatprep.subr.bf16.mxu0 %v2495_v32  ;;  %v655_v31 = vld [vmem:[#allocation5 + $0x11a8] sm:$0xff]  ;;  %v645_v32 = vld [vmem:[#allocation5 + $0x1158] sm:$0xff]  ;;  %v2641_v37 = vpack.c.bf16 %v632_v29, %v620_v27  ;;  %v750_v27 = vld [vmem:[#allocation5 + $0x14a0] sm:$0xff] }
  0x83   :  { %2624 = vmatprep.subr.bf16.mxu1 %v2623_v36  ;;  %998 = vmatprep.mubr.f32.mxu0 %v67_v42  ;;  %v82_v36 = vld [vmem:[#allocation2 + $0xc0] sm:$0xff]  ;;  %v2515_v38 = vpack.c.bf16 %v655_v31, %v643_v30  ;;  %v752_v30 = vld [vmem:[#allocation5 + $0x14b0] sm:$0xff]  ;;  %v763_v31 = vld [vmem:[#allocation5 + $0x1508] sm:$0xff] }
  0x84   :  { %1224 = vmatprep.mubr.f32.mxu1 %v67_v42  ;;  %999 = vmatmul.mubr.f32.gmra.mrb[4].mxu0 %v66_v44  ;;  %v2643_v42 = vpack.c.bf16 %v657_v33, %v645_v32  ;;  %v775_v32 = vld [vmem:[#allocation5 + $0x1568] sm:$0xff]  ;;  %v765_v33 = vld [vmem:[#allocation5 + $0x1518] sm:$0xff]  ;;  %v774_v39 = vld [vmem:[#allocation5 + $0x1560] sm:$0xff] }
  0x85   :  { %2498 = vmatpush1.bf16.msra.mxu0 %v2497_v43  ;;  %1225 = vmatmul.mubr.f32.gmra.mrb[4].mxu1 %v66_v44  ;;  %v656_v43 = vld [vmem:[#allocation5 + $0x11b0] sm:$0xff]  ;;  %v667_v44 = vld [vmem:[#allocation5 + $0x1208] sm:$0xff] }
  0x86   :  { %2626 = vmatpush1.bf16.msra.mxu1 %v2625_v45  ;;  %2500 = vmatprep.subr.bf16.mxu0 %v2499_v46  ;;  %v679_v45 = vld [vmem:[#allocation5 + $0x1268] sm:$0xff]  ;;  %v669_v46 = vld [vmem:[#allocation5 + $0x1218] sm:$0xff]  ;;  %v2645_v51 = vpack.c.bf16 %v656_v43, %v644_v41  ;;  %v800_v54 = vld [vmem:[#allocation5 + $0x1630] sm:$0xff] }
  0x87   :  { %2628 = vmatprep.subr.bf16.mxu1 %v2627_v50  ;;  %1004 = vmatprep.mubr.f32.mxu0 %v71_v56  ;;  %v86_v50 = vld [vmem:[#allocation2 + $0xe0] sm:$0xff]  ;;  %v2519_v52 = vpack.c.bf16 %v679_v45, %v667_v44  ;;  %v787_v43 = vld [vmem:[#allocation5 + $0x15c8] sm:$0xff]  ;;  %v789_v45 = vld [vmem:[#allocation5 + $0x15d8] sm:$0xff] }
  0x88   :  { %1230 = vmatprep.mubr.f32.mxu1 %v71_v56  ;;  %1005 = vmatmul.mubr.f32.gmra.mrb[6].mxu0 %v70_v58  ;;  %v2647_v56 = vpack.c.bf16 %v681_v47, %v669_v46  ;;  %v799_v44 = vld [vmem:[#allocation5 + $0x1628] sm:$0xff]  ;;  %v801_v46 = vld [vmem:[#allocation5 + $0x1638] sm:$0xff]  ;;  %v824_v2 = vld [vmem:[#allocation5 + $0x16f0] sm:$0xff] }
  0x89   :  { %2502 = vmatpush1.bf16.msra.mxu0 %v2501_v57  ;;  %1231 = vmatmul.mubr.f32.gmra.mrb[6].mxu1 %v70_v58  ;;  %v680_v57 = vld [vmem:[#allocation5 + $0x1270] sm:$0xff]  ;;  %v691_v58 = vld [vmem:[#allocation5 + $0x12c8] sm:$0xff]  ;;  %v2667_v53 = vpack.c.bf16 %v801_v46, %v789_v45  ;;  %v145_v45 = vld [vmem:[#allocation5 + $0x1b8] sm:$0xff] }
  0x8a   :  { %2630 = vmatpush1.bf16.msra.mxu1 %v2629_v59  ;;  %2504 = vmatprep.subr.bf16.mxu0 %v2503_v60  ;;  %v703_v59 = vld [vmem:[#allocation5 + $0x1328] sm:$0xff]  ;;  %v693_v60 = vld [vmem:[#allocation5 + $0x12d8] sm:$0xff] }
  0x8b   :  { %2632 = vmatprep.subr.bf16.mxu1 %v2631_v0  ;;  %1010 = vmatprep.mubr.f32.mxu0 %v75_v6  ;;  %v2649_v0 = vpack.c.bf16 %v680_v57, %v668_v55  ;;  %v2523_v1 = vpack.c.bf16 %v703_v59, %v691_v58  ;;  %v2651_v5 = vpack.c.bf16 %v705_v61, %v693_v60  ;;  %v811_v55 = vld [vmem:[#allocation5 + $0x1688] sm:$0xff]  ;;  %v813_v57 = vld [vmem:[#allocation5 + $0x1698] sm:$0xff] }
  0x8c   :  { %1236 = vmatprep.mubr.f32.mxu1 %v75_v6  ;;  %1011 = vmatmul.mubr.f32.gmra.mrb[8].mxu0 %v74_v8  ;;  %v704_v6 = vld [vmem:[#allocation5 + $0x1330] sm:$0xff]  ;;  %v825_v58 = vld [vmem:[#allocation5 + $0x16f8] sm:$0xff] }
  0x8d   :  { %2506 = vmatpush1.bf16.msra.mxu0 %v2505_v7  ;;  %1237 = vmatmul.mubr.f32.gmra.mrb[8].mxu1 %v74_v8  ;;  %v715_v7 = vld [vmem:[#allocation5 + $0x1388] sm:$0xff]  ;;  %v2653_v12 = vpack.c.bf16 %v704_v6, %v692_v4  ;;  %v849_v6 = vld [vmem:[#allocation5 + $0x17b8] sm:$0xff] }
  0x8e   :  { %2634 = vmatpush1.bf16.msra.mxu1 %v2633_v9  ;;  %2508 = vmatprep.subr.bf16.mxu0 %v2507_v10  ;;  %v727_v8 = vld [vmem:[#allocation5 + $0x13e8] sm:$0xff]  ;;  %v717_v9 = vld [vmem:[#allocation5 + $0x1398] sm:$0xff] }
  0x8f   :  { %2636 = vmatprep.subr.bf16.mxu1 %v2635_v14  ;;  %1016 = vmatprep.mubr.f32.mxu0 %v79_v20  ;;  %v729_v10 = vld [vmem:[#allocation5 + $0x13f8] sm:$0xff]  ;;  %v2527_v13 = vpack.c.bf16 %v727_v8, %v715_v7  ;;  %v714_v14 = vld [vmem:[#allocation5 + $0x1380] sm:$0xff]  ;;  %v847_v4 = vld [vmem:[#allocation5 + $0x17a8] sm:$0xff] }
  0x90   :  { %1242 = vmatprep.mubr.f32.mxu1 %v79_v20  ;;  %1017 = vmatmul.mubr.f32.gmra.mrb[10].mxu0 %v78_v22  ;;  %v2655_v17 = vpack.c.bf16 %v729_v10, %v717_v9  ;;  %v751_v20 = vld [vmem:[#allocation5 + $0x14a8] sm:$0xff]  ;;  %v2547_v9 = vpack.c.bf16 %v847_v4, %v835_v3  ;;  %v834_v10 = vld [vmem:[#allocation5 + $0x1740] sm:$0xff]  ;;  %v157_v46 = vld [vmem:[#allocation5 + $0x218] sm:$0xff] }
  0x91   :  { %2510 = vmatpush1.bf16.msra.mxu0 %v2509_v21  ;;  %1243 = vmatmul.mubr.f32.gmra.mrb[10].mxu1 %v78_v22  ;;  %v741_v21 = vld [vmem:[#allocation5 + $0x1458] sm:$0xff]  ;;  %v2531_v25 = vpack.c.bf16 %v751_v20, %v739_v19  ;;  %v180_v3 = vld [vmem:[#allocation5 + $0x2d0] sm:$0xff] }
  0x92   :  { %2638 = vmatpush1.bf16.msra.mxu1 %v2637_v23  ;;  %2512 = vmatprep.subr.bf16.mxu0 %v2511_v24  ;;  %v753_v22 = vld [vmem:[#allocation5 + $0x14b8] sm:$0xff]  ;;  %v2529_v23 = vpack.c.bf16 %v726_v15, %v714_v14  ;;  %v2657_v24 = vpack.c.bf16 %v728_v18, %v716_v16  ;;  %v848_v14 = vld [vmem:[#allocation5 + $0x17b0] sm:$0xff]  ;;  %v95_v15 = vld [vmem:[#allocation5 + $0x28] sm:$0xff] }
  0x93   :  { %2640 = vmatprep.subr.bf16.mxu1 %v2639_v28  ;;  %1022 = vmatprep.mubr.f32.mxu0 %v83_v34  ;;  %v740_v28 = vld [vmem:[#allocation5 + $0x1450] sm:$0xff]  ;;  %v2659_v29 = vpack.c.bf16 %v753_v22, %v741_v21  ;;  %v107_v16 = vld [vmem:[#allocation5 + $0x88] sm:$0xff]  ;;  %v109_v18 = vld [vmem:[#allocation5 + $0x98] sm:$0xff] }
  0x94   :  { %1248 = vmatprep.mubr.f32.mxu1 %v83_v34  ;;  %1023 = vmatmul.mubr.f32.gmra.mrb[12].mxu0 %v82_v36  ;;  %v777_v34 = vld [vmem:[#allocation5 + $0x1578] sm:$0xff]  ;;  %v2679_v21 = vpack.c.bf16 %v107_v16, %v95_v15  ;;  %v94_v22 = vld [vmem:[#allocation5 + $0x20] sm:$0xff]  ;;  %v192_v16 = vld [vmem:[#allocation5 + $0x330] sm:$0xff] }
  0x95   :  { %2514 = vmatpush1.bf16.msra.mxu0 %v2513_v35  ;;  %1249 = vmatmul.mubr.f32.gmra.mrb[12].mxu1 %v82_v36  ;;  %v2533_v35 = vpack.c.bf16 %v750_v27, %v738_v26  ;;  %v2661_v36 = vpack.c.bf16 %v752_v30, %v740_v28  ;;  %v2663_v41 = vpack.c.bf16 %v777_v34, %v765_v33  ;;  %v108_v26 = vld [vmem:[#allocation5 + $0x90] sm:$0xff]  ;;  %v119_v27 = vld [vmem:[#allocation5 + $0xe8] sm:$0xff]  ;;  %v118_v34 = vld [vmem:[#allocation5 + $0xe0] sm:$0xff] }
  0x96   :  { %2642 = vmatpush1.bf16.msra.mxu1 %v2641_v37  ;;  %2516 = vmatprep.subr.bf16.mxu0 %v2515_v38  ;;  %v2535_v37 = vpack.c.bf16 %v775_v32, %v763_v31  ;;  %v762_v38 = vld [vmem:[#allocation5 + $0x1500] sm:$0xff]  ;;  %v131_v28 = vld [vmem:[#allocation5 + $0x148] sm:$0xff]  ;;  %v121_v31 = vld [vmem:[#allocation5 + $0xf8] sm:$0xff] }
  0x97   :  { %2644 = vmatprep.subr.bf16.mxu1 %v2643_v42  ;;  %1028 = vmatprep.mubr.f32.mxu0 %v87_v48  ;;  %v776_v42 = vld [vmem:[#allocation5 + $0x1570] sm:$0xff]  ;;  %v2537_v47 = vpack.c.bf16 %v774_v39, %v762_v38  ;;  %v133_v32 = vld [vmem:[#allocation5 + $0x158] sm:$0xff] }
  0x98   :  { %1254 = vmatprep.mubr.f32.mxu1 %v87_v48  ;;  %1029 = vmatmul.mubr.f32.gmra.mrb[14].mxu0 %v86_v50  ;;  %v2665_v48 = vpack.c.bf16 %v776_v42, %v764_v40  ;;  %v120_v38 = vld [vmem:[#allocation5 + $0xf0] sm:$0xff]  ;;  %v2811_v40 = vpack.c.bf16 %v133_v32, %v121_v31  ;;  %v155_v42 = vld [vmem:[#allocation5 + $0x208] sm:$0xff] }
  0x99   :  { %2518 = vmatpush1.bf16.msra.mxu0 %v2517_v49  ;;  %1255 = vmatmul.mubr.f32.gmra.mrb[14].mxu1 %v86_v50  ;;  %v2539_v49 = vpack.c.bf16 %v799_v44, %v787_v43  ;;  %v786_v50 = vld [vmem:[#allocation5 + $0x15c0] sm:$0xff]  ;;  %v132_v39 = vld [vmem:[#allocation5 + $0x150] sm:$0xff] }
  0x9a   :  { %2646 = vmatpush1.bf16.msra.mxu1 %v2645_v51  ;;  %2520 = vmatprep.subr.bf16.mxu0 %v2519_v52  ;;  %v798_v51 = vld [vmem:[#allocation5 + $0x1620] sm:$0xff]  ;;  %v788_v52 = vld [vmem:[#allocation5 + $0x15d0] sm:$0xff] }
  0x9b   :  { %2648 = vmatprep.subr.bf16.mxu1 %v2647_v56  ;;  %1099 = vmatprep.mubr.f32.mxu0 %v61_v62  ;;  %v823_v56 = vld [vmem:[#allocation5 + $0x16e8] sm:$0xff]  ;;  %v2541_v59 = vpack.c.bf16 %v798_v51, %v786_v50  ;;  %v2669_v60 = vpack.c.bf16 %v800_v54, %v788_v52  ;;  %v64_v43 = vld [vmem:[#allocation2 + $0x30] sm:$0xff]  ;;  %v69_v50 = vld [vmem:[#allocation2 + $0x58] sm:$0xff]  ;;  %v2815_v54 = vpack.c.bf16 %v157_v46, %v145_v45 }
  0x9c   :  { %1325 = vmatprep.mubr.f32.mxu1 %v61_v62  ;;  %v2543_v61 = vpack.c.bf16 %v823_v56, %v811_v55  ;;  %v810_v62 = vld [vmem:[#allocation5 + $0x1680] sm:$0xff]  ;;  %v144_v52 = vld [vmem:[#allocation5 + $0x1b0] sm:$0xff]  ;;  %v167_v55 = vld [vmem:[#allocation5 + $0x268] sm:$0xff] }
  0x9d   :  { %2522 = vmatpush1.bf16.msra.mxu0 %v2521_v63  ;;  %v822_v63 = vld [vmem:[#allocation5 + $0x16e0] sm:$0xff]  ;;  %v179_v56 = vld [vmem:[#allocation5 + $0x2c8] sm:$0xff]  ;;  %v228_v31 = vld [vmem:[#allocation5 + $0x450] sm:$0xff] }
  0x9e   :  { %2650 = vmatpush1.bf16.msra.mxu1 %v2649_v0  ;;  %2524 = vmatprep.subr.bf16.mxu0 %v2523_v1  ;;  %v812_v0 = vld [vmem:[#allocation5 + $0x1690] sm:$0xff]  ;;  %v2671_v1 = vpack.c.bf16 %v825_v58, %v813_v57  ;;  %v2545_v7 = vpack.c.bf16 %v822_v63, %v810_v62  ;;  %v166_v62 = vld [vmem:[#allocation5 + $0x260] sm:$0xff] }
  0x9f   :  { %2652 = vmatprep.subr.bf16.mxu1 %v2651_v5  ;;  %v837_v5 = vld [vmem:[#allocation5 + $0x1758] sm:$0xff]  ;;  %v2673_v8 = vpack.c.bf16 %v824_v2, %v812_v0  ;;  %v68_v57 = vld [vmem:[#allocation2 + $0x50] sm:$0xff]  ;;  %v178_v63 = vld [vmem:[#allocation5 + $0x2c0] sm:$0xff] }
  0xa0   :  { %v73_v0 = vld [vmem:[#allocation2 + $0x78] sm:$0xff]  ;;  %v168_v2 = vld [vmem:[#allocation5 + $0x270] sm:$0xff] }
  0xa1   :  { %2526 = vmatpush1.bf16.msra.mxu0 %v2525_v11  ;;  %v846_v11 = vld [vmem:[#allocation5 + $0x17a0] sm:$0xff]  ;;  %v252_v45 = vld [vmem:[#allocation5 + $0x510] sm:$0xff] }
  0xa2   :  { %2654 = vmatpush1.bf16.msra.mxu1 %v2653_v12  ;;  %2528 = vmatprep.subr.bf16.mxu0 %v2527_v13  ;;  %v836_v12 = vld [vmem:[#allocation5 + $0x1750] sm:$0xff]  ;;  %v2675_v13 = vpack.c.bf16 %v849_v6, %v837_v5  ;;  %v2549_v19 = vpack.c.bf16 %v846_v11, %v834_v10  ;;  %v191_v5 = vld [vmem:[#allocation5 + $0x328] sm:$0xff]  ;;  %v205_v10 = vld [vmem:[#allocation5 + $0x398] sm:$0xff]  ;;  %v2821_v11 = vpack.c.bf16 %v180_v3, %v168_v2 }
  0xa3   :  { %2656 = vmatprep.subr.bf16.mxu1 %v2655_v17  ;;  %v97_v17 = vld [vmem:[#allocation5 + $0x38] sm:$0xff]  ;;  %v2677_v20 = vpack.c.bf16 %v848_v14, %v836_v12  ;;  %v203_v6 = vld [vmem:[#allocation5 + $0x388] sm:$0xff]  ;;  %v190_v12 = vld [vmem:[#allocation5 + $0x320] sm:$0xff] }
  0xa4   :  { %v77_v14 = vld [vmem:[#allocation2 + $0x98] sm:$0xff]  ;;  %v2695_v15 = vpack.c.bf16 %v203_v6, %v191_v5  ;;  %v84_v46 = vld [vmem:[#allocation2 + $0xd0] sm:$0xff]  ;;  %v286_v5 = vld [vmem:[#allocation5 + $0x620] sm:$0xff] }
  0xa5   :  { %2530 = vmatpush1.bf16.msra.mxu0 %v2529_v23  ;;  %v106_v23 = vld [vmem:[#allocation5 + $0x80] sm:$0xff] }
  0xa6   :  { %2658 = vmatpush1.bf16.msra.mxu1 %v2657_v24  ;;  %2532 = vmatprep.subr.bf16.mxu0 %v2531_v25  ;;  %v2807_v24 = vpack.c.bf16 %v109_v18, %v97_v17  ;;  %v96_v25 = vld [vmem:[#allocation5 + $0x30] sm:$0xff]  ;;  %v2681_v30 = vpack.c.bf16 %v106_v23, %v94_v22  ;;  %v217_v23 = vld [vmem:[#allocation5 + $0x3f8] sm:$0xff]  ;;  %v298_v6 = vld [vmem:[#allocation5 + $0x680] sm:$0xff] }
  0xa7   :  { %2660 = vmatprep.subr.bf16.mxu1 %v2659_v29  ;;  %v60_v29 = vld [vmem:[#allocation2 + $0x10] sm:$0xff]  ;;  %v2809_v33 = vpack.c.bf16 %v108_v26, %v96_v25  ;;  %v214_v26 = vld [vmem:[#allocation5 + $0x3e0] sm:$0xff] }
  0xa8   :  { %v204_v17 = vld [vmem:[#allocation5 + $0x390] sm:$0xff] }
  0xa9   :  { %2534 = vmatpush1.bf16.msra.mxu0 %v2533_v35  ;;  %v130_v35 = vld [vmem:[#allocation5 + $0x140] sm:$0xff]  ;;  %v2825_v25 = vpack.c.bf16 %v204_v17, %v192_v16 }
  0xaa   :  { %2662 = vmatpush1.bf16.msra.mxu1 %v2661_v36  ;;  %2536 = vmatprep.subr.bf16.mxu0 %v2535_v37  ;;  %v65_v36 = vld [vmem:[#allocation2 + $0x38] sm:$0xff]  ;;  %v2683_v37 = vpack.c.bf16 %v131_v28, %v119_v27  ;;  %v2685_v44 = vpack.c.bf16 %v130_v35, %v118_v34  ;;  %v226_v27 = vld [vmem:[#allocation5 + $0x440] sm:$0xff]  ;;  %v251_v34 = vld [vmem:[#allocation5 + $0x508] sm:$0xff] }
  0xab   :  { %2664 = vmatprep.subr.bf16.mxu1 %v2663_v41  ;;  %v143_v41 = vld [vmem:[#allocation5 + $0x1a8] sm:$0xff]  ;;  %v81_v28 = vld [vmem:[#allocation2 + $0xb8] sm:$0xff]  ;;  %v80_v35 = vld [vmem:[#allocation2 + $0xb0] sm:$0xff] }
  0xac   :  { %v2687_v51 = vpack.c.bf16 %v155_v42, %v143_v41  ;;  %v250_v41 = vld [vmem:[#allocation5 + $0x500] sm:$0xff]  ;;  %v85_v42 = vld [vmem:[#allocation2 + $0xd8] sm:$0xff] }
  0xad   :  { %2538 = vmatpush1.bf16.msra.mxu0 %v2537_v47  ;;  %v2813_v47 = vpack.c.bf16 %v132_v39, %v120_v38  ;;  %v253_v38 = vld [vmem:[#allocation5 + $0x518] sm:$0xff]  ;;  %v310_v17 = vld [vmem:[#allocation5 + $0x6e0] sm:$0xff] }
  0xae   :  { %2666 = vmatpush1.bf16.msra.mxu1 %v2665_v48  ;;  %2540 = vmatprep.subr.bf16.mxu0 %v2539_v49  ;;  %v142_v48 = vld [vmem:[#allocation5 + $0x1a0] sm:$0xff] }
  0xaf   :  { %2668 = vmatprep.subr.bf16.mxu1 %v2667_v53  ;;  %v154_v49 = vld [vmem:[#allocation5 + $0x200] sm:$0xff]  ;;  %v156_v53 = vld [vmem:[#allocation5 + $0x210] sm:$0xff] }
  0xb0   :  { %v2689_v58 = vpack.c.bf16 %v154_v49, %v142_v48  ;;  %v263_v48 = vld [vmem:[#allocation5 + $0x568] sm:$0xff] }
  0xb1   :  { %2542 = vmatpush1.bf16.msra.mxu0 %v2541_v59  ;;  %v169_v59 = vld [vmem:[#allocation5 + $0x278] sm:$0xff]  ;;  %v275_v49 = vld [vmem:[#allocation5 + $0x5c8] sm:$0xff] }
  0xb2   :  { %2670 = vmatpush1.bf16.msra.mxu1 %v2669_v60  ;;  %2544 = vmatprep.subr.bf16.mxu0 %v2543_v61  ;;  %v181_v60 = vld [vmem:[#allocation5 + $0x2d8] sm:$0xff]  ;;  %v2817_v61 = vpack.c.bf16 %v156_v53, %v144_v52 }
  0xb3   :  { %2672 = vmatprep.subr.bf16.mxu1 %v2671_v1  ;;  %v2691_v1 = vpack.c.bf16 %v179_v56, %v167_v55  ;;  %v2819_v4 = vpack.c.bf16 %v181_v60, %v169_v59  ;;  %v265_v52 = vld [vmem:[#allocation5 + $0x578] sm:$0xff]  ;;  %v262_v55 = vld [vmem:[#allocation5 + $0x560] sm:$0xff]  ;;  %v276_v59 = vld [vmem:[#allocation5 + $0x5d0] sm:$0xff] }
  0xb4   :  { %v277_v53 = vld [vmem:[#allocation5 + $0x5d8] sm:$0xff]  ;;  %v274_v56 = vld [vmem:[#allocation5 + $0x5c0] sm:$0xff]  ;;  %v287_v60 = vld [vmem:[#allocation5 + $0x628] sm:$0xff] }
  0xb5   :  { %2546 = vmatpush1.bf16.msra.mxu0 %v2545_v7  ;;  %v72_v7 = vld [vmem:[#allocation2 + $0x70] sm:$0xff]  ;;  %v2709_v2 = vpack.c.bf16 %v274_v56, %v262_v55  ;;  %v394_v55 = vld [vmem:[#allocation5 + $0x980] sm:$0xff] }
  0xb6   :  { %2674 = vmatpush1.bf16.msra.mxu1 %v2673_v8  ;;  %2548 = vmatprep.subr.bf16.mxu0 %v2547_v9  ;;  %v2693_v8 = vpack.c.bf16 %v178_v63, %v166_v62  ;;  %v193_v9 = vld [vmem:[#allocation5 + $0x338] sm:$0xff]  ;;  %v2835_v62 = vpack.c.bf16 %v277_v53, %v265_v52  ;;  %v384_v56 = vld [vmem:[#allocation5 + $0x930] sm:$0xff] }
  0xb7   :  { %2676 = vmatprep.subr.bf16.mxu1 %v2675_v13  ;;  %v202_v13 = vld [vmem:[#allocation5 + $0x380] sm:$0xff]  ;;  %v2823_v18 = vpack.c.bf16 %v205_v10, %v193_v9  ;;  %v289_v63 = vld [vmem:[#allocation5 + $0x638] sm:$0xff]  ;;  %v300_v9 = vld [vmem:[#allocation5 + $0x690] sm:$0xff] }
  0xb8   :  { %v2697_v22 = vpack.c.bf16 %v202_v13, %v190_v12  ;;  %v311_v10 = vld [vmem:[#allocation5 + $0x6e8] sm:$0xff]  ;;  %v313_v12 = vld [vmem:[#allocation5 + $0x6f8] sm:$0xff] }
  0xb9   :  { %2550 = vmatpush1.bf16.msra.mxu0 %v2549_v19  ;;  %v215_v19 = vld [vmem:[#allocation5 + $0x3e8] sm:$0xff]  ;;  %v325_v13 = vld [vmem:[#allocation5 + $0x758] sm:$0xff] }
  0xba   :  { %2678 = vmatpush1.bf16.msra.mxu1 %v2677_v20  ;;  %2680 = vmatprep.subr.bf16.mxu0 %v2679_v21  ;;  %v227_v20 = vld [vmem:[#allocation5 + $0x448] sm:$0xff]  ;;  %v76_v21 = vld [vmem:[#allocation2 + $0x90] sm:$0xff] }
  0xbb   :  { %2808 = vmatprep.subr.bf16.mxu1 %v2807_v24  ;;  %v229_v24 = vld [vmem:[#allocation5 + $0x458] sm:$0xff] }
  0xbc   :  { %1100 = vmatmul.mubr.f32.vlgmr.msra.gmra.mrb[0].mxu0 %v60_v29  ;;  %v2827_v32 = vpack.c.bf16 %v229_v24, %v217_v23  ;;  %v347_v23 = vld [vmem:[#allocation5 + $0x808] sm:$0xff] }
  0xbd   :  { %1326 = vmatmul.mubr.f32.vlgmr.msra.gmra.mrb[0].mxu1 %v60_v29  ;;  %2682 = vmatpush1.bf16.msra.mxu0 %v2681_v30  ;;  %v2699_v29 = vpack.c.bf16 %v227_v20, %v215_v19  ;;  %v216_v30 = vld [vmem:[#allocation5 + $0x3f0] sm:$0xff]  ;;  %v2843_v20 = vpack.c.bf16 %v325_v13, %v313_v12  ;;  %v3393_v24 = vld [vmem:[#allocation2 + $0x8] sm:$0xff] }
  0xbe   :  { %2810 = vmatpush1.bf16.msra.mxu1 %v2809_v33  ;;  %1105 = vmatprep.mubr.f32.mxu0 %v65_v36  ;;  %v239_v33 = vld [vmem:[#allocation5 + $0x4a8] sm:$0xff]  ;;  %v2829_v39 = vpack.c.bf16 %v228_v31, %v216_v30  ;;  %v312_v19 = vld [vmem:[#allocation5 + $0x6f0] sm:$0xff]  ;;  %v334_v30 = vld [vmem:[#allocation5 + $0x7a0] sm:$0xff] }
  0xbf   :  { %1331 = vmatprep.mubr.f32.mxu1 %v65_v36  ;;  %2684 = vmatprep.subr.bf16.mxu0 %v2683_v37  ;;  %v2701_v36 = vpack.c.bf16 %v226_v27, %v214_v26  ;;  %v241_v37 = vld [vmem:[#allocation5 + $0x4b8] sm:$0xff]  ;;  %v346_v31 = vld [vmem:[#allocation5 + $0x800] sm:$0xff] }
  0xc0   :  { %1106 = vmatmul.mubr.f32.gmra.mrb[2].mxu0 %v64_v43  ;;  %2812 = vmatprep.subr.bf16.mxu1 %v2811_v40  ;;  %v238_v40 = vld [vmem:[#allocation5 + $0x4a0] sm:$0xff]  ;;  %v349_v26 = vld [vmem:[#allocation5 + $0x818] sm:$0xff] }
  0xc1   :  { %1332 = vmatmul.mubr.f32.gmra.mrb[2].mxu1 %v64_v43  ;;  %2686 = vmatpush1.bf16.msra.mxu0 %v2685_v44  ;;  %v2703_v43 = vpack.c.bf16 %v251_v34, %v239_v33  ;;  %v240_v44 = vld [vmem:[#allocation5 + $0x4b0] sm:$0xff] }
  0xc2   :  { %2814 = vmatpush1.bf16.msra.mxu1 %v2813_v47  ;;  %1111 = vmatprep.mubr.f32.mxu0 %v69_v50  ;;  %v2831_v47 = vpack.c.bf16 %v253_v38, %v241_v37  ;;  %v348_v34 = vld [vmem:[#allocation5 + $0x810] sm:$0xff]  ;;  %v361_v37 = vld [vmem:[#allocation5 + $0x878] sm:$0xff] }
  0xc3   :  { %1337 = vmatprep.mubr.f32.mxu1 %v69_v50  ;;  %2688 = vmatprep.subr.bf16.mxu0 %v2687_v51  ;;  %v2705_v50 = vpack.c.bf16 %v250_v41, %v238_v40  ;;  %v89_v51 = vld [vmem:[#allocation2 + $0xf8] sm:$0xff] }
  0xc4   :  { %1112 = vmatmul.mubr.f32.gmra.mrb[4].mxu0 %v68_v57  ;;  %2816 = vmatprep.subr.bf16.mxu1 %v2815_v54  ;;  %v2833_v54 = vpack.c.bf16 %v252_v45, %v240_v44  ;;  %v373_v38 = vld [vmem:[#allocation5 + $0x8d8] sm:$0xff]  ;;  %v360_v44 = vld [vmem:[#allocation5 + $0x870] sm:$0xff] }
  0xc5   :  { %1338 = vmatmul.mubr.f32.gmra.mrb[4].mxu1 %v68_v57  ;;  %2690 = vmatpush1.bf16.msra.mxu0 %v2689_v58  ;;  %v264_v57 = vld [vmem:[#allocation5 + $0x570] sm:$0xff]  ;;  %v2707_v58 = vpack.c.bf16 %v275_v49, %v263_v48  ;;  %v2851_v45 = vpack.c.bf16 %v373_v38, %v361_v37  ;;  %v395_v48 = vld [vmem:[#allocation5 + $0x988] sm:$0xff]  ;;  %v385_v49 = vld [vmem:[#allocation5 + $0x938] sm:$0xff] }
  0xc6   :  { %2818 = vmatpush1.bf16.msra.mxu1 %v2817_v61  ;;  %1117 = vmatprep.mubr.f32.mxu0 %v73_v0  ;;  %v299_v61 = vld [vmem:[#allocation5 + $0x688] sm:$0xff]  ;;  %v2837_v3 = vpack.c.bf16 %v276_v59, %v264_v57  ;;  %v478_v38 = vld [vmem:[#allocation5 + $0xc20] sm:$0xff] }
  0xc7   :  { %1343 = vmatprep.mubr.f32.mxu1 %v73_v0  ;;  %2692 = vmatprep.subr.bf16.mxu0 %v2691_v1  ;;  %v301_v0 = vld [vmem:[#allocation5 + $0x698] sm:$0xff]  ;;  %v88_v1 = vld [vmem:[#allocation2 + $0xf0] sm:$0xff]  ;;  %v407_v59 = vld [vmem:[#allocation5 + $0x9e8] sm:$0xff] }
  0xc8   :  { %1118 = vmatmul.mubr.f32.gmra.mrb[6].mxu0 %v72_v7  ;;  %2820 = vmatprep.subr.bf16.mxu1 %v2819_v4  ;;  %v2711_v4 = vpack.c.bf16 %v299_v61, %v287_v60  ;;  %v419_v60 = vld [vmem:[#allocation5 + $0xa48] sm:$0xff]  ;;  %v409_v61 = vld [vmem:[#allocation5 + $0x9f8] sm:$0xff] }
  0xc9   :  { %1344 = vmatmul.mubr.f32.gmra.mrb[6].mxu1 %v72_v7  ;;  %2694 = vmatpush1.bf16.msra.mxu0 %v2693_v8  ;;  %v288_v7 = vld [vmem:[#allocation5 + $0x630] sm:$0xff]  ;;  %v2839_v8 = vpack.c.bf16 %v301_v0, %v289_v63 }
  0xca   :  { %2822 = vmatpush1.bf16.msra.mxu1 %v2821_v11  ;;  %1123 = vmatprep.mubr.f32.mxu0 %v77_v14  ;;  %v323_v11 = vld [vmem:[#allocation5 + $0x748] sm:$0xff] }
  0xcb   :  { %1349 = vmatprep.mubr.f32.mxu1 %v77_v14  ;;  %2696 = vmatprep.subr.bf16.mxu0 %v2695_v15  ;;  %v2713_v14 = vpack.c.bf16 %v298_v6, %v286_v5  ;;  %v2841_v15 = vpack.c.bf16 %v300_v9, %v288_v7  ;;  %v2715_v16 = vpack.c.bf16 %v323_v11, %v311_v10  ;;  %v420_v6 = vld [vmem:[#allocation5 + $0xa50] sm:$0xff]  ;;  %v431_v7 = vld [vmem:[#allocation5 + $0xaa8] sm:$0xff]  ;;  %v433_v9 = vld [vmem:[#allocation5 + $0xab8] sm:$0xff] }
  0xcc   :  { %1124 = vmatmul.mubr.f32.gmra.mrb[8].mxu0 %v76_v21  ;;  %2824 = vmatprep.subr.bf16.mxu1 %v2823_v18  ;;  %v322_v18 = vld [vmem:[#allocation5 + $0x740] sm:$0xff]  ;;  %v445_v10 = vld [vmem:[#allocation5 + $0xb18] sm:$0xff] }
  0xcd   :  { %1350 = vmatmul.mubr.f32.gmra.mrb[8].mxu1 %v76_v21  ;;  %2698 = vmatpush1.bf16.msra.mxu0 %v2697_v22  ;;  %v324_v21 = vld [vmem:[#allocation5 + $0x750] sm:$0xff]  ;;  %v335_v22 = vld [vmem:[#allocation5 + $0x7a8] sm:$0xff]  ;;  %v2717_v27 = vpack.c.bf16 %v322_v18, %v310_v17  ;;  %v2863_v17 = vpack.c.bf16 %v445_v10, %v433_v9  ;;  %v3396_v9 = vld [vmem:[#allocation2 + $0x20] sm:$0xff] }
  0xce   :  { %2826 = vmatpush1.bf16.msra.mxu1 %v2825_v25  ;;  %1129 = vmatprep.mubr.f32.mxu0 %v81_v28  ;;  %v337_v25 = vld [vmem:[#allocation5 + $0x7b8] sm:$0xff]  ;;  %v444_v18 = vld [vmem:[#allocation5 + $0xb10] sm:$0xff] }
  0xcf   :  { %1355 = vmatprep.mubr.f32.mxu1 %v81_v28  ;;  %2700 = vmatprep.subr.bf16.mxu0 %v2699_v29  ;;  %v2845_v28 = vpack.c.bf16 %v324_v21, %v312_v19  ;;  %v2719_v29 = vpack.c.bf16 %v347_v23, %v335_v22  ;;  %v2847_v33 = vpack.c.bf16 %v349_v26, %v337_v25  ;;  %v455_v19 = vld [vmem:[#allocation5 + $0xb68] sm:$0xff]  ;;  %v457_v21 = vld [vmem:[#allocation5 + $0xb78] sm:$0xff]  ;;  %v454_v26 = vld [vmem:[#allocation5 + $0xb60] sm:$0xff] }
  0xd0   :  { %1130 = vmatmul.mubr.f32.gmra.mrb[10].mxu0 %v80_v35  ;;  %2828 = vmatprep.subr.bf16.mxu1 %v2827_v32  ;;  %v336_v32 = vld [vmem:[#allocation5 + $0x7b0] sm:$0xff]  ;;  %v469_v22 = vld [vmem:[#allocation5 + $0xbd8] sm:$0xff] }
  0xd1   :  { %1356 = vmatmul.mubr.f32.gmra.mrb[10].mxu1 %v80_v35  ;;  %2702 = vmatpush1.bf16.msra.mxu0 %v2701_v36  ;;  %v359_v35 = vld [vmem:[#allocation5 + $0x868] sm:$0xff]  ;;  %v2849_v40 = vpack.c.bf16 %v348_v34, %v336_v32  ;;  %v493_v34 = vld [vmem:[#allocation5 + $0xc98] sm:$0xff] }
  0xd2   :  { %2830 = vmatpush1.bf16.msra.mxu1 %v2829_v39  ;;  %1135 = vmatprep.mubr.f32.mxu0 %v85_v42  ;;  %v371_v36 = vld [vmem:[#allocation5 + $0x8c8] sm:$0xff]  ;;  %v2721_v39 = vpack.c.bf16 %v346_v31, %v334_v30  ;;  %v468_v30 = vld [vmem:[#allocation5 + $0xbd0] sm:$0xff] }
  0xd3   :  { %1361 = vmatprep.mubr.f32.mxu1 %v85_v42  ;;  %2704 = vmatprep.subr.bf16.mxu0 %v2703_v43  ;;  %v2723_v41 = vpack.c.bf16 %v371_v36, %v359_v35  ;;  %v358_v42 = vld [vmem:[#allocation5 + $0x860] sm:$0xff]  ;;  %v479_v31 = vld [vmem:[#allocation5 + $0xc28] sm:$0xff] }
  0xd4   :  { %1136 = vmatmul.mubr.f32.gmra.mrb[12].mxu0 %v84_v46  ;;  %2832 = vmatprep.subr.bf16.mxu1 %v2831_v47  ;;  %v370_v43 = vld [vmem:[#allocation5 + $0x8c0] sm:$0xff]  ;;  %v383_v47 = vld [vmem:[#allocation5 + $0x928] sm:$0xff] }
  0xd5   :  { %1362 = vmatmul.mubr.f32.gmra.mrb[12].mxu1 %v84_v46  ;;  %2706 = vmatpush1.bf16.msra.mxu0 %v2705_v50  ;;  %v372_v46 = vld [vmem:[#allocation5 + $0x8d0] sm:$0xff]  ;;  %v397_v50 = vld [vmem:[#allocation5 + $0x998] sm:$0xff]  ;;  %v2727_v53 = vpack.c.bf16 %v395_v48, %v383_v47  ;;  %v491_v32 = vld [vmem:[#allocation5 + $0xc88] sm:$0xff] }
  0xd6   :  { %2834 = vmatpush1.bf16.msra.mxu1 %v2833_v54  ;;  %1141 = vmatprep.mubr.f32.mxu0 %v89_v51  ;;  %v2853_v52 = vpack.c.bf16 %v372_v46, %v360_v44  ;;  %v382_v54 = vld [vmem:[#allocation5 + $0x920] sm:$0xff]  ;;  %v2855_v57 = vpack.c.bf16 %v397_v50, %v385_v49  ;;  %v2743_v37 = vpack.c.bf16 %v491_v32, %v479_v31  ;;  %v515_v44 = vld [vmem:[#allocation5 + $0xd48] sm:$0xff]  ;;  %v517_v46 = vld [vmem:[#allocation5 + $0xd58] sm:$0xff] }
  0xd7   :  { %1367 = vmatprep.mubr.f32.mxu1 %v89_v51  ;;  %2708 = vmatprep.subr.bf16.mxu0 %v2707_v58  ;;  %v2725_v51 = vpack.c.bf16 %v370_v43, %v358_v42  ;;  %v396_v58 = vld [vmem:[#allocation5 + $0x990] sm:$0xff]  ;;  %v2729_v63 = vpack.c.bf16 %v394_v55, %v382_v54  ;;  %v503_v43 = vld [vmem:[#allocation5 + $0xce8] sm:$0xff]  ;;  %v502_v50 = vld [vmem:[#allocation5 + $0xce0] sm:$0xff] }
  0xd8   :  { %1142 = vmatmul.mubr.f32.gmra.mrb[14].mxu0 %v88_v1  ;;  %2836 = vmatprep.subr.bf16.mxu1 %v2835_v62  ;;  %v421_v62 = vld [vmem:[#allocation5 + $0xa58] sm:$0xff]  ;;  %v2857_v0 = vpack.c.bf16 %v396_v58, %v384_v56  ;;  %v492_v42 = vld [vmem:[#allocation5 + $0xc90] sm:$0xff]  ;;  %v2747_v49 = vpack.c.bf16 %v515_v44, %v503_v43  ;;  %v527_v55 = vld [vmem:[#allocation5 + $0xda8] sm:$0xff] }
  0xd9   :  { %1368 = vmatmul.mubr.f32.gmra.mrb[14].mxu1 %v88_v1  ;;  %2710 = vmatpush1.bf16.msra.mxu0 %v2709_v2  ;;  %v2731_v1 = vpack.c.bf16 %v419_v60, %v407_v59  ;;  %v406_v2 = vld [vmem:[#allocation5 + $0x9e0] sm:$0xff]  ;;  %v2859_v5 = vpack.c.bf16 %v421_v62, %v409_v61  ;;  %v516_v54 = vld [vmem:[#allocation5 + $0xd50] sm:$0xff]  ;;  %v539_v56 = vld [vmem:[#allocation5 + $0xe08] sm:$0xff] }
  0xda   :  { %2838 = vmatpush1.bf16.msra.mxu1 %v2837_v3  ;;  %2712 = vmatprep.subr.bf16.mxu0 %v2711_v4  ;;  %v418_v3 = vld [vmem:[#allocation5 + $0xa40] sm:$0xff]  ;;  %v408_v4 = vld [vmem:[#allocation5 + $0x9f0] sm:$0xff]  ;;  %v529_v58 = vld [vmem:[#allocation5 + $0xdb8] sm:$0xff]  ;;  %v2751_v62 = vpack.c.bf16 %v539_v56, %v527_v55 }
  0xdb   :  { %2840 = vmatprep.subr.bf16.mxu1 %v2839_v8  ;;  %1438 = vmatprep.mubr.f32.mxu0 %v3393_v24  ;;  %v443_v8 = vld [vmem:[#allocation5 + $0xb08] sm:$0xff]  ;;  %v2733_v11 = vpack.c.bf16 %v418_v3, %v406_v2  ;;  %v2861_v12 = vpack.c.bf16 %v420_v6, %v408_v4  ;;  %v541_v59 = vld [vmem:[#allocation5 + $0xe18] sm:$0xff]  ;;  %v540_v3 = vld [vmem:[#allocation5 + $0xe10] sm:$0xff] }
  0xdc   :  { %1664 = vmatprep.mubr.f32.mxu1 %v3393_v24  ;;  %v2735_v13 = vpack.c.bf16 %v443_v8, %v431_v7  ;;  %v2879_v2 = vpack.c.bf16 %v541_v59, %v529_v58  ;;  %v551_v4 = vld [vmem:[#allocation5 + $0xe68] sm:$0xff]  ;;  %v553_v7 = vld [vmem:[#allocation5 + $0xe78] sm:$0xff]  ;;  %v588_v31 = vld [vmem:[#allocation5 + $0xf90] sm:$0xff] }
  0xdd   :  { %2714 = vmatpush1.bf16.msra.mxu0 %v2713_v14  ;;  %v430_v14 = vld [vmem:[#allocation5 + $0xaa0] sm:$0xff]  ;;  %v3395_v6 = vld [vmem:[#allocation2 + $0x28] sm:$0xff]  ;;  %v565_v8 = vld [vmem:[#allocation5 + $0xed8] sm:$0xff] }
  0xde   :  { %2842 = vmatpush1.bf16.msra.mxu1 %v2841_v15  ;;  %2716 = vmatprep.subr.bf16.mxu0 %v2715_v16  ;;  %v442_v15 = vld [vmem:[#allocation5 + $0xb00] sm:$0xff]  ;;  %v432_v16 = vld [vmem:[#allocation5 + $0xab0] sm:$0xff]  ;;  %v599_v32 = vld [vmem:[#allocation5 + $0xfe8] sm:$0xff] }
  0xdf   :  { %2844 = vmatprep.subr.bf16.mxu1 %v2843_v20  ;;  %v467_v20 = vld [vmem:[#allocation5 + $0xbc8] sm:$0xff]  ;;  %v2737_v23 = vpack.c.bf16 %v442_v15, %v430_v14  ;;  %v2865_v24 = vpack.c.bf16 %v444_v18, %v432_v16  ;;  %v562_v14 = vld [vmem:[#allocation5 + $0xec0] sm:$0xff]  ;;  %v552_v15 = vld [vmem:[#allocation5 + $0xe70] sm:$0xff]  ;;  %v2883_v16 = vpack.c.bf16 %v565_v8, %v553_v7 }
  0xe0   :  { %v2739_v25 = vpack.c.bf16 %v467_v20, %v455_v19  ;;  %v575_v18 = vld [vmem:[#allocation5 + $0xf28] sm:$0xff]  ;;  %v600_v43 = vld [vmem:[#allocation5 + $0xff0] sm:$0xff]  ;;  %v622_v55 = vld [vmem:[#allocation5 + $0x10a0] sm:$0xff] }
  0xe1   :  { %2718 = vmatpush1.bf16.msra.mxu0 %v2717_v27  ;;  %v466_v27 = vld [vmem:[#allocation5 + $0xbc0] sm:$0xff]  ;;  %v587_v19 = vld [vmem:[#allocation5 + $0xf88] sm:$0xff]  ;;  %v636_v59 = vld [vmem:[#allocation5 + $0x1110] sm:$0xff] }
  0xe2   :  { %2846 = vmatpush1.bf16.msra.mxu1 %v2845_v28  ;;  %2720 = vmatprep.subr.bf16.mxu0 %v2719_v29  ;;  %v456_v28 = vld [vmem:[#allocation5 + $0xb70] sm:$0xff]  ;;  %v2867_v29 = vpack.c.bf16 %v469_v22, %v457_v21  ;;  %v2741_v35 = vpack.c.bf16 %v466_v27, %v454_v26  ;;  %v3397_v20 = vld [vmem:[#allocation2 + $0x48] sm:$0xff]  ;;  %v577_v21 = vld [vmem:[#allocation5 + $0xf38] sm:$0xff]  ;;  %v2759_v26 = vpack.c.bf16 %v587_v19, %v575_v18 }
  0xe3   :  { %2848 = vmatprep.subr.bf16.mxu1 %v2847_v33  ;;  %v481_v33 = vld [vmem:[#allocation5 + $0xc38] sm:$0xff]  ;;  %v2869_v36 = vpack.c.bf16 %v468_v30, %v456_v28  ;;  %v574_v27 = vld [vmem:[#allocation5 + $0xf20] sm:$0xff]  ;;  %v648_v7 = vld [vmem:[#allocation5 + $0x1170] sm:$0xff] }
  0xe4   :  { %v589_v22 = vld [vmem:[#allocation5 + $0xf98] sm:$0xff]  ;;  %v586_v28 = vld [vmem:[#allocation5 + $0xf80] sm:$0xff] }
  0xe5   :  { %2722 = vmatpush1.bf16.msra.mxu0 %v2721_v39  ;;  %v490_v39 = vld [vmem:[#allocation5 + $0xc80] sm:$0xff]  ;;  %v2887_v30 = vpack.c.bf16 %v589_v22, %v577_v21  ;;  %v672_v21 = vld [vmem:[#allocation5 + $0x1230] sm:$0xff] }
  0xe6   :  { %2850 = vmatpush1.bf16.msra.mxu1 %v2849_v40  ;;  %2724 = vmatprep.subr.bf16.mxu0 %v2723_v41  ;;  %v480_v40 = vld [vmem:[#allocation5 + $0xc30] sm:$0xff]  ;;  %v2871_v41 = vpack.c.bf16 %v493_v34, %v481_v33  ;;  %v2745_v47 = vpack.c.bf16 %v490_v39, %v478_v38  ;;  %v611_v33 = vld [vmem:[#allocation5 + $0x1048] sm:$0xff]  ;;  %v2761_v38 = vpack.c.bf16 %v586_v28, %v574_v27  ;;  %v634_v56 = vld [vmem:[#allocation5 + $0x1100] sm:$0xff] }
  0xe7   :  { %2852 = vmatprep.subr.bf16.mxu1 %v2851_v45  ;;  %v505_v45 = vld [vmem:[#allocation5 + $0xcf8] sm:$0xff]  ;;  %v2873_v48 = vpack.c.bf16 %v492_v42, %v480_v40  ;;  %v3399_v34 = vld [vmem:[#allocation2 + $0x68] sm:$0xff]  ;;  %v2763_v40 = vpack.c.bf16 %v611_v33, %v599_v32  ;;  %v610_v42 = vld [vmem:[#allocation5 + $0x1040] sm:$0xff] }
  0xe8   :  { %v670_v19 = vld [vmem:[#allocation5 + $0x1220] sm:$0xff]  ;;  %v697_v27 = vld [vmem:[#allocation5 + $0x12f8] sm:$0xff] }
  0xe9   :  { %2726 = vmatpush1.bf16.msra.mxu0 %v2725_v51  ;;  %v514_v51 = vld [vmem:[#allocation5 + $0xd40] sm:$0xff]  ;;  %v709_v28 = vld [vmem:[#allocation5 + $0x1358] sm:$0xff] }
  0xea   :  { %2854 = vmatpush1.bf16.msra.mxu1 %v2853_v52  ;;  %2728 = vmatprep.subr.bf16.mxu0 %v2727_v53  ;;  %v504_v52 = vld [vmem:[#allocation5 + $0xcf0] sm:$0xff]  ;;  %v2875_v53 = vpack.c.bf16 %v517_v46, %v505_v45  ;;  %v2749_v60 = vpack.c.bf16 %v514_v51, %v502_v50  ;;  %v623_v46 = vld [vmem:[#allocation5 + $0x10a8] sm:$0xff]  ;;  %v637_v50 = vld [vmem:[#allocation5 + $0x1118] sm:$0xff] }
  0xeb   :  { %2856 = vmatprep.subr.bf16.mxu1 %v2855_v57  ;;  %v3394_v57 = vld [vmem:[#allocation2] sm:$0xff]  ;;  %v2877_v61 = vpack.c.bf16 %v516_v54, %v504_v52  ;;  %v612_v45 = vld [vmem:[#allocation5 + $0x1050] sm:$0xff] }
  0xec   :  { %v3402_v51 = vld [vmem:[#allocation2 + $0x80] sm:$0xff] }
  0xed   :  { %2730 = vmatpush1.bf16.msra.mxu0 %v2729_v63  ;;  %v526_v63 = vld [vmem:[#allocation5 + $0xda0] sm:$0xff] }
  0xee   :  { %2858 = vmatpush1.bf16.msra.mxu1 %v2857_v0  ;;  %2732 = vmatprep.subr.bf16.mxu0 %v2731_v1  ;;  %v538_v0 = vld [vmem:[#allocation5 + $0xe00] sm:$0xff]  ;;  %v528_v1 = vld [vmem:[#allocation5 + $0xdb0] sm:$0xff] }
  0xef   :  { %2860 = vmatprep.subr.bf16.mxu1 %v2859_v5  ;;  %v563_v5 = vld [vmem:[#allocation5 + $0xec8] sm:$0xff]  ;;  %v2753_v10 = vpack.c.bf16 %v538_v0, %v526_v63  ;;  %v649_v63 = vld [vmem:[#allocation5 + $0x1178] sm:$0xff]  ;;  %v694_v33 = vld [vmem:[#allocation5 + $0x12e0] sm:$0xff] }
  0xf0   :  { %v661_v0 = vld [vmem:[#allocation5 + $0x11d8] sm:$0xff] }
  0xf1   :  { %2734 = vmatpush1.bf16.msra.mxu0 %v2733_v11  ;;  %v2881_v11 = vpack.c.bf16 %v540_v3, %v528_v1  ;;  %v3404_v1 = vld [vmem:[#allocation2 + $0xa0] sm:$0xff]  ;;  %v2899_v8 = vpack.c.bf16 %v661_v0, %v649_v63  ;;  %v767_v63 = vld [vmem:[#allocation5 + $0x1528] sm:$0xff] }
  0xf2   :  { %2862 = vmatpush1.bf16.msra.mxu1 %v2861_v12  ;;  %2736 = vmatprep.subr.bf16.mxu0 %v2735_v13  ;;  %v2755_v12 = vpack.c.bf16 %v563_v5, %v551_v4  ;;  %v550_v13 = vld [vmem:[#allocation5 + $0xe60] sm:$0xff]  ;;  %v779_v0 = vld [vmem:[#allocation5 + $0x1588] sm:$0xff] }
  0xf3   :  { %2864 = vmatprep.subr.bf16.mxu1 %v2863_v17  ;;  %v564_v17 = vld [vmem:[#allocation5 + $0xed0] sm:$0xff]  ;;  %v646_v5 = vld [vmem:[#allocation5 + $0x1160] sm:$0xff] }
  0xf5   :  { %2738 = vmatpush1.bf16.msra.mxu0 %v2737_v23  ;;  %v3398_v23 = vld [vmem:[#allocation2 + $0x40] sm:$0xff] }
  0xf6   :  { %2866 = vmatpush1.bf16.msra.mxu1 %v2865_v24  ;;  %2740 = vmatprep.subr.bf16.mxu0 %v2739_v25  ;;  %v2757_v24 = vpack.c.bf16 %v562_v14, %v550_v13  ;;  %v2885_v25 = vpack.c.bf16 %v564_v17, %v552_v15  ;;  %v673_v13 = vld [vmem:[#allocation5 + $0x1238] sm:$0xff]  ;;  %v3406_v15 = vld [vmem:[#allocation2 + $0xc0] sm:$0xff] }
  0xf7   :  { %2868 = vmatprep.subr.bf16.mxu1 %v2867_v29  ;;  %v576_v29 = vld [vmem:[#allocation5 + $0xf30] sm:$0xff]  ;;  %v685_v14 = vld [vmem:[#allocation5 + $0x1298] sm:$0xff] }
  0xf8   :  { %v2889_v39 = vpack.c.bf16 %v588_v31, %v576_v29  ;;  %v2903_v22 = vpack.c.bf16 %v685_v14, %v673_v13  ;;  %v3408_v29 = vld [vmem:[#allocation2 + $0xe0] sm:$0xff]  ;;  %v793_v13 = vld [vmem:[#allocation5 + $0x15f8] sm:$0xff] }
  0xf9   :  { %2742 = vmatpush1.bf16.msra.mxu0 %v2741_v35  ;;  %v601_v35 = vld [vmem:[#allocation5 + $0xff8] sm:$0xff] }
  0xfa   :  { %2870 = vmatpush1.bf16.msra.mxu1 %v2869_v36  ;;  %2744 = vmatprep.subr.bf16.mxu0 %v2743_v37  ;;  %v613_v36 = vld [vmem:[#allocation5 + $0x1058] sm:$0xff]  ;;  %v3400_v37 = vld [vmem:[#allocation2 + $0x60] sm:$0xff] }
  0xfb   :  { %2872 = vmatprep.subr.bf16.mxu1 %v2871_v41  ;;  %v598_v41 = vld [vmem:[#allocation5 + $0xfe0] sm:$0xff]  ;;  %v2891_v44 = vpack.c.bf16 %v613_v36, %v601_v35  ;;  %v696_v35 = vld [vmem:[#allocation5 + $0x12f0] sm:$0xff]  ;;  %v2907_v36 = vpack.c.bf16 %v709_v28, %v697_v27  ;;  %v805_v14 = vld [vmem:[#allocation5 + $0x1658] sm:$0xff] }
  0xfc   :  { %1439 = vmatmul.mubr.f32.vlgmr.msra.gmra.mrb[16].mxu0 %v3394_v57  ;;  %v2765_v52 = vpack.c.bf16 %v610_v42, %v598_v41  ;;  %v721_v41 = vld [vmem:[#allocation5 + $0x13b8] sm:$0xff] }
  0xfd   :  { %2746 = vmatpush1.bf16.msra.mxu0 %v2745_v47  ;;  %1665 = vmatmul.mubr.f32.vlgmr.msra.gmra.mrb[16].mxu1 %v3394_v57  ;;  %v635_v47 = vld [vmem:[#allocation5 + $0x1108] sm:$0xff]  ;;  %v624_v57 = vld [vmem:[#allocation5 + $0x10b0] sm:$0xff]  ;;  %v733_v42 = vld [vmem:[#allocation5 + $0x1418] sm:$0xff] }
  0xfe   :  { %2874 = vmatpush1.bf16.msra.mxu1 %v2873_v48  ;;  %2748 = vmatprep.subr.bf16.mxu0 %v2747_v49  ;;  %v3401_v48 = vld [vmem:[#allocation2 + $0x88] sm:$0xff]  ;;  %v625_v49 = vld [vmem:[#allocation5 + $0x10b8] sm:$0xff]  ;;  %v2767_v54 = vpack.c.bf16 %v635_v47, %v623_v46  ;;  %v2897_v3 = vpack.c.bf16 %v636_v59, %v624_v57  ;;  %v718_v46 = vld [vmem:[#allocation5 + $0x13a0] sm:$0xff] }
  0xff   :  { %2876 = vmatprep.subr.bf16.mxu1 %v2875_v53  ;;  %1444 = vmatprep.mubr.f32.mxu0 %v3395_v6  ;;  %v2893_v53 = vpack.c.bf16 %v612_v45, %v600_v43  ;;  %v2895_v58 = vpack.c.bf16 %v637_v50, %v625_v49  ;;  %v730_v47 = vld [vmem:[#allocation5 + $0x1400] sm:$0xff]  ;;  %v2911_v49 = vpack.c.bf16 %v733_v42, %v721_v41  ;;  %v732_v50 = vld [vmem:[#allocation5 + $0x1410] sm:$0xff] }
 0x100   :  { %1670 = vmatprep.mubr.f32.mxu1 %v3395_v6  ;;  %1445 = vmatmul.mubr.f32.gmra.mrb[18].mxu0 %v3396_v9  ;;  %v658_v6 = vld [vmem:[#allocation5 + $0x11c0] sm:$0xff] }
 0x101   :  { %2750 = vmatpush1.bf16.msra.mxu0 %v2749_v60  ;;  %1671 = vmatmul.mubr.f32.gmra.mrb[18].mxu1 %v3396_v9  ;;  %v647_v60 = vld [vmem:[#allocation5 + $0x1168] sm:$0xff]  ;;  %v660_v9 = vld [vmem:[#allocation5 + $0x11d0] sm:$0xff]  ;;  %v754_v59 = vld [vmem:[#allocation5 + $0x14c0] sm:$0xff] }
 0x102   :  { %2878 = vmatpush1.bf16.msra.mxu1 %v2877_v61  ;;  %2752 = vmatprep.subr.bf16.mxu0 %v2751_v62  ;;  %v659_v61 = vld [vmem:[#allocation5 + $0x11c8] sm:$0xff]  ;;  %v2901_v17 = vpack.c.bf16 %v660_v9, %v648_v7  ;;  %v778_v7 = vld [vmem:[#allocation5 + $0x1580] sm:$0xff] }
 0x103   :  { %2880 = vmatprep.subr.bf16.mxu1 %v2879_v2  ;;  %1450 = vmatprep.mubr.f32.mxu0 %v3397_v20  ;;  %v3403_v62 = vld [vmem:[#allocation2 + $0xa8] sm:$0xff]  ;;  %v2769_v2 = vpack.c.bf16 %v634_v56, %v622_v55  ;;  %v2771_v4 = vpack.c.bf16 %v659_v61, %v647_v60  ;;  %v2785_v55 = vpack.c.bf16 %v730_v47, %v718_v46  ;;  %v744_v60 = vld [vmem:[#allocation5 + $0x1470] sm:$0xff]  ;;  %v838_v42 = vld [vmem:[#allocation5 + $0x1760] sm:$0xff] }
 0x104   :  { %1676 = vmatprep.mubr.f32.mxu1 %v3397_v20  ;;  %1451 = vmatmul.mubr.f32.gmra.mrb[20].mxu0 %v3398_v23  ;;  %v682_v20 = vld [vmem:[#allocation5 + $0x1280] sm:$0xff]  ;;  %v852_v46 = vld [vmem:[#allocation5 + $0x17d0] sm:$0xff]  ;;  %v99_v47 = vld [vmem:[#allocation5 + $0x48] sm:$0xff] }
 0x105   :  { %2754 = vmatpush1.bf16.msra.mxu0 %v2753_v10  ;;  %1677 = vmatmul.mubr.f32.gmra.mrb[20].mxu1 %v3398_v23  ;;  %v671_v10 = vld [vmem:[#allocation5 + $0x1228] sm:$0xff]  ;;  %v684_v23 = vld [vmem:[#allocation5 + $0x1290] sm:$0xff] }
 0x106   :  { %2882 = vmatpush1.bf16.msra.mxu1 %v2881_v11  ;;  %2756 = vmatprep.subr.bf16.mxu0 %v2755_v12  ;;  %v683_v11 = vld [vmem:[#allocation5 + $0x1288] sm:$0xff]  ;;  %v2905_v31 = vpack.c.bf16 %v684_v23, %v672_v21  ;;  %v2923_v21 = vpack.c.bf16 %v805_v14, %v793_v13  ;;  %v3411_v13 = vld [vmem:[#allocation2 + $0x38] sm:$0xff] }
 0x107   :  { %2884 = vmatprep.subr.bf16.mxu1 %v2883_v16  ;;  %1456 = vmatprep.mubr.f32.mxu0 %v3399_v34  ;;  %v3405_v12 = vld [vmem:[#allocation2 + $0xc8] sm:$0xff]  ;;  %v2773_v16 = vpack.c.bf16 %v658_v6, %v646_v5  ;;  %v2775_v18 = vpack.c.bf16 %v683_v11, %v671_v10  ;;  %v2791_v5 = vpack.c.bf16 %v779_v0, %v767_v63  ;;  %v766_v6 = vld [vmem:[#allocation5 + $0x1520] sm:$0xff]  ;;  %v780_v10 = vld [vmem:[#allocation5 + $0x1590] sm:$0xff] }
 0x108   :  { %1682 = vmatprep.mubr.f32.mxu1 %v3399_v34  ;;  %1457 = vmatmul.mubr.f32.gmra.mrb[22].mxu0 %v3400_v37  ;;  %v706_v34 = vld [vmem:[#allocation5 + $0x1340] sm:$0xff]  ;;  %v791_v11 = vld [vmem:[#allocation5 + $0x15e8] sm:$0xff]  ;;  %v137_v63 = vld [vmem:[#allocation5 + $0x178] sm:$0xff] }
 0x109   :  { %2758 = vmatpush1.bf16.msra.mxu0 %v2757_v24  ;;  %1683 = vmatmul.mubr.f32.gmra.mrb[22].mxu1 %v3400_v37  ;;  %v695_v24 = vld [vmem:[#allocation5 + $0x12e8] sm:$0xff]  ;;  %v708_v37 = vld [vmem:[#allocation5 + $0x1350] sm:$0xff]  ;;  %v2781_v43 = vpack.c.bf16 %v706_v34, %v694_v33 }
 0x10a   :  { %2886 = vmatpush1.bf16.msra.mxu1 %v2885_v25  ;;  %2760 = vmatprep.subr.bf16.mxu0 %v2759_v26  ;;  %v707_v25 = vld [vmem:[#allocation5 + $0x1348] sm:$0xff]  ;;  %v828_v34 = vld [vmem:[#allocation5 + $0x1710] sm:$0xff] }
 0x10b   :  { %2888 = vmatprep.subr.bf16.mxu1 %v2887_v30  ;;  %1462 = vmatprep.mubr.f32.mxu0 %v3401_v48  ;;  %v3407_v26 = vld [vmem:[#allocation2 + $0xe8] sm:$0xff]  ;;  %v2777_v30 = vpack.c.bf16 %v682_v20, %v670_v19  ;;  %v2779_v32 = vpack.c.bf16 %v707_v25, %v695_v24  ;;  %v802_v19 = vld [vmem:[#allocation5 + $0x1640] sm:$0xff]  ;;  %v792_v20 = vld [vmem:[#allocation5 + $0x15f0] sm:$0xff] }
 0x10c   :  { %1688 = vmatprep.mubr.f32.mxu1 %v3401_v48  ;;  %1463 = vmatmul.mubr.f32.gmra.mrb[24].mxu0 %v3402_v51  ;;  %v720_v48 = vld [vmem:[#allocation5 + $0x13b0] sm:$0xff]  ;;  %v815_v23 = vld [vmem:[#allocation5 + $0x16a8] sm:$0xff]  ;;  %v817_v25 = vld [vmem:[#allocation5 + $0x16b8] sm:$0xff] }
 0x10d   :  { %2762 = vmatpush1.bf16.msra.mxu0 %v2761_v38  ;;  %1689 = vmatmul.mubr.f32.gmra.mrb[24].mxu1 %v3402_v51  ;;  %v719_v38 = vld [vmem:[#allocation5 + $0x13a8] sm:$0xff]  ;;  %v2913_v56 = vpack.c.bf16 %v732_v50, %v720_v48  ;;  %v113_v50 = vld [vmem:[#allocation5 + $0xb8] sm:$0xff] }
 0x10e   :  { %2890 = vmatpush1.bf16.msra.mxu1 %v2889_v39  ;;  %2764 = vmatprep.subr.bf16.mxu0 %v2763_v40  ;;  %v731_v39 = vld [vmem:[#allocation5 + $0x1408] sm:$0xff]  ;;  %v3409_v40 = vld [vmem:[#allocation2 + $0x18] sm:$0xff] }
 0x10f   :  { %2892 = vmatprep.subr.bf16.mxu1 %v2891_v44  ;;  %1468 = vmatprep.mubr.f32.mxu0 %v3403_v62  ;;  %v2909_v44 = vpack.c.bf16 %v708_v37, %v696_v35  ;;  %v2783_v45 = vpack.c.bf16 %v731_v39, %v719_v38  ;;  %v743_v51 = vld [vmem:[#allocation5 + $0x1468] sm:$0xff]  ;;  %v841_v37 = vld [vmem:[#allocation5 + $0x1778] sm:$0xff] }
 0x110   :  { %1694 = vmatprep.mubr.f32.mxu1 %v3403_v62  ;;  %1469 = vmatmul.mubr.f32.gmra.mrb[26].mxu0 %v3404_v1  ;;  %v756_v62 = vld [vmem:[#allocation5 + $0x14d0] sm:$0xff]  ;;  %v827_v24 = vld [vmem:[#allocation5 + $0x1708] sm:$0xff]  ;;  %v853_v38 = vld [vmem:[#allocation5 + $0x17d8] sm:$0xff] }
 0x111   :  { %2766 = vmatpush1.bf16.msra.mxu0 %v2765_v52  ;;  %1695 = vmatmul.mubr.f32.gmra.mrb[26].mxu1 %v3404_v1  ;;  %v755_v52 = vld [vmem:[#allocation5 + $0x14c8] sm:$0xff]  ;;  %v769_v1 = vld [vmem:[#allocation5 + $0x1538] sm:$0xff] }
 0x112   :  { %2894 = vmatpush1.bf16.msra.mxu1 %v2893_v53  ;;  %2768 = vmatprep.subr.bf16.mxu0 %v2767_v54  ;;  %v745_v53 = vld [vmem:[#allocation5 + $0x1478] sm:$0xff]  ;;  %v2787_v57 = vpack.c.bf16 %v755_v52, %v743_v51  ;;  %v839_v35 = vld [vmem:[#allocation5 + $0x1768] sm:$0xff] }
 0x113   :  { %2896 = vmatprep.subr.bf16.mxu1 %v2895_v58  ;;  %1474 = vmatprep.mubr.f32.mxu0 %v3405_v12  ;;  %v757_v54 = vld [vmem:[#allocation5 + $0x14d8] sm:$0xff]  ;;  %v742_v58 = vld [vmem:[#allocation5 + $0x1460] sm:$0xff]  ;;  %v111_v48 = vld [vmem:[#allocation5 + $0xa8] sm:$0xff] }
 0x114   :  { %1700 = vmatprep.mubr.f32.mxu1 %v3405_v12  ;;  %1475 = vmatmul.mubr.f32.gmra.mrb[28].mxu0 %v3406_v15  ;;  %v2915_v61 = vpack.c.bf16 %v757_v54, %v745_v53  ;;  %v803_v12 = vld [vmem:[#allocation5 + $0x1648] sm:$0xff]  ;;  %v2935_v53 = vpack.c.bf16 %v111_v48, %v99_v47  ;;  %v98_v54 = vld [vmem:[#allocation5 + $0x40] sm:$0xff]  ;;  %v208_v47 = vld [vmem:[#allocation5 + $0x3b0] sm:$0xff] }
 0x115   :  { %2770 = vmatpush1.bf16.msra.mxu0 %v2769_v2  ;;  %1701 = vmatmul.mubr.f32.gmra.mrb[28].mxu1 %v3406_v15  ;;  %v781_v2 = vld [vmem:[#allocation5 + $0x1598] sm:$0xff]  ;;  %v2793_v15 = vpack.c.bf16 %v778_v7, %v766_v6  ;;  %v3410_v6 = vld [vmem:[#allocation2 + $0x10] sm:$0xff] }
 0x116   :  { %2898 = vmatpush1.bf16.msra.mxu1 %v2897_v3  ;;  %2772 = vmatprep.subr.bf16.mxu0 %v2771_v4  ;;  %v2789_v3 = vpack.c.bf16 %v754_v59, %v742_v58  ;;  %v2917_v4 = vpack.c.bf16 %v756_v62, %v744_v60  ;;  %v2919_v9 = vpack.c.bf16 %v781_v2, %v769_v1  ;;  %v112_v58 = vld [vmem:[#allocation5 + $0xb0] sm:$0xff]  ;;  %v123_v59 = vld [vmem:[#allocation5 + $0x108] sm:$0xff]  ;;  %v125_v62 = vld [vmem:[#allocation5 + $0x118] sm:$0xff] }
 0x117   :  { %2900 = vmatprep.subr.bf16.mxu1 %v2899_v8  ;;  %1480 = vmatprep.mubr.f32.mxu0 %v3407_v26  ;;  %v768_v8 = vld [vmem:[#allocation5 + $0x1530] sm:$0xff]  ;;  %v135_v60 = vld [vmem:[#allocation5 + $0x168] sm:$0xff]  ;;  %v122_v1 = vld [vmem:[#allocation5 + $0x100] sm:$0xff]  ;;  %v3067_v7 = vpack.c.bf16 %v137_v63, %v125_v62 }
 0x118   :  { %1706 = vmatprep.mubr.f32.mxu1 %v3407_v26  ;;  %1481 = vmatmul.mubr.f32.gmra.mrb[30].mxu0 %v3408_v29  ;;  %v829_v26 = vld [vmem:[#allocation5 + $0x1718] sm:$0xff]  ;;  %v134_v2 = vld [vmem:[#allocation5 + $0x160] sm:$0xff]  ;;  %v3416_v48 = vld [vmem:[#allocation2 + $0x70] sm:$0xff] }
 0x119   :  { %2774 = vmatpush1.bf16.msra.mxu0 %v2773_v16  ;;  %1707 = vmatmul.mubr.f32.gmra.mrb[30].mxu1 %v3408_v29  ;;  %v2921_v16 = vpack.c.bf16 %v780_v10, %v768_v8  ;;  %v2799_v29 = vpack.c.bf16 %v827_v24, %v815_v23  ;;  %v2927_v33 = vpack.c.bf16 %v829_v26, %v817_v25  ;;  %v147_v8 = vld [vmem:[#allocation5 + $0x1c8] sm:$0xff]  ;;  %v173_v25 = vld [vmem:[#allocation5 + $0x298] sm:$0xff]  ;;  %v3418_v62 = vld [vmem:[#allocation2 + $0x90] sm:$0xff] }
 0x11a   :  { %2902 = vmatpush1.bf16.msra.mxu1 %v2901_v17  ;;  %2776 = vmatprep.subr.bf16.mxu0 %v2775_v18  ;;  %v2795_v17 = vpack.c.bf16 %v803_v12, %v791_v11  ;;  %v790_v18 = vld [vmem:[#allocation5 + $0x15e0] sm:$0xff]  ;;  %v2941_v10 = vpack.c.bf16 %v134_v2, %v122_v1  ;;  %v149_v11 = vld [vmem:[#allocation5 + $0x1d8] sm:$0xff]  ;;  %v183_v23 = vld [vmem:[#allocation5 + $0x2e8] sm:$0xff] }
 0x11b   :  { %2904 = vmatprep.subr.bf16.mxu1 %v2903_v22  ;;  %1551 = vmatprep.mubr.f32.mxu0 %v3409_v40  ;;  %v804_v22 = vld [vmem:[#allocation5 + $0x1650] sm:$0xff]  ;;  %v2797_v27 = vpack.c.bf16 %v802_v19, %v790_v18  ;;  %v161_v12 = vld [vmem:[#allocation5 + $0x238] sm:$0xff]  ;;  %v255_v1 = vld [vmem:[#allocation5 + $0x528] sm:$0xff] }
 0x11c   :  { %1777 = vmatprep.mubr.f32.mxu1 %v3409_v40  ;;  %v2925_v28 = vpack.c.bf16 %v804_v22, %v792_v20  ;;  %v148_v18 = vld [vmem:[#allocation5 + $0x1d0] sm:$0xff]  ;;  %v171_v22 = vld [vmem:[#allocation5 + $0x288] sm:$0xff]  ;;  %v185_v26 = vld [vmem:[#allocation5 + $0x2f8] sm:$0xff] }
 0x11d   :  { %2778 = vmatpush1.bf16.msra.mxu0 %v2777_v30  ;;  %v814_v30 = vld [vmem:[#allocation5 + $0x16a0] sm:$0xff]  ;;  %v160_v19 = vld [vmem:[#allocation5 + $0x230] sm:$0xff] }
 0x11e   :  { %2906 = vmatpush1.bf16.msra.mxu1 %v2905_v31  ;;  %2780 = vmatprep.subr.bf16.mxu0 %v2779_v32  ;;  %v826_v31 = vld [vmem:[#allocation5 + $0x1700] sm:$0xff]  ;;  %v816_v32 = vld [vmem:[#allocation5 + $0x16b0] sm:$0xff] }
 0x11f   :  { %2908 = vmatprep.subr.bf16.mxu1 %v2907_v36  ;;  %v851_v36 = vld [vmem:[#allocation5 + $0x17c8] sm:$0xff]  ;;  %v2801_v39 = vpack.c.bf16 %v826_v31, %v814_v30  ;;  %v2929_v40 = vpack.c.bf16 %v828_v34, %v816_v32  ;;  %v3412_v20 = vld [vmem:[#allocation2 + $0x30] sm:$0xff]  ;;  %v182_v30 = vld [vmem:[#allocation5 + $0x2e0] sm:$0xff]  ;;  %v2947_v31 = vpack.c.bf16 %v183_v23, %v171_v22 }
 0x120   :  { %v2803_v41 = vpack.c.bf16 %v851_v36, %v839_v35  ;;  %v172_v32 = vld [vmem:[#allocation5 + $0x290] sm:$0xff]  ;;  %v3075_v35 = vpack.c.bf16 %v185_v26, %v173_v25  ;;  %v195_v36 = vld [vmem:[#allocation5 + $0x348] sm:$0xff]  ;;  %v278_v22 = vld [vmem:[#allocation5 + $0x5e0] sm:$0xff] }
 0x121   :  { %2782 = vmatpush1.bf16.msra.mxu0 %v2781_v43  ;;  %v850_v43 = vld [vmem:[#allocation5 + $0x17c0] sm:$0xff]  ;;  %v3414_v34 = vld [vmem:[#allocation2 + $0x50] sm:$0xff]  ;;  %v291_v26 = vld [vmem:[#allocation5 + $0x648] sm:$0xff] }
 0x122   :  { %2910 = vmatpush1.bf16.msra.mxu1 %v2909_v44  ;;  %2784 = vmatprep.subr.bf16.mxu0 %v2783_v45  ;;  %v840_v44 = vld [vmem:[#allocation5 + $0x1770] sm:$0xff]  ;;  %v2931_v45 = vpack.c.bf16 %v853_v38, %v841_v37  ;;  %v2805_v51 = vpack.c.bf16 %v850_v43, %v838_v42  ;;  %v207_v37 = vld [vmem:[#allocation5 + $0x3a8] sm:$0xff]  ;;  %v194_v43 = vld [vmem:[#allocation5 + $0x340] sm:$0xff] }
 0x123   :  { %2912 = vmatprep.subr.bf16.mxu1 %v2911_v49  ;;  %v101_v49 = vld [vmem:[#allocation5 + $0x58] sm:$0xff]  ;;  %v2933_v52 = vpack.c.bf16 %v852_v46, %v840_v44  ;;  %v206_v44 = vld [vmem:[#allocation5 + $0x3a0] sm:$0xff]  ;;  %v196_v46 = vld [vmem:[#allocation5 + $0x350] sm:$0xff] }
 0x124   :  { %v268_v23 = vld [vmem:[#allocation5 + $0x590] sm:$0xff] }
 0x125   :  { %2786 = vmatpush1.bf16.msra.mxu0 %v2785_v55  ;;  %v110_v55 = vld [vmem:[#allocation5 + $0xa0] sm:$0xff]  ;;  %v280_v25 = vld [vmem:[#allocation5 + $0x5f0] sm:$0xff] }
 0x126   :  { %2914 = vmatpush1.bf16.msra.mxu1 %v2913_v56  ;;  %2788 = vmatprep.subr.bf16.mxu0 %v2787_v57  ;;  %v3063_v56 = vpack.c.bf16 %v113_v50, %v101_v49  ;;  %v100_v57 = vld [vmem:[#allocation5 + $0x50] sm:$0xff]  ;;  %v219_v50 = vld [vmem:[#allocation5 + $0x408] sm:$0xff] }
 0x127   :  { %2916 = vmatprep.subr.bf16.mxu1 %v2915_v61  ;;  %v2937_v61 = vpack.c.bf16 %v110_v55, %v98_v54  ;;  %v3065_v0 = vpack.c.bf16 %v112_v58, %v100_v57  ;;  %v233_v54 = vld [vmem:[#allocation5 + $0x478] sm:$0xff]  ;;  %v218_v57 = vld [vmem:[#allocation5 + $0x400] sm:$0xff] }
 0x128   :  { %v3417_v55 = vld [vmem:[#allocation2 + $0x98] sm:$0xff]  ;;  %v230_v58 = vld [vmem:[#allocation5 + $0x460] sm:$0xff] }
 0x129   :  { %2790 = vmatpush1.bf16.msra.mxu0 %v2789_v3  ;;  %v2939_v3 = vpack.c.bf16 %v135_v60, %v123_v59  ;;  %v220_v60 = vld [vmem:[#allocation5 + $0x410] sm:$0xff]  ;;  %v2957_v2 = vpack.c.bf16 %v230_v58, %v218_v57  ;;  %v341_v57 = vld [vmem:[#allocation5 + $0x7d8] sm:$0xff] }
 0x12a   :  { %2918 = vmatpush1.bf16.msra.mxu1 %v2917_v4  ;;  %2792 = vmatprep.subr.bf16.mxu0 %v2791_v5  ;;  %v124_v4 = vld [vmem:[#allocation5 + $0x110] sm:$0xff]  ;;  %v353_v58 = vld [vmem:[#allocation5 + $0x838] sm:$0xff] }
 0x12b   :  { %2920 = vmatprep.subr.bf16.mxu1 %v2919_v9  ;;  %v136_v5 = vld [vmem:[#allocation5 + $0x170] sm:$0xff]  ;;  %v159_v9 = vld [vmem:[#allocation5 + $0x228] sm:$0xff] }
 0x12c   :  { %v3069_v14 = vpack.c.bf16 %v136_v5, %v124_v4  ;;  %v257_v4 = vld [vmem:[#allocation5 + $0x538] sm:$0xff] }
 0x12d   :  { %2794 = vmatpush1.bf16.msra.mxu0 %v2793_v15  ;;  %v146_v15 = vld [vmem:[#allocation5 + $0x1c0] sm:$0xff]  ;;  %v3419_v5 = vld [vmem:[#allocation2 + $0xb8] sm:$0xff] }
 0x12e   :  { %2922 = vmatpush1.bf16.msra.mxu1 %v2921_v16  ;;  %2796 = vmatprep.subr.bf16.mxu0 %v2795_v17  ;;  %v158_v16 = vld [vmem:[#allocation5 + $0x220] sm:$0xff]  ;;  %v2943_v17 = vpack.c.bf16 %v159_v9, %v147_v8 }
 0x12f   :  { %2924 = vmatprep.subr.bf16.mxu1 %v2923_v21  ;;  %v3071_v21 = vpack.c.bf16 %v161_v12, %v149_v11  ;;  %v2945_v24 = vpack.c.bf16 %v158_v16, %v146_v15  ;;  %v254_v8 = vld [vmem:[#allocation5 + $0x520] sm:$0xff]  ;;  %v256_v11 = vld [vmem:[#allocation5 + $0x530] sm:$0xff]  ;;  %v279_v15 = vld [vmem:[#allocation5 + $0x5e8] sm:$0xff] }
 0x130   :  { %v3420_v12 = vld [vmem:[#allocation2 + $0xb0] sm:$0xff] }
 0x131   :  { %2798 = vmatpush1.bf16.msra.mxu0 %v2797_v27  ;;  %v3413_v27 = vld [vmem:[#allocation2 + $0x58] sm:$0xff] }
 0x132   :  { %2926 = vmatpush1.bf16.msra.mxu1 %v2925_v28  ;;  %2800 = vmatprep.subr.bf16.mxu0 %v2799_v29  ;;  %v3073_v28 = vpack.c.bf16 %v160_v19, %v148_v18  ;;  %v170_v29 = vld [vmem:[#allocation5 + $0x280] sm:$0xff]  ;;  %v281_v18 = vld [vmem:[#allocation5 + $0x5f8] sm:$0xff] }
 0x133   :  { %2928 = vmatprep.subr.bf16.mxu1 %v2927_v33  ;;  %v184_v33 = vld [vmem:[#allocation5 + $0x2f0] sm:$0xff]  ;;  %v2949_v38 = vpack.c.bf16 %v182_v30, %v170_v29  ;;  %v3421_v19 = vld [vmem:[#allocation2 + $0xd8] sm:$0xff] }
 0x134   :  { %v3077_v42 = vpack.c.bf16 %v184_v33, %v172_v32  ;;  %v293_v30 = vld [vmem:[#allocation5 + $0x658] sm:$0xff] }
 0x135   :  { %2802 = vmatpush1.bf16.msra.mxu0 %v2801_v39  ;;  %v197_v39 = vld [vmem:[#allocation5 + $0x358] sm:$0xff] }
 0x136   :  { %2930 = vmatpush1.bf16.msra.mxu1 %v2929_v40  ;;  %2804 = vmatprep.subr.bf16.mxu0 %v2803_v41  ;;  %v209_v40 = vld [vmem:[#allocation5 + $0x3b8] sm:$0xff] }
 0x137   :  { %2932 = vmatprep.subr.bf16.mxu1 %v2931_v45  ;;  %v3415_v41 = vld [vmem:[#allocation2 + $0x78] sm:$0xff]  ;;  %v2951_v45 = vpack.c.bf16 %v207_v37, %v195_v36  ;;  %v3079_v49 = vpack.c.bf16 %v209_v40, %v197_v39  ;;  %v290_v36 = vld [vmem:[#allocation5 + $0x640] sm:$0xff]  ;;  %v304_v40 = vld [vmem:[#allocation5 + $0x6b0] sm:$0xff] }
 0x138   :  { %v3423_v33 = vld [vmem:[#allocation2 + $0xf8] sm:$0xff]  ;;  %v302_v37 = vld [vmem:[#allocation5 + $0x6a0] sm:$0xff] }
 0x139   :  { %2806 = vmatpush1.bf16.msra.mxu0 %v2805_v51  ;;  %v231_v51 = vld [vmem:[#allocation5 + $0x468] sm:$0xff] }
 0x13a   :  { %2934 = vmatpush1.bf16.msra.mxu1 %v2933_v52  ;;  %2936 = vmatprep.subr.bf16.mxu0 %v2935_v53  ;;  %v2953_v52 = vpack.c.bf16 %v206_v44, %v194_v43  ;;  %v221_v53 = vld [vmem:[#allocation5 + $0x418] sm:$0xff]  ;;  %v2955_v59 = vpack.c.bf16 %v231_v51, %v219_v50  ;;  %v3424_v43 = vld [vmem:[#allocation2 + $0xf0] sm:$0xff]  ;;  %v326_v50 = vld [vmem:[#allocation5 + $0x760] sm:$0xff] }
 0x13b   :  { %3064 = vmatprep.subr.bf16.mxu1 %v3063_v56  ;;  %v3081_v56 = vpack.c.bf16 %v208_v47, %v196_v46  ;;  %v3083_v63 = vpack.c.bf16 %v233_v54, %v221_v53  ;;  %v317_v44 = vld [vmem:[#allocation5 + $0x718] sm:$0xff]  ;;  %v2969_v46 = vpack.c.bf16 %v302_v37, %v290_v36  ;;  %v316_v51 = vld [vmem:[#allocation5 + $0x710] sm:$0xff]  ;;  %v339_v54 = vld [vmem:[#allocation5 + $0x7c8] sm:$0xff] }
 0x13c   :  { %1552 = vmatmul.mubr.f32.vlgmr.msra.gmra.mrb[16].mxu0 %v3410_v6  ;;  %v328_v53 = vld [vmem:[#allocation5 + $0x770] sm:$0xff] }
 0x13d   :  { %1778 = vmatmul.mubr.f32.vlgmr.msra.gmra.mrb[16].mxu1 %v3410_v6  ;;  %2938 = vmatpush1.bf16.msra.mxu0 %v2937_v61  ;;  %v232_v61 = vld [vmem:[#allocation5 + $0x470] sm:$0xff] }
 0x13e   :  { %3066 = vmatpush1.bf16.msra.mxu1 %v3065_v0  ;;  %1557 = vmatprep.mubr.f32.mxu0 %v3411_v13  ;;  %v243_v0 = vld [vmem:[#allocation5 + $0x4c8] sm:$0xff]  ;;  %v3085_v6 = vpack.c.bf16 %v232_v61, %v220_v60  ;;  %v3101_v60 = vpack.c.bf16 %v328_v53, %v316_v51  ;;  %v412_v36 = vld [vmem:[#allocation5 + $0xa10] sm:$0xff]  ;;  %v461_v53 = vld [vmem:[#allocation5 + $0xb98] sm:$0xff] }
 0x13f   :  { %1783 = vmatprep.mubr.f32.mxu1 %v3411_v13  ;;  %2940 = vmatprep.subr.bf16.mxu0 %v2939_v3  ;;  %v245_v3 = vld [vmem:[#allocation5 + $0x4d8] sm:$0xff]  ;;  %v2959_v9 = vpack.c.bf16 %v255_v1, %v243_v0  ;;  %v340_v0 = vld [vmem:[#allocation5 + $0x7d0] sm:$0xff]  ;;  %v3103_v1 = vpack.c.bf16 %v353_v58, %v341_v57  ;;  %v459_v51 = vld [vmem:[#allocation5 + $0xb88] sm:$0xff] }
 0x140   :  { %1558 = vmatmul.mubr.f32.gmra.mrb[18].mxu0 %v3412_v20  ;;  %3068 = vmatprep.subr.bf16.mxu1 %v3067_v7  ;;  %v242_v7 = vld [vmem:[#allocation5 + $0x4c0] sm:$0xff]  ;;  %v3087_v13 = vpack.c.bf16 %v257_v4, %v245_v3  ;;  %v363_v3 = vld [vmem:[#allocation5 + $0x888] sm:$0xff] }
 0x141   :  { %1784 = vmatmul.mubr.f32.gmra.mrb[18].mxu1 %v3412_v20  ;;  %2942 = vmatpush1.bf16.msra.mxu0 %v2941_v10  ;;  %v244_v10 = vld [vmem:[#allocation5 + $0x4d0] sm:$0xff]  ;;  %v2961_v16 = vpack.c.bf16 %v254_v8, %v242_v7  ;;  %v375_v4 = vld [vmem:[#allocation5 + $0x8e8] sm:$0xff]  ;;  %v458_v58 = vld [vmem:[#allocation5 + $0xb80] sm:$0xff] }
 0x142   :  { %3070 = vmatpush1.bf16.msra.mxu1 %v3069_v14  ;;  %1563 = vmatprep.mubr.f32.mxu0 %v3413_v27  ;;  %v267_v14 = vld [vmem:[#allocation5 + $0x588] sm:$0xff]  ;;  %v3089_v20 = vpack.c.bf16 %v256_v11, %v244_v10  ;;  %v362_v10 = vld [vmem:[#allocation5 + $0x880] sm:$0xff] }
 0x143   :  { %1789 = vmatprep.mubr.f32.mxu1 %v3413_v27  ;;  %2944 = vmatprep.subr.bf16.mxu0 %v2943_v17  ;;  %v269_v17 = vld [vmem:[#allocation5 + $0x598] sm:$0xff]  ;;  %v303_v27 = vld [vmem:[#allocation5 + $0x6a8] sm:$0xff]  ;;  %v374_v11 = vld [vmem:[#allocation5 + $0x8e0] sm:$0xff] }
 0x144   :  { %1564 = vmatmul.mubr.f32.gmra.mrb[20].mxu0 %v3414_v34  ;;  %3072 = vmatprep.subr.bf16.mxu1 %v3071_v21  ;;  %v266_v21 = vld [vmem:[#allocation5 + $0x580] sm:$0xff]  ;;  %v3091_v29 = vpack.c.bf16 %v281_v18, %v269_v17  ;;  %v389_v17 = vld [vmem:[#allocation5 + $0x958] sm:$0xff] }
 0x145   :  { %1790 = vmatmul.mubr.f32.gmra.mrb[20].mxu1 %v3414_v34  ;;  %2946 = vmatpush1.bf16.msra.mxu0 %v2945_v24  ;;  %v2963_v24 = vpack.c.bf16 %v279_v15, %v267_v14  ;;  %v2965_v32 = vpack.c.bf16 %v278_v22, %v266_v21  ;;  %v3093_v34 = vpack.c.bf16 %v280_v25, %v268_v23  ;;  %v376_v14 = vld [vmem:[#allocation5 + $0x8f0] sm:$0xff]  ;;  %v387_v15 = vld [vmem:[#allocation5 + $0x948] sm:$0xff]  ;;  %v401_v18 = vld [vmem:[#allocation5 + $0x9b8] sm:$0xff] }
 0x146   :  { %3074 = vmatpush1.bf16.msra.mxu1 %v3073_v28  ;;  %1569 = vmatprep.mubr.f32.mxu0 %v3415_v41  ;;  %v3422_v28 = vld [vmem:[#allocation2 + $0xd0] sm:$0xff]  ;;  %v386_v22 = vld [vmem:[#allocation5 + $0x940] sm:$0xff]  ;;  %v3111_v25 = vpack.c.bf16 %v401_v18, %v389_v17 }
 0x147   :  { %1795 = vmatprep.mubr.f32.mxu1 %v3415_v41  ;;  %2948 = vmatprep.subr.bf16.mxu0 %v2947_v31  ;;  %v305_v31 = vld [vmem:[#allocation5 + $0x6b8] sm:$0xff]  ;;  %v315_v41 = vld [vmem:[#allocation5 + $0x708] sm:$0xff]  ;;  %v398_v23 = vld [vmem:[#allocation5 + $0x9a0] sm:$0xff] }
 0x148   :  { %1570 = vmatmul.mubr.f32.gmra.mrb[22].mxu0 %v3416_v48  ;;  %3076 = vmatprep.subr.bf16.mxu1 %v3075_v35  ;;  %v2967_v35 = vpack.c.bf16 %v303_v27, %v291_v26  ;;  %v3095_v39 = vpack.c.bf16 %v305_v31, %v293_v30  ;;  %v400_v26 = vld [vmem:[#allocation5 + $0x9b0] sm:$0xff]  ;;  %v411_v27 = vld [vmem:[#allocation5 + $0xa08] sm:$0xff]  ;;  %v425_v30 = vld [vmem:[#allocation5 + $0xa78] sm:$0xff]  ;;  %v2985_v31 = vpack.c.bf16 %v398_v23, %v386_v22 }
 0x149   :  { %1796 = vmatmul.mubr.f32.gmra.mrb[22].mxu1 %v3416_v48  ;;  %2950 = vmatpush1.bf16.msra.mxu0 %v2949_v38  ;;  %v292_v38 = vld [vmem:[#allocation5 + $0x650] sm:$0xff]  ;;  %v506_v18 = vld [vmem:[#allocation5 + $0xd00] sm:$0xff]  ;;  %v531_v23 = vld [vmem:[#allocation5 + $0xdc8] sm:$0xff] }
 0x14a   :  { %3078 = vmatpush1.bf16.msra.mxu1 %v3077_v42  ;;  %1575 = vmatprep.mubr.f32.mxu0 %v3417_v55  ;;  %v327_v42 = vld [vmem:[#allocation5 + $0x768] sm:$0xff]  ;;  %v3097_v47 = vpack.c.bf16 %v304_v40, %v292_v38  ;;  %v424_v38 = vld [vmem:[#allocation5 + $0xa70] sm:$0xff] }
 0x14b   :  { %1801 = vmatprep.mubr.f32.mxu1 %v3417_v55  ;;  %2952 = vmatprep.subr.bf16.mxu0 %v2951_v45  ;;  %v329_v45 = vld [vmem:[#allocation5 + $0x778] sm:$0xff]  ;;  %v2971_v48 = vpack.c.bf16 %v327_v42, %v315_v41  ;;  %v351_v55 = vld [vmem:[#allocation5 + $0x828] sm:$0xff]  ;;  %v520_v22 = vld [vmem:[#allocation5 + $0xd70] sm:$0xff] }
 0x14c   :  { %1576 = vmatmul.mubr.f32.gmra.mrb[24].mxu0 %v3418_v62  ;;  %3080 = vmatprep.subr.bf16.mxu1 %v3079_v49  ;;  %v314_v49 = vld [vmem:[#allocation5 + $0x700] sm:$0xff]  ;;  %v2975_v61 = vpack.c.bf16 %v351_v55, %v339_v54  ;;  %v447_v40 = vld [vmem:[#allocation5 + $0xb28] sm:$0xff]  ;;  %v437_v41 = vld [vmem:[#allocation5 + $0xad8] sm:$0xff] }
 0x14d   :  { %1802 = vmatmul.mubr.f32.gmra.mrb[24].mxu1 %v3418_v62  ;;  %2954 = vmatpush1.bf16.msra.mxu0 %v2953_v52  ;;  %v3099_v52 = vpack.c.bf16 %v329_v45, %v317_v44  ;;  %v338_v62 = vld [vmem:[#allocation5 + $0x7c0] sm:$0xff]  ;;  %v449_v42 = vld [vmem:[#allocation5 + $0xb38] sm:$0xff]  ;;  %v3117_v44 = vpack.c.bf16 %v424_v38, %v412_v36  ;;  %v555_v36 = vld [vmem:[#allocation5 + $0xe88] sm:$0xff] }
 0x14e   :  { %3082 = vmatpush1.bf16.msra.mxu1 %v3081_v56  ;;  %1581 = vmatprep.mubr.f32.mxu0 %v3419_v5  ;;  %v3425_v56 = vld [vmem:[#allocation2 + $0x8] sm:$0xff]  ;;  %v473_v54 = vld [vmem:[#allocation5 + $0xbf8] sm:$0xff] }
 0x14f   :  { %1807 = vmatprep.mubr.f32.mxu1 %v3419_v5  ;;  %2956 = vmatprep.subr.bf16.mxu0 %v2955_v59  ;;  %v2973_v59 = vpack.c.bf16 %v326_v50, %v314_v49  ;;  %v365_v5 = vld [vmem:[#allocation5 + $0x898] sm:$0xff]  ;;  %v3119_v49 = vpack.c.bf16 %v449_v42, %v437_v41  ;;  %v448_v50 = vld [vmem:[#allocation5 + $0xb30] sm:$0xff]  ;;  %v3427_v38 = vld [vmem:[#allocation2 + $0x28] sm:$0xff]  ;;  %v862_v41 = vlaneseq }
 0x150   :  { %1582 = vmatmul.mubr.f32.gmra.mrb[26].mxu0 %v3420_v12  ;;  %3084 = vmatprep.subr.bf16.mxu1 %v3083_v63  ;;  %v350_v63 = vld [vmem:[#allocation5 + $0x820] sm:$0xff] }
 0x151   :  { %1808 = vmatmul.mubr.f32.gmra.mrb[26].mxu1 %v3420_v12  ;;  %2958 = vmatpush1.bf16.msra.mxu0 %v2957_v2  ;;  %v352_v2 = vld [vmem:[#allocation5 + $0x830] sm:$0xff]  ;;  %v2977_v7 = vpack.c.bf16 %v350_v63, %v338_v62  ;;  %v483_v63 = vld [vmem:[#allocation5 + $0xc48] sm:$0xff]  ;;  %v3428_v42 = vld [vmem:[#allocation2 + $0x20] sm:$0xff] }
 0x152   :  { %3086 = vmatpush1.bf16.msra.mxu1 %v3085_v6  ;;  %1587 = vmatprep.mubr.f32.mxu0 %v3421_v19  ;;  %v377_v6 = vld [vmem:[#allocation5 + $0x8f8] sm:$0xff]  ;;  %v3105_v8 = vpack.c.bf16 %v352_v2, %v340_v0  ;;  %v364_v12 = vld [vmem:[#allocation5 + $0x890] sm:$0xff]  ;;  %v495_v0 = vld [vmem:[#allocation5 + $0xca8] sm:$0xff] }
 0x153   :  { %1813 = vmatprep.mubr.f32.mxu1 %v3421_v19  ;;  %2960 = vmatprep.subr.bf16.mxu0 %v2959_v9  ;;  %v2979_v9 = vpack.c.bf16 %v375_v4, %v363_v3  ;;  %v2981_v19 = vpack.c.bf16 %v374_v11, %v362_v10  ;;  %v472_v62 = vld [vmem:[#allocation5 + $0xbf0] sm:$0xff]  ;;  %v497_v2 = vld [vmem:[#allocation5 + $0xcb8] sm:$0xff]  ;;  %v507_v11 = vld [vmem:[#allocation5 + $0xd08] sm:$0xff] }
 0x154   :  { %1588 = vmatmul.mubr.f32.gmra.mrb[28].mxu0 %v3422_v28  ;;  %3088 = vmatprep.subr.bf16.mxu1 %v3087_v13  ;;  %v3107_v13 = vpack.c.bf16 %v377_v6, %v365_v5  ;;  %v2999_v5 = vpack.c.bf16 %v495_v0, %v483_v63  ;;  %v482_v6 = vld [vmem:[#allocation5 + $0xc40] sm:$0xff]  ;;  %v496_v10 = vld [vmem:[#allocation5 + $0xcb0] sm:$0xff] }
 0x155   :  { %1814 = vmatmul.mubr.f32.gmra.mrb[28].mxu1 %v3422_v28  ;;  %2962 = vmatpush1.bf16.msra.mxu0 %v2961_v16  ;;  %v399_v16 = vld [vmem:[#allocation5 + $0x9a8] sm:$0xff]  ;;  %v580_v63 = vld [vmem:[#allocation5 + $0xf50] sm:$0xff] }
 0x156   :  { %3090 = vmatpush1.bf16.msra.mxu1 %v3089_v20  ;;  %1593 = vmatprep.mubr.f32.mxu0 %v3423_v33  ;;  %v3109_v20 = vpack.c.bf16 %v376_v14, %v364_v12  ;;  %v2983_v21 = vpack.c.bf16 %v399_v16, %v387_v15  ;;  %v423_v28 = vld [vmem:[#allocation5 + $0xa68] sm:$0xff]  ;;  %v521_v14 = vld [vmem:[#allocation5 + $0xd78] sm:$0xff] }
 0x157   :  { %1819 = vmatprep.mubr.f32.mxu1 %v3423_v33  ;;  %2964 = vmatprep.subr.bf16.mxu0 %v2963_v24  ;;  %v388_v24 = vld [vmem:[#allocation5 + $0x950] sm:$0xff]  ;;  %v2987_v33 = vpack.c.bf16 %v423_v28, %v411_v27  ;;  %v519_v12 = vld [vmem:[#allocation5 + $0xd68] sm:$0xff]  ;;  %v545_v27 = vld [vmem:[#allocation5 + $0xe38] sm:$0xff] }
 0x158   :  { %1594 = vmatmul.mubr.f32.gmra.mrb[30].mxu0 %v3424_v43  ;;  %3092 = vmatprep.subr.bf16.mxu1 %v3091_v29  ;;  %v413_v29 = vld [vmem:[#allocation5 + $0xa18] sm:$0xff]  ;;  %v3003_v17 = vpack.c.bf16 %v519_v12, %v507_v11 }
 0x159   :  { %1820 = vmatmul.mubr.f32.gmra.mrb[30].mxu1 %v3424_v43  ;;  %2966 = vmatpush1.bf16.msra.mxu0 %v2965_v32  ;;  %v3113_v32 = vpack.c.bf16 %v400_v26, %v388_v24  ;;  %v3115_v37 = vpack.c.bf16 %v425_v30, %v413_v29  ;;  %v543_v24 = vld [vmem:[#allocation5 + $0xe28] sm:$0xff]  ;;  %v533_v26 = vld [vmem:[#allocation5 + $0xdd8] sm:$0xff] }
 0x15a   :  { %3094 = vmatpush1.bf16.msra.mxu1 %v3093_v34  ;;  %2968 = vmatprep.subr.bf16.mxu0 %v2967_v35  ;;  %v410_v34 = vld [vmem:[#allocation5 + $0xa00] sm:$0xff]  ;;  %v3007_v30 = vpack.c.bf16 %v543_v24, %v531_v23  ;;  %v3433_v23 = vld [vmem:[#allocation2 + $0x88] sm:$0xff] }
 0x15b   :  { %3096 = vmatprep.subr.bf16.mxu1 %v3095_v39  ;;  %1890 = vmatprep.mubr.f32.mxu0 %v3425_v56  ;;  %v422_v35 = vld [vmem:[#allocation5 + $0xa60] sm:$0xff]  ;;  %v435_v39 = vld [vmem:[#allocation5 + $0xac8] sm:$0xff] }
 0x15c   :  { %2116 = vmatprep.mubr.f32.mxu1 %v3425_v56  ;;  %v2989_v43 = vpack.c.bf16 %v422_v35, %v410_v34  ;;  %v2991_v45 = vpack.c.bf16 %v447_v40, %v435_v39  ;;  %v3135_v34 = vpack.c.bf16 %v545_v27, %v533_v26  ;;  %v544_v35 = vld [vmem:[#allocation5 + $0xe30] sm:$0xff]  ;;  %v557_v39 = vld [vmem:[#allocation5 + $0xe98] sm:$0xff]  ;;  %v3434_v27 = vld [vmem:[#allocation2 + $0x80] sm:$0xff] }
 0x15d   :  { %2970 = vmatpush1.bf16.msra.mxu0 %v2969_v46  ;;  %v434_v46 = vld [vmem:[#allocation5 + $0xac0] sm:$0xff]  ;;  %v569_v40 = vld [vmem:[#allocation5 + $0xef8] sm:$0xff] }
 0x15e   :  { %3098 = vmatpush1.bf16.msra.mxu1 %v3097_v47  ;;  %2972 = vmatprep.subr.bf16.mxu0 %v2971_v48  ;;  %v446_v47 = vld [vmem:[#allocation5 + $0xb20] sm:$0xff]  ;;  %v436_v48 = vld [vmem:[#allocation5 + $0xad0] sm:$0xff]  ;;  %v641_v26 = vld [vmem:[#allocation5 + $0x1138] sm:$0xff] }
 0x15f   :  { %3100 = vmatprep.subr.bf16.mxu1 %v3099_v52  ;;  %v471_v52 = vld [vmem:[#allocation5 + $0xbe8] sm:$0xff]  ;;  %v2993_v55 = vpack.c.bf16 %v446_v47, %v434_v46  ;;  %v3121_v56 = vpack.c.bf16 %v448_v50, %v436_v48  ;;  %v554_v46 = vld [vmem:[#allocation5 + $0xe80] sm:$0xff]  ;;  %v556_v48 = vld [vmem:[#allocation5 + $0xe90] sm:$0xff] }
 0x160   :  { %v2995_v57 = vpack.c.bf16 %v471_v52, %v459_v51  ;;  %v566_v47 = vld [vmem:[#allocation5 + $0xee0] sm:$0xff]  ;;  %v568_v50 = vld [vmem:[#allocation5 + $0xef0] sm:$0xff]  ;;  %v579_v51 = vld [vmem:[#allocation5 + $0xf48] sm:$0xff] }
 0x161   :  { %2974 = vmatpush1.bf16.msra.mxu0 %v2973_v59  ;;  %v470_v59 = vld [vmem:[#allocation5 + $0xbe0] sm:$0xff]  ;;  %v591_v52 = vld [vmem:[#allocation5 + $0xfa8] sm:$0xff] }
 0x162   :  { %3102 = vmatpush1.bf16.msra.mxu1 %v3101_v60  ;;  %2976 = vmatprep.subr.bf16.mxu0 %v2975_v61  ;;  %v460_v60 = vld [vmem:[#allocation5 + $0xb90] sm:$0xff]  ;;  %v3123_v61 = vpack.c.bf16 %v473_v54, %v461_v53  ;;  %v2997_v3 = vpack.c.bf16 %v470_v59, %v458_v58  ;;  %v3429_v53 = vld [vmem:[#allocation2 + $0x48] sm:$0xff]  ;;  %v581_v54 = vld [vmem:[#allocation5 + $0xf58] sm:$0xff]  ;;  %v3013_v58 = vpack.c.bf16 %v566_v47, %v554_v46 }
 0x163   :  { %3104 = vmatprep.subr.bf16.mxu1 %v3103_v1  ;;  %v485_v1 = vld [vmem:[#allocation5 + $0xc58] sm:$0xff]  ;;  %v3125_v4 = vpack.c.bf16 %v472_v62, %v460_v60  ;;  %v3141_v59 = vpack.c.bf16 %v568_v50, %v556_v48  ;;  %v3015_v60 = vpack.c.bf16 %v591_v52, %v579_v51  ;;  %v590_v62 = vld [vmem:[#allocation5 + $0xfa0] sm:$0xff] }
 0x164   :  { %v653_v46 = vld [vmem:[#allocation5 + $0x1198] sm:$0xff]  ;;  %v3436_v48 = vld [vmem:[#allocation2 + $0xa0] sm:$0xff] }
 0x165   :  { %2978 = vmatpush1.bf16.msra.mxu0 %v2977_v7  ;;  %v494_v7 = vld [vmem:[#allocation5 + $0xca0] sm:$0xff]  ;;  %v665_v47 = vld [vmem:[#allocation5 + $0x11f8] sm:$0xff] }
 0x166   :  { %3106 = vmatpush1.bf16.msra.mxu1 %v3105_v8  ;;  %2980 = vmatprep.subr.bf16.mxu0 %v2979_v9  ;;  %v484_v8 = vld [vmem:[#allocation5 + $0xc50] sm:$0xff]  ;;  %v3127_v9 = vpack.c.bf16 %v497_v2, %v485_v1  ;;  %v3001_v15 = vpack.c.bf16 %v494_v7, %v482_v6  ;;  %v603_v2 = vld [vmem:[#allocation5 + $0x1008] sm:$0xff]  ;;  %v605_v6 = vld [vmem:[#allocation5 + $0x1018] sm:$0xff] }
 0x167   :  { %3108 = vmatprep.subr.bf16.mxu1 %v3107_v13  ;;  %v509_v13 = vld [vmem:[#allocation5 + $0xd18] sm:$0xff]  ;;  %v3129_v16 = vpack.c.bf16 %v496_v10, %v484_v8  ;;  %v592_v1 = vld [vmem:[#allocation5 + $0xfb0] sm:$0xff]  ;;  %v3432_v8 = vld [vmem:[#allocation2 + $0x60] sm:$0xff] }
 0x168   :  { %v617_v7 = vld [vmem:[#allocation5 + $0x1078] sm:$0xff]  ;;  %v3679_v10 = vld [vmem:[#allocation7] sm:$0xff] }
 0x169   :  { %2982 = vmatpush1.bf16.msra.mxu0 %v2981_v19  ;;  %v518_v19 = vld [vmem:[#allocation5 + $0xd60] sm:$0xff] }
 0x16a   :  { %3110 = vmatpush1.bf16.msra.mxu1 %v3109_v20  ;;  %2984 = vmatprep.subr.bf16.mxu0 %v2983_v21  ;;  %v508_v20 = vld [vmem:[#allocation5 + $0xd10] sm:$0xff]  ;;  %v3131_v21 = vpack.c.bf16 %v521_v14, %v509_v13  ;;  %v3005_v28 = vpack.c.bf16 %v518_v19, %v506_v18  ;;  %v3145_v13 = vpack.c.bf16 %v592_v1, %v580_v63  ;;  %v675_v63 = vld [vmem:[#allocation5 + $0x1248] sm:$0xff] }
 0x16b   :  { %3112 = vmatprep.subr.bf16.mxu1 %v3111_v25  ;;  %v3426_v25 = vld [vmem:[#allocation2] sm:$0xff]  ;;  %v3133_v29 = vpack.c.bf16 %v520_v22, %v508_v20  ;;  %v604_v18 = vld [vmem:[#allocation5 + $0x1010] sm:$0xff]  ;;  %v3147_v19 = vpack.c.bf16 %v617_v7, %v605_v6  ;;  %v639_v22 = vld [vmem:[#allocation5 + $0x1128] sm:$0xff] }
 0x16c   :  { %v616_v20 = vld [vmem:[#allocation5 + $0x1070] sm:$0xff]  ;;  %v3437_v1 = vld [vmem:[#allocation2 + $0xc8] sm:$0xff]  ;;  %v677_v6 = vld [vmem:[#allocation5 + $0x1258] sm:$0xff] }
 0x16d   :  { %2986 = vmatpush1.bf16.msra.mxu0 %v2985_v31  ;;  %v530_v31 = vld [vmem:[#allocation5 + $0xdc0] sm:$0xff]  ;;  %v689_v7 = vld [vmem:[#allocation5 + $0x12b8] sm:$0xff] }
 0x16e   :  { %3114 = vmatpush1.bf16.msra.mxu1 %v3113_v32  ;;  %2988 = vmatprep.subr.bf16.mxu0 %v2987_v33  ;;  %v542_v32 = vld [vmem:[#allocation5 + $0xe20] sm:$0xff]  ;;  %v532_v33 = vld [vmem:[#allocation5 + $0xdd0] sm:$0xff] }
 0x16f   :  { %3116 = vmatprep.subr.bf16.mxu1 %v3115_v37  ;;  %v567_v37 = vld [vmem:[#allocation5 + $0xee8] sm:$0xff] }
 0x171   :  { %2990 = vmatpush1.bf16.msra.mxu0 %v2989_v43  ;;  %v3009_v43 = vpack.c.bf16 %v542_v32, %v530_v31  ;;  %v3149_v32 = vpack.c.bf16 %v616_v20, %v604_v18  ;;  %v674_v20 = vld [vmem:[#allocation5 + $0x1240] sm:$0xff] }
 0x172   :  { %3118 = vmatpush1.bf16.msra.mxu1 %v3117_v44  ;;  %2992 = vmatprep.subr.bf16.mxu0 %v2991_v45  ;;  %v3137_v44 = vpack.c.bf16 %v544_v35, %v532_v33  ;;  %v3011_v45 = vpack.c.bf16 %v567_v37, %v555_v36  ;;  %v638_v35 = vld [vmem:[#allocation5 + $0x1120] sm:$0xff]  ;;  %v628_v36 = vld [vmem:[#allocation5 + $0x10d0] sm:$0xff] }
 0x173   :  { %3120 = vmatprep.subr.bf16.mxu1 %v3119_v49  ;;  %v3139_v49 = vpack.c.bf16 %v569_v40, %v557_v39  ;;  %v640_v39 = vld [vmem:[#allocation5 + $0x1130] sm:$0xff]  ;;  %v651_v40 = vld [vmem:[#allocation5 + $0x1188] sm:$0xff] }
 0x175   :  { %2994 = vmatpush1.bf16.msra.mxu0 %v2993_v55  ;;  %v593_v55 = vld [vmem:[#allocation5 + $0xfb8] sm:$0xff] }
 0x176   :  { %3122 = vmatpush1.bf16.msra.mxu1 %v3121_v56  ;;  %2996 = vmatprep.subr.bf16.mxu0 %v2995_v57  ;;  %v3676_v56 = vshrl.u32 %v862_v41, 7  ;;  %v3430_v57 = vld [vmem:[#allocation2 + $0x40] sm:$0xff]  ;;  %v3143_v0 = vpack.c.bf16 %v593_v55, %v581_v54  ;;  %v663_v41 = vld [vmem:[#allocation5 + $0x11e8] sm:$0xff]  ;;  %v3153_v54 = vpack.c.bf16 %v640_v39, %v628_v36  ;;  %v701_v36 = vld [vmem:[#allocation5 + $0x1318] sm:$0xff] }
 0x177   :  { %3124 = vmatprep.subr.bf16.mxu1 %v3123_v61  ;;  %v578_v61 = vld [vmem:[#allocation5 + $0xf40] sm:$0xff]  ;;  %v3027_v55 = vpack.c.bf16 %v663_v41, %v651_v40 }
 0x178   :  { %v872_v11 = vsub.s32 2, %v3676_v56  ;;  %v868_v12 = vsub.s32 1, %v3676_v56  ;;  %v876_v14 = vsub.s32 3, %v3676_v56 }
 0x179   :  { %2998 = vmatpush1.bf16.msra.mxu0 %v2997_v3  ;;  %v615_v3 = vld [vmem:[#allocation5 + $0x1068] sm:$0xff] }
 0x17a   :  { %3126 = vmatpush1.bf16.msra.mxu1 %v3125_v4  ;;  %3000 = vmatprep.subr.bf16.mxu0 %v2999_v5  ;;  %v3431_v4 = vld [vmem:[#allocation2 + $0x68] sm:$0xff]  ;;  %v864_v5 = vsub.s32 0, %v3676_v56  ;;  %v3702_v31 = vrot.slane %v3679_v10, %v876_v14 }
 0x17b   :  { %3128 = vmatprep.subr.bf16.mxu1 %v3127_v9  ;;  %v3017_v9 = vpack.c.bf16 %v590_v62, %v578_v61  ;;  %v3155_v61 = vpack.c.bf16 %v665_v47, %v653_v46  ;;  %v664_v62 = vld [vmem:[#allocation5 + $0x11f0] sm:$0xff]  ;;  %v698_v46 = vld [vmem:[#allocation5 + $0x1300] sm:$0xff] }
 0x17c   :  { %1891 = vmatmul.mubr.f32.vlgmr.msra.gmra.mrb[32].mxu0 %v3426_v25  ;;  %v3687_v24 = vrot.slane %v3679_v10, %v864_v5  ;;  %v710_v47 = vld [vmem:[#allocation5 + $0x1360] sm:$0xff] }
 0x17d   :  { %3002 = vmatpush1.bf16.msra.mxu0 %v3001_v15  ;;  %2117 = vmatmul.mubr.f32.vlgmr.msra.gmra.mrb[32].mxu1 %v3426_v25  ;;  %v3019_v15 = vpack.c.bf16 %v615_v3, %v603_v2  ;;  %v629_v25 = vld [vmem:[#allocation5 + $0x10d8] sm:$0xff] }
 0x17e   :  { %3130 = vmatpush1.bf16.msra.mxu1 %v3129_v16  ;;  %3004 = vmatprep.subr.bf16.mxu0 %v3003_v17  ;;  %v602_v16 = vld [vmem:[#allocation5 + $0x1000] sm:$0xff] }
 0x17f   :  { %3132 = vmatprep.subr.bf16.mxu1 %v3131_v21  ;;  %1896 = vmatprep.mubr.f32.mxu0 %v3427_v38  ;;  %v614_v17 = vld [vmem:[#allocation5 + $0x1060] sm:$0xff]  ;;  %v627_v21 = vld [vmem:[#allocation5 + $0x10c8] sm:$0xff] }
 0x180   :  { %2122 = vmatprep.mubr.f32.mxu1 %v3427_v38  ;;  %1897 = vmatmul.mubr.f32.gmra.mrb[34].mxu0 %v3428_v42  ;;  %v3023_v33 = vpack.c.bf16 %v639_v22, %v627_v21  ;;  %v3151_v38 = vpack.c.bf16 %v641_v26, %v629_v25  ;;  %v686_v21 = vld [vmem:[#allocation5 + $0x12a0] sm:$0xff]  ;;  %v676_v22 = vld [vmem:[#allocation5 + $0x1250] sm:$0xff]  ;;  %v3159_v25 = vpack.c.bf16 %v689_v7, %v677_v6 }
 0x181   :  { %3006 = vmatpush1.bf16.msra.mxu0 %v3005_v28  ;;  %2123 = vmatmul.mubr.f32.gmra.mrb[34].mxu1 %v3428_v42  ;;  %v3692_v28 = vrot.slane %v3679_v10, %v872_v11  ;;  %v3435_v42 = vld [vmem:[#allocation2 + $0xa8] sm:$0xff]  ;;  %v688_v26 = vld [vmem:[#allocation5 + $0x12b0] sm:$0xff]  ;;  %v734_v6 = vld [vmem:[#allocation5 + $0x1420] sm:$0xff] }
 0x182   :  { %3134 = vmatpush1.bf16.msra.mxu1 %v3133_v29  ;;  %3008 = vmatprep.subr.bf16.mxu0 %v3007_v30  ;;  %v3697_v29 = vrot.slane %v3679_v10, %v868_v12  ;;  %v3021_v30 = vpack.c.bf16 %v614_v17, %v602_v16  ;;  %v724_v7 = vld [vmem:[#allocation5 + $0x13d0] sm:$0xff] }
 0x183   :  { %3136 = vmatprep.subr.bf16.mxu1 %v3135_v34  ;;  %1902 = vmatprep.mubr.f32.mxu0 %v3429_v53  ;;  %v626_v34 = vld [vmem:[#allocation5 + $0x10c0] sm:$0xff] }
 0x184   :  { %2128 = vmatprep.mubr.f32.mxu1 %v3429_v53  ;;  %1903 = vmatmul.mubr.f32.gmra.mrb[36].mxu0 %v3430_v57  ;;  %v3025_v52 = vpack.c.bf16 %v638_v35, %v626_v34 }
 0x185   :  { %3010 = vmatpush1.bf16.msra.mxu0 %v3009_v43  ;;  %2129 = vmatmul.mubr.f32.gmra.mrb[36].mxu1 %v3430_v57  ;;  %v650_v57 = vld [vmem:[#allocation5 + $0x1180] sm:$0xff] }
 0x186   :  { %3138 = vmatpush1.bf16.msra.mxu1 %v3137_v44  ;;  %3012 = vmatprep.subr.bf16.mxu0 %v3011_v45 }
 0x187   :  { %3140 = vmatprep.subr.bf16.mxu1 %v3139_v49  ;;  %1908 = vmatprep.mubr.f32.mxu0 %v3431_v4 }
 0x188   :  { %2134 = vmatprep.mubr.f32.mxu1 %v3431_v4  ;;  %1909 = vmatmul.mubr.f32.gmra.mrb[38].mxu0 %v3432_v8 }
 0x189   :  { %3014 = vmatpush1.bf16.msra.mxu0 %v3013_v58  ;;  %2135 = vmatmul.mubr.f32.gmra.mrb[38].mxu1 %v3432_v8  ;;  %v662_v58 = vld [vmem:[#allocation5 + $0x11e0] sm:$0xff] }
 0x18a   :  { %3142 = vmatpush1.bf16.msra.mxu1 %v3141_v59  ;;  %3016 = vmatprep.subr.bf16.mxu0 %v3015_v60  ;;  %v652_v59 = vld [vmem:[#allocation5 + $0x1190] sm:$0xff]  ;;  %v3438_v8 = vld [vmem:[#allocation2 + $0xc0] sm:$0xff]  ;;  %v3029_v16 = vpack.c.bf16 %v662_v58, %v650_v57 }
 0x18b   :  { %3144 = vmatprep.subr.bf16.mxu1 %v3143_v0  ;;  %1914 = vmatprep.mubr.f32.mxu0 %v3433_v23  ;;  %v687_v0 = vld [vmem:[#allocation5 + $0x12a8] sm:$0xff]  ;;  %v3157_v18 = vpack.c.bf16 %v664_v62, %v652_v59  ;;  %v725_v59 = vld [vmem:[#allocation5 + $0x13d8] sm:$0xff] }
 0x18c   :  { %2140 = vmatprep.mubr.f32.mxu1 %v3433_v23  ;;  %1915 = vmatmul.mubr.f32.gmra.mrb[40].mxu0 %v3434_v27 }
 0x18d   :  { %3018 = vmatpush1.bf16.msra.mxu0 %v3017_v9  ;;  %2141 = vmatmul.mubr.f32.gmra.mrb[40].mxu1 %v3434_v27  ;;  %v699_v27 = vld [vmem:[#allocation5 + $0x1308] sm:$0xff] }
 0x18e   :  { %3146 = vmatpush1.bf16.msra.mxu1 %v3145_v13  ;;  %3020 = vmatprep.subr.bf16.mxu0 %v3019_v15 }
 0x18f   :  { %v1101_v37 = vpop.f32.mrb[0].mxu0  ;;  %3148 = vmatprep.subr.bf16.mxu1 %v3147_v19  ;;  %1920 = vmatprep.mubr.f32.mxu0 %v3435_v42  ;;  %v3031_v19 = vpack.c.bf16 %v687_v0, %v675_v63  ;;  %v3037_v0 = vpack.c.bf16 %v710_v47, %v698_v46 }
 0x190   :  { %v3191_v43 = vadd.f32 %v1101_v37, %v3687_v24  ;;  %v1327_v44 = vpop.f32.mrb[0].mxu1  ;;  %v1103_v45 = vpop.f32.mrb[1].mxu0  ;;  %2146 = vmatprep.mubr.f32.mxu1 %v3435_v42  ;;  %1921 = vmatmul.mubr.f32.gmra.mrb[42].mxu0 %v3436_v48  ;;  %v713_v37 = vld [vmem:[#allocation5 + $0x1378] sm:$0xff]  ;;  %v3033_v42 = vpack.c.bf16 %v686_v21, %v674_v20 }
 0x191   :  { %v3207_v49 = vadd.f32 %v1327_v44, %v3692_v28  ;;  %v3192_v50 = vadd.f32 %v1103_v45, %v3697_v29  ;;  %v1329_v51 = vpop.f32.mrb[1].mxu1  ;;  %3022 = vmatpush1.bf16.msra.mxu0 %v3021_v30  ;;  %2147 = vmatmul.mubr.f32.gmra.mrb[42].mxu1 %v3436_v48  ;;  %v711_v30 = vld [vmem:[#allocation5 + $0x1368] sm:$0xff]  ;;  %v3161_v44 = vpack.c.bf16 %v688_v26, %v676_v22  ;;  %v700_v48 = vld [vmem:[#allocation5 + $0x1310] sm:$0xff]  ;;  %v749_v20 = vld [vmem:[#allocation5 + $0x1498] sm:$0xff] }
 0x192   :  { %2278 = vst [vmem:[#allocation8] sm:$0xff] %v3191_v43  ;;  %v3208_v53 = vadd.f32 %v1329_v51, %v3702_v31  ;;  %3150 = vmatpush1.bf16.msra.mxu1 %v3149_v32  ;;  %3024 = vmatprep.subr.bf16.mxu0 %v3023_v33  ;;  %v3439_v32 = vld [vmem:[#allocation2 + $0xe8] sm:$0xff]  ;;  %v3035_v45 = vpack.c.bf16 %v711_v30, %v699_v27  ;;  %v712_v51 = vld [vmem:[#allocation5 + $0x1370] sm:$0xff]  ;;  %v761_v21 = vld [vmem:[#allocation5 + $0x14f8] sm:$0xff] }
 0x193   :  { %2280 = vst [vmem:[#allocation8 + $0x10] sm:$0xff] %v3207_v49  ;;  %2279 = vst [vmem:[#allocation8 + $0x8] sm:$0xff] %v3192_v50  ;;  %v1107_v60 = vpop.f32.mrb[2].mxu0  ;;  %3152 = vmatprep.subr.bf16.mxu1 %v3151_v38  ;;  %1926 = vmatprep.mubr.f32.mxu0 %v3437_v1  ;;  %v3440_v38 = vld [vmem:[#allocation2 + $0xe0] sm:$0xff]  ;;  %v3163_v50 = vpack.c.bf16 %v713_v37, %v701_v36  ;;  %v3171_v37 = vpack.c.bf16 %v761_v21, %v749_v20  ;;  %v808_v20 = vld [vmem:[#allocation5 + $0x1670] sm:$0xff] }
 0x194   :  { %2281 = vst [vmem:[#allocation8 + $0x18] sm:$0xff] %v3208_v53  ;;  %v3193_v2 = vadd.f32 %v1107_v60, %v3687_v24  ;;  %v1333_v3 = vpop.f32.mrb[2].mxu1  ;;  %v1109_v4 = vpop.f32.mrb[3].mxu0  ;;  %2152 = vmatprep.mubr.f32.mxu1 %v3437_v1  ;;  %1927 = vmatmul.mubr.f32.gmra.mrb[44].mxu0 %v3438_v8  ;;  %v735_v53 = vld [vmem:[#allocation5 + $0x1428] sm:$0xff]  ;;  %v737_v60 = vld [vmem:[#allocation5 + $0x1438] sm:$0xff] }
 0x195   :  { %v3209_v9 = vadd.f32 %v1333_v3, %v3692_v28  ;;  %v3194_v13 = vadd.f32 %v1109_v4, %v3697_v29  ;;  %v1335_v15 = vpop.f32.mrb[3].mxu1  ;;  %3026 = vmatpush1.bf16.msra.mxu0 %v3025_v52  ;;  %2153 = vmatmul.mubr.f32.gmra.mrb[44].mxu1 %v3438_v8  ;;  %v723_v52 = vld [vmem:[#allocation5 + $0x13c8] sm:$0xff]  ;;  %v722_v4 = vld [vmem:[#allocation5 + $0x13c0] sm:$0xff] }
 0x196   :  { %2282 = vst [vmem:[#allocation8 + $0x20] sm:$0xff] %v3193_v2  ;;  %v3210_v17 = vadd.f32 %v1335_v15, %v3702_v31  ;;  %3154 = vmatpush1.bf16.msra.mxu1 %v3153_v54  ;;  %3028 = vmatprep.subr.bf16.mxu0 %v3027_v55  ;;  %v3441_v54 = vld [vmem:[#allocation2 + $0x18] sm:$0xff]  ;;  %v3165_v2 = vpack.c.bf16 %v712_v51, %v700_v48  ;;  %v747_v15 = vld [vmem:[#allocation5 + $0x1488] sm:$0xff] }
 0x197   :  { %2284 = vst [vmem:[#allocation8 + $0x30] sm:$0xff] %v3209_v9  ;;  %2283 = vst [vmem:[#allocation8 + $0x28] sm:$0xff] %v3194_v13  ;;  %v1113_v23 = vpop.f32.mrb[4].mxu0  ;;  %3156 = vmatprep.subr.bf16.mxu1 %v3155_v61  ;;  %1932 = vmatprep.mubr.f32.mxu0 %v3439_v32  ;;  %v3039_v3 = vpack.c.bf16 %v735_v53, %v723_v52  ;;  %v3167_v9 = vpack.c.bf16 %v737_v60, %v725_v59  ;;  %v736_v13 = vld [vmem:[#allocation5 + $0x1430] sm:$0xff]  ;;  %v770_v53 = vld [vmem:[#allocation5 + $0x1540] sm:$0xff] }
 0x198   :  { %2285 = vst [vmem:[#allocation8 + $0x38] sm:$0xff] %v3210_v17  ;;  %v3195_v33 = vadd.f32 %v1113_v23, %v3687_v24  ;;  %v1339_v34 = vpop.f32.mrb[4].mxu1  ;;  %v1115_v35 = vpop.f32.mrb[5].mxu0  ;;  %2158 = vmatprep.mubr.f32.mxu1 %v3439_v32  ;;  %1933 = vmatmul.mubr.f32.gmra.mrb[46].mxu0 %v3440_v38  ;;  %v3041_v26 = vpack.c.bf16 %v734_v6, %v722_v4  ;;  %v784_v59 = vld [vmem:[#allocation5 + $0x15b0] sm:$0xff]  ;;  %v795_v60 = vld [vmem:[#allocation5 + $0x1608] sm:$0xff] }
 0x199   :  { %v3211_v39 = vadd.f32 %v1339_v34, %v3692_v28  ;;  %v3196_v40 = vadd.f32 %v1115_v35, %v3697_v29  ;;  %v1341_v41 = vpop.f32.mrb[5].mxu1  ;;  %3030 = vmatpush1.bf16.msra.mxu0 %v3029_v16  ;;  %2159 = vmatmul.mubr.f32.gmra.mrb[46].mxu1 %v3440_v38  ;;  %v759_v16 = vld [vmem:[#allocation5 + $0x14e8] sm:$0xff]  ;;  %v3169_v30 = vpack.c.bf16 %v736_v13, %v724_v7  ;;  %v758_v34 = vld [vmem:[#allocation5 + $0x14e0] sm:$0xff]  ;;  %v748_v35 = vld [vmem:[#allocation5 + $0x1490] sm:$0xff] }
 0x19a   :  { %2286 = vst [vmem:[#allocation8 + $0x40] sm:$0xff] %v3195_v33  ;;  %v3212_v43 = vadd.f32 %v1341_v41, %v3702_v31  ;;  %3158 = vmatpush1.bf16.msra.mxu1 %v3157_v18  ;;  %3032 = vmatprep.subr.bf16.mxu0 %v3031_v19  ;;  %v3043_v32 = vpack.c.bf16 %v759_v16, %v747_v15  ;;  %v746_v33 = vld [vmem:[#allocation5 + $0x1480] sm:$0xff]  ;;  %v760_v38 = vld [vmem:[#allocation5 + $0x14f0] sm:$0xff]  ;;  %v819_v21 = vld [vmem:[#allocation5 + $0x16c8] sm:$0xff] }
 0x19b   :  { %2288 = vst [vmem:[#allocation8 + $0x50] sm:$0xff] %v3211_v39  ;;  %2287 = vst [vmem:[#allocation8 + $0x48] sm:$0xff] %v3196_v40  ;;  %v1119_v49 = vpop.f32.mrb[6].mxu0  ;;  %3160 = vmatprep.subr.bf16.mxu1 %v3159_v25  ;;  %2003 = vmatprep.mubr.f32.mxu0 %v3441_v54  ;;  %v771_v39 = vld [vmem:[#allocation5 + $0x1548] sm:$0xff]  ;;  %v3173_v51 = vpack.c.bf16 %v760_v38, %v748_v35  ;;  %v794_v15 = vld [vmem:[#allocation5 + $0x1600] sm:$0xff] }
 0x19c   :  { %2289 = vst [vmem:[#allocation8 + $0x58] sm:$0xff] %v3212_v43  ;;  %v3197_v55 = vadd.f32 %v1119_v49, %v3687_v24  ;;  %v1345_v57 = vpop.f32.mrb[6].mxu1  ;;  %v1121_v58 = vpop.f32.mrb[7].mxu0  ;;  %2229 = vmatprep.mubr.f32.mxu1 %v3441_v54  ;;  %v783_v40 = vld [vmem:[#allocation5 + $0x15a8] sm:$0xff]  ;;  %v3045_v49 = vpack.c.bf16 %v758_v34, %v746_v33  ;;  %v782_v54 = vld [vmem:[#allocation5 + $0x15a0] sm:$0xff] }
 0x19d   :  { %v3213_v61 = vadd.f32 %v1345_v57, %v3692_v28  ;;  %v3198_v62 = vadd.f32 %v1121_v58, %v3697_v29  ;;  %v1347_v63 = vpop.f32.mrb[7].mxu1  ;;  %3034 = vmatpush1.bf16.msra.mxu0 %v3033_v42  ;;  %v3047_v52 = vpack.c.bf16 %v783_v40, %v771_v39  ;;  %v3049_v7 = vpack.c.bf16 %v782_v54, %v770_v53  ;;  %v806_v16 = vld [vmem:[#allocation5 + $0x1660] sm:$0xff]  ;;  %v820_v40 = vld [vmem:[#allocation5 + $0x16d0] sm:$0xff] }
 0x19e   :  { %2290 = vst [vmem:[#allocation8 + $0x60] sm:$0xff] %v3197_v55  ;;  %v3214_v1 = vadd.f32 %v1347_v63, %v3702_v31  ;;  %3162 = vmatpush1.bf16.msra.mxu1 %v3161_v44  ;;  %3036 = vmatprep.subr.bf16.mxu0 %v3035_v45  ;;  %v773_v44 = vld [vmem:[#allocation5 + $0x1558] sm:$0xff]  ;;  %v772_v55 = vld [vmem:[#allocation5 + $0x1550] sm:$0xff]  ;;  %v3053_v35 = vpack.c.bf16 %v806_v16, %v794_v15  ;;  %v818_v39 = vld [vmem:[#allocation5 + $0x16c0] sm:$0xff] }
 0x19f   :  { %2292 = vst [vmem:[#allocation8 + $0x70] sm:$0xff] %v3213_v61  ;;  %2291 = vst [vmem:[#allocation8 + $0x68] sm:$0xff] %v3198_v62  ;;  %v1125_v8 = vpop.f32.mrb[8].mxu0  ;;  %3164 = vmatprep.subr.bf16.mxu1 %v3163_v50  ;;  %v785_v45 = vld [vmem:[#allocation5 + $0x15b8] sm:$0xff]  ;;  %v807_v61 = vld [vmem:[#allocation5 + $0x1668] sm:$0xff] }
 0x1a0   :  { %2293 = vst [vmem:[#allocation8 + $0x78] sm:$0xff] %v3214_v1  ;;  %v3199_v17 = vadd.f32 %v1125_v8, %v3687_v24  ;;  %v1351_v18 = vpop.f32.mrb[8].mxu1  ;;  %v1127_v19 = vpop.f32.mrb[9].mxu0  ;;  %v3175_v58 = vpack.c.bf16 %v785_v45, %v773_v44  ;;  %v797_v1 = vld [vmem:[#allocation5 + $0x1618] sm:$0xff]  ;;  %v3051_v13 = vpack.c.bf16 %v807_v61, %v795_v60  ;;  %v3442_v54 = vld [vmem:[#allocation2 + $0x10] sm:$0xff] }
 0x1a1   :  { %v3215_v22 = vadd.f32 %v1351_v18, %v3692_v28  ;;  %v3200_v23 = vadd.f32 %v1127_v19, %v3697_v29  ;;  %v1353_v25 = vpop.f32.mrb[9].mxu1  ;;  %3038 = vmatpush1.bf16.msra.mxu0 %v3037_v0  ;;  %v857_v44 = vld [vmem:[#allocation5 + $0x17f8] sm:$0xff]  ;;  %v3448_v61 = vld [vmem:[#allocation2 + $0x70] sm:$0xff] }
 0x1a2   :  { %2294 = vst [vmem:[#allocation8 + $0x80] sm:$0xff] %v3199_v17  ;;  %v3216_v27 = vadd.f32 %v1353_v25, %v3702_v31  ;;  %3166 = vmatpush1.bf16.msra.mxu1 %v3165_v2  ;;  %3040 = vmatprep.subr.bf16.mxu0 %v3039_v3  ;;  %v809_v2 = vld [vmem:[#allocation5 + $0x1678] sm:$0xff]  ;;  %v796_v17 = vld [vmem:[#allocation5 + $0x1610] sm:$0xff] }
 0x1a3   :  { %2296 = vst [vmem:[#allocation8 + $0x90] sm:$0xff] %v3215_v22  ;;  %2295 = vst [vmem:[#allocation8 + $0x88] sm:$0xff] %v3200_v23  ;;  %v1131_v36 = vpop.f32.mrb[10].mxu0  ;;  %3168 = vmatprep.subr.bf16.mxu1 %v3167_v9  ;;  %v3177_v9 = vpack.c.bf16 %v784_v59, %v772_v55  ;;  %v3179_v19 = vpack.c.bf16 %v809_v2, %v797_v1  ;;  %v831_v22 = vld [vmem:[#allocation5 + $0x1728] sm:$0xff]  ;;  %v3443_v55 = vld [vmem:[#allocation2 + $0x38] sm:$0xff] }
 0x1a4   :  { %2297 = vst [vmem:[#allocation8 + $0x98] sm:$0xff] %v3216_v27  ;;  %v3201_v41 = vadd.f32 %v1131_v36, %v3687_v24  ;;  %v1357_v42 = vpop.f32.mrb[10].mxu1  ;;  %v1133_v43 = vpop.f32.mrb[11].mxu0  ;;  %v821_v27 = vld [vmem:[#allocation5 + $0x16d8] sm:$0xff]  ;;  %v3055_v38 = vpack.c.bf16 %v831_v22, %v819_v21  ;;  %v3446_v59 = vld [vmem:[#allocation2 + $0x50] sm:$0xff] }
 0x1a5   :  { %v3217_v46 = vadd.f32 %v1357_v42, %v3692_v28  ;;  %v3202_v47 = vadd.f32 %v1133_v43, %v3697_v29  ;;  %v1359_v48 = vpop.f32.mrb[11].mxu1  ;;  %3042 = vmatpush1.bf16.msra.mxu0 %v3041_v26  ;;  %v843_v42 = vld [vmem:[#allocation5 + $0x1788] sm:$0xff]  ;;  %v845_v43 = vld [vmem:[#allocation5 + $0x1798] sm:$0xff]  ;;  %v3452_v1 = vld [vmem:[#allocation2 + $0xb0] sm:$0xff] }
 0x1a6   :  { %2298 = vst [vmem:[#allocation8 + $0xa0] sm:$0xff] %v3201_v41  ;;  %v3218_v50 = vadd.f32 %v1359_v48, %v3702_v31  ;;  %3170 = vmatpush1.bf16.msra.mxu1 %v3169_v30  ;;  %3044 = vmatprep.subr.bf16.mxu0 %v3043_v32  ;;  %v833_v30 = vld [vmem:[#allocation5 + $0x1738] sm:$0xff]  ;;  %v854_v48 = vld [vmem:[#allocation5 + $0x17e0] sm:$0xff] }
 0x1a7   :  { %2300 = vst [vmem:[#allocation8 + $0xb0] sm:$0xff] %v3217_v46  ;;  %2299 = vst [vmem:[#allocation8 + $0xa8] sm:$0xff] %v3202_v47  ;;  %v1137_v57 = vpop.f32.mrb[12].mxu0  ;;  %3172 = vmatprep.subr.bf16.mxu1 %v3171_v37  ;;  %v3181_v37 = vpack.c.bf16 %v808_v20, %v796_v17  ;;  %v3183_v41 = vpack.c.bf16 %v833_v30, %v821_v27  ;;  %v842_v47 = vld [vmem:[#allocation5 + $0x1780] sm:$0xff]  ;;  %v3447_v60 = vld [vmem:[#allocation2 + $0x78] sm:$0xff] }
 0x1a8   :  { %2301 = vst [vmem:[#allocation8 + $0xb8] sm:$0xff] %v3218_v50  ;;  %v3203_v62 = vadd.f32 %v1137_v57, %v3687_v24  ;;  %v1363_v63 = vpop.f32.mrb[12].mxu1  ;;  %v1139_v0 = vpop.f32.mrb[13].mxu0  ;;  %v844_v50 = vld [vmem:[#allocation5 + $0x1790] sm:$0xff]  ;;  %v3453_v2 = vld [vmem:[#allocation2 + $0xd8] sm:$0xff] }
 0x1a9   :  { %v3219_v3 = vadd.f32 %v1363_v63, %v3692_v28  ;;  %v3204_v4 = vadd.f32 %v1139_v0, %v3697_v29  ;;  %v1365_v6 = vpop.f32.mrb[13].mxu1  ;;  %3046 = vmatpush1.bf16.msra.mxu0 %v3045_v49  ;;  %v3187_v49 = vpack.c.bf16 %v857_v44, %v845_v43  ;;  %v3444_v57 = vld [vmem:[#allocation2 + $0x30] sm:$0xff]  ;;  %v3451_v0 = vld [vmem:[#allocation2 + $0xb8] sm:$0xff] }
 0x1aa   :  { %2302 = vst [vmem:[#allocation8 + $0xc0] sm:$0xff] %v3203_v62  ;;  %v3220_v8 = vadd.f32 %v1365_v6, %v3702_v31  ;;  %3174 = vmatpush1.bf16.msra.mxu1 %v3173_v51  ;;  %3048 = vmatprep.subr.bf16.mxu0 %v3047_v52  ;;  %v856_v51 = vld [vmem:[#allocation5 + $0x17f0] sm:$0xff]  ;;  %v3061_v52 = vpack.c.bf16 %v854_v48, %v842_v47  ;;  %v3449_v62 = vld [vmem:[#allocation2 + $0x98] sm:$0xff] }
 0x1ab   :  { %2304 = vst [vmem:[#allocation8 + $0xd0] sm:$0xff] %v3219_v3  ;;  %2303 = vst [vmem:[#allocation8 + $0xc8] sm:$0xff] %v3204_v4  ;;  %v1143_v18 = vpop.f32.mrb[14].mxu0  ;;  %3176 = vmatprep.subr.bf16.mxu1 %v3175_v58  ;;  %v3189_v53 = vpack.c.bf16 %v856_v51, %v844_v50  ;;  %v3445_v58 = vld [vmem:[#allocation2 + $0x58] sm:$0xff]  ;;  %v3450_v63 = vld [vmem:[#allocation2 + $0x90] sm:$0xff] }
 0x1ac   :  { %2305 = vst [vmem:[#allocation8 + $0xd8] sm:$0xff] %v3220_v8  ;;  %v3205_v23 = vadd.f32 %v1143_v18, %v3687_v24  ;;  %v1369_v25 = vpop.f32.mrb[14].mxu1  ;;  %v1145_v26 = vpop.f32.mrb[15].mxu0  ;;  %v830_v24 = vld [vmem:[#allocation5 + $0x1720] sm:$0xff]  ;;  %v3454_v3 = vld [vmem:[#allocation2 + $0xd0] sm:$0xff]  ;;  %v3455_v4 = vld [vmem:[#allocation2 + $0xf8] sm:$0xff] }
 0x1ad   :  { %v3221_v32 = vadd.f32 %v1369_v25, %v3692_v28  ;;  %v3206_v33 = vadd.f32 %v1145_v26, %v3697_v29  ;;  %v1371_v34 = vpop.f32.mrb[15].mxu1  ;;  %3050 = vmatpush1.bf16.msra.mxu0 %v3049_v7  ;;  %v832_v28 = vld [vmem:[#allocation5 + $0x1730] sm:$0xff]  ;;  %v855_v29 = vld [vmem:[#allocation5 + $0x17e8] sm:$0xff]  ;;  %v3057_v45 = vpack.c.bf16 %v830_v24, %v818_v39  ;;  %v880_v7 = vsub.s32 4, %v3676_v56 }
 0x1ae   :  { %2306 = vst [vmem:[#allocation8 + $0xe0] sm:$0xff] %v3205_v23  ;;  %v3222_v36 = vadd.f32 %v1371_v34, %v3702_v31  ;;  %3178 = vmatpush1.bf16.msra.mxu1 %v3177_v9  ;;  %3052 = vmatprep.subr.bf16.mxu0 %v3051_v13  ;;  %v3185_v31 = vpack.c.bf16 %v832_v28, %v820_v40  ;;  %v3456_v6 = vld [vmem:[#allocation2 + $0xf0] sm:$0xff]  ;;  %v888_v8 = vsub.s32 6, %v3676_v56  ;;  %v884_v9 = vsub.s32 5, %v3676_v56 }
 0x1af   :  { %2308 = vst [vmem:[#allocation8 + $0xf0] sm:$0xff] %v3221_v32  ;;  %2307 = vst [vmem:[#allocation8 + $0xe8] sm:$0xff] %v3206_v33  ;;  %3180 = vmatprep.subr.bf16.mxu1 %v3179_v19  ;;  %v3059_v46 = vpack.c.bf16 %v855_v29, %v843_v42  ;;  %v892_v13 = vsub.s32 7, %v3676_v56  ;;  %v3741_v15 = vrot.slane %v3679_v10, %v880_v7 }
 0x1b0   :  { %2309 = vst [vmem:[#allocation8 + $0xf8] sm:$0xff] %v3222_v36  ;;  %v3744_v16 = vrot.slane %v3679_v10, %v888_v8  ;;  %v3747_v17 = vrot.slane %v3679_v10, %v884_v9 }
 0x1b1   :  { %3054 = vmatpush1.bf16.msra.mxu0 %v3053_v35  ;;  %v3750_v18 = vrot.slane %v3679_v10, %v892_v13 }
 0x1b2   :  { %3182 = vmatpush1.bf16.msra.mxu1 %v3181_v37  ;;  %3056 = vmatprep.subr.bf16.mxu0 %v3055_v38 }
 0x1b3   :  { %3184 = vmatprep.subr.bf16.mxu1 %v3183_v41 }
 0x1b5   :  { %3058 = vmatpush1.bf16.msra.mxu0 %v3057_v45 }
 0x1b6   :  { %3186 = vmatpush1.bf16.msra.mxu1 %v3185_v31  ;;  %3060 = vmatprep.subr.bf16.mxu0 %v3059_v46 }
 0x1b7   :  { %3188 = vmatprep.subr.bf16.mxu1 %v3187_v49 }
 0x1b9   :  { %3062 = vmatpush1.bf16.msra.mxu0 %v3061_v52 }
 0x1ba   :  { %3190 = vmatpush1.bf16.msra.mxu1 %v3189_v53 }
 0x1bc   :  { %2004 = vmatmul.mubr.f32.vlgmr.msra.gmra.mrb[32].mxu0 %v3442_v54 }
 0x1bd   :  { %2230 = vmatmul.mubr.f32.vlgmr.msra.gmra.mrb[32].mxu1 %v3442_v54  ;;  %2009 = vmatprep.mubr.f32.mxu0 %v3443_v55 }
 0x1be   :  { %2235 = vmatprep.mubr.f32.mxu1 %v3443_v55 }
 0x1c0   :  { %2010 = vmatmul.mubr.f32.gmra.mrb[34].mxu0 %v3444_v57 }
 0x1c1   :  { %2236 = vmatmul.mubr.f32.gmra.mrb[34].mxu1 %v3444_v57  ;;  %2015 = vmatprep.mubr.f32.mxu0 %v3445_v58 }
 0x1c2   :  { %2241 = vmatprep.mubr.f32.mxu1 %v3445_v58 }
 0x1c4   :  { %2016 = vmatmul.mubr.f32.gmra.mrb[36].mxu0 %v3446_v59 }
 0x1c5   :  { %2242 = vmatmul.mubr.f32.gmra.mrb[36].mxu1 %v3446_v59  ;;  %2021 = vmatprep.mubr.f32.mxu0 %v3447_v60 }
 0x1c6   :  { %2247 = vmatprep.mubr.f32.mxu1 %v3447_v60 }
 0x1c8   :  { %2022 = vmatmul.mubr.f32.gmra.mrb[38].mxu0 %v3448_v61 }
 0x1c9   :  { %2248 = vmatmul.mubr.f32.gmra.mrb[38].mxu1 %v3448_v61  ;;  %2027 = vmatprep.mubr.f32.mxu0 %v3449_v62 }
 0x1ca   :  { %2253 = vmatprep.mubr.f32.mxu1 %v3449_v62 }
 0x1cc   :  { %2028 = vmatmul.mubr.f32.gmra.mrb[40].mxu0 %v3450_v63 }
 0x1cd   :  { %2254 = vmatmul.mubr.f32.gmra.mrb[40].mxu1 %v3450_v63  ;;  %2033 = vmatprep.mubr.f32.mxu0 %v3451_v0 }
 0x1ce   :  { %2259 = vmatprep.mubr.f32.mxu1 %v3451_v0 }
 0x1d0   :  { %2034 = vmatmul.mubr.f32.gmra.mrb[42].mxu0 %v3452_v1 }
 0x1d1   :  { %2260 = vmatmul.mubr.f32.gmra.mrb[42].mxu1 %v3452_v1  ;;  %2039 = vmatprep.mubr.f32.mxu0 %v3453_v2 }
 0x1d2   :  { %2265 = vmatprep.mubr.f32.mxu1 %v3453_v2 }
 0x1d4   :  { %2040 = vmatmul.mubr.f32.gmra.mrb[44].mxu0 %v3454_v3 }
 0x1d5   :  { %2266 = vmatmul.mubr.f32.gmra.mrb[44].mxu1 %v3454_v3  ;;  %2045 = vmatprep.mubr.f32.mxu0 %v3455_v4 }
 0x1d6   :  { %2271 = vmatprep.mubr.f32.mxu1 %v3455_v4 }
 0x1d8   :  { %2046 = vmatmul.mubr.f32.gmra.mrb[46].mxu0 %v3456_v6 }
 0x1d9   :  { %2272 = vmatmul.mubr.f32.gmra.mrb[46].mxu1 %v3456_v6 }
 0x20f   :  { %v1553_v19 = vpop.f32.mrb[16].mxu0 }
 0x210   :  { %v3223_v20 = vadd.f32 %v1553_v19, %v3741_v15  ;;  %v1779_v21 = vpop.f32.mrb[16].mxu1  ;;  %v1555_v22 = vpop.f32.mrb[17].mxu0 }
 0x211   :  { %v3239_v23 = vadd.f32 %v1779_v21, %v3744_v16  ;;  %v3224_v25 = vadd.f32 %v1555_v22, %v3747_v17  ;;  %v1781_v26 = vpop.f32.mrb[17].mxu1 }
 0x212   :  { %2310 = vst [vmem:[#allocation9] sm:$0xff] %v3223_v20  ;;  %v3240_v27 = vadd.f32 %v1781_v26, %v3750_v18 }
 0x213   :  { %2312 = vst [vmem:[#allocation9 + $0x10] sm:$0xff] %v3239_v23  ;;  %2311 = vst [vmem:[#allocation9 + $0x8] sm:$0xff] %v3224_v25  ;;  %v1559_v30 = vpop.f32.mrb[18].mxu0 }
 0x214   :  { %2313 = vst [vmem:[#allocation9 + $0x18] sm:$0xff] %v3240_v27  ;;  %v3225_v10 = vadd.f32 %v1559_v30, %v3741_v15  ;;  %v1785_v32 = vpop.f32.mrb[18].mxu1  ;;  %v1561_v33 = vpop.f32.mrb[19].mxu0 }
 0x215   :  { %v3241_v34 = vadd.f32 %v1785_v32, %v3744_v16  ;;  %v3226_v35 = vadd.f32 %v1561_v33, %v3747_v17  ;;  %v1787_v36 = vpop.f32.mrb[19].mxu1 }
 0x216   :  { %2314 = vst [vmem:[#allocation9 + $0x20] sm:$0xff] %v3225_v10  ;;  %v3242_v37 = vadd.f32 %v1787_v36, %v3750_v18 }
 0x217   :  { %2316 = vst [vmem:[#allocation9 + $0x30] sm:$0xff] %v3241_v34  ;;  %2315 = vst [vmem:[#allocation9 + $0x28] sm:$0xff] %v3226_v35  ;;  %v1565_v38 = vpop.f32.mrb[20].mxu0 }
 0x218   :  { %2317 = vst [vmem:[#allocation9 + $0x38] sm:$0xff] %v3242_v37  ;;  %v3227_v39 = vadd.f32 %v1565_v38, %v3741_v15  ;;  %v1791_v24 = vpop.f32.mrb[20].mxu1  ;;  %v1567_v40 = vpop.f32.mrb[21].mxu0 }
 0x219   :  { %v3243_v41 = vadd.f32 %v1791_v24, %v3744_v16  ;;  %v3228_v28 = vadd.f32 %v1567_v40, %v3747_v17  ;;  %v1793_v42 = vpop.f32.mrb[21].mxu1 }
 0x21a   :  { %2318 = vst [vmem:[#allocation9 + $0x40] sm:$0xff] %v3227_v39  ;;  %v3244_v29 = vadd.f32 %v1793_v42, %v3750_v18 }
 0x21b   :  { %2320 = vst [vmem:[#allocation9 + $0x50] sm:$0xff] %v3243_v41  ;;  %2319 = vst [vmem:[#allocation9 + $0x48] sm:$0xff] %v3228_v28  ;;  %v1571_v43 = vpop.f32.mrb[22].mxu0 }
 0x21c   :  { %2321 = vst [vmem:[#allocation9 + $0x58] sm:$0xff] %v3244_v29  ;;  %v3229_v44 = vadd.f32 %v1571_v43, %v3741_v15  ;;  %v1797_v45 = vpop.f32.mrb[22].mxu1  ;;  %v1573_v31 = vpop.f32.mrb[23].mxu0 }
 0x21d   :  { %v3245_v46 = vadd.f32 %v1797_v45, %v3744_v16  ;;  %v3230_v47 = vadd.f32 %v1573_v31, %v3747_v17  ;;  %v1799_v48 = vpop.f32.mrb[23].mxu1 }
 0x21e   :  { %2322 = vst [vmem:[#allocation9 + $0x60] sm:$0xff] %v3229_v44  ;;  %v3246_v49 = vadd.f32 %v1799_v48, %v3750_v18 }
 0x21f   :  { %2324 = vst [vmem:[#allocation9 + $0x70] sm:$0xff] %v3245_v46  ;;  %2323 = vst [vmem:[#allocation9 + $0x68] sm:$0xff] %v3230_v47  ;;  %v1577_v50 = vpop.f32.mrb[24].mxu0 }
 0x220   :  { %2325 = vst [vmem:[#allocation9 + $0x78] sm:$0xff] %v3246_v49  ;;  %v3231_v51 = vadd.f32 %v1577_v50, %v3741_v15  ;;  %v1803_v52 = vpop.f32.mrb[24].mxu1  ;;  %v1579_v53 = vpop.f32.mrb[25].mxu0 }
 0x221   :  { %v3247_v54 = vadd.f32 %v1803_v52, %v3744_v16  ;;  %v3232_v55 = vadd.f32 %v1579_v53, %v3747_v17  ;;  %v1805_v57 = vpop.f32.mrb[25].mxu1 }
 0x222   :  { %2326 = vst [vmem:[#allocation9 + $0x80] sm:$0xff] %v3231_v51  ;;  %v3248_v58 = vadd.f32 %v1805_v57, %v3750_v18 }
 0x223   :  { %2328 = vst [vmem:[#allocation9 + $0x90] sm:$0xff] %v3247_v54  ;;  %2327 = vst [vmem:[#allocation9 + $0x88] sm:$0xff] %v3232_v55  ;;  %v1583_v59 = vpop.f32.mrb[26].mxu0 }
 0x224   :  { %2329 = vst [vmem:[#allocation9 + $0x98] sm:$0xff] %v3248_v58  ;;  %v3233_v60 = vadd.f32 %v1583_v59, %v3741_v15  ;;  %v1809_v61 = vpop.f32.mrb[26].mxu1  ;;  %v1585_v62 = vpop.f32.mrb[27].mxu0 }
 0x225   :  { %v3249_v63 = vadd.f32 %v1809_v61, %v3744_v16  ;;  %v3234_v0 = vadd.f32 %v1585_v62, %v3747_v17  ;;  %v1811_v1 = vpop.f32.mrb[27].mxu1 }
 0x226   :  { %2330 = vst [vmem:[#allocation9 + $0xa0] sm:$0xff] %v3233_v60  ;;  %v3250_v2 = vadd.f32 %v1811_v1, %v3750_v18 }
 0x227   :  { %2332 = vst [vmem:[#allocation9 + $0xb0] sm:$0xff] %v3249_v63  ;;  %2331 = vst [vmem:[#allocation9 + $0xa8] sm:$0xff] %v3234_v0  ;;  %v1589_v3 = vpop.f32.mrb[28].mxu0 }
 0x228   :  { %2333 = vst [vmem:[#allocation9 + $0xb8] sm:$0xff] %v3250_v2  ;;  %v3235_v4 = vadd.f32 %v1589_v3, %v3741_v15  ;;  %v1815_v6 = vpop.f32.mrb[28].mxu1  ;;  %v1591_v7 = vpop.f32.mrb[29].mxu0 }
 0x229   :  { %v3251_v8 = vadd.f32 %v1815_v6, %v3744_v16  ;;  %v3236_v9 = vadd.f32 %v1591_v7, %v3747_v17  ;;  %v1817_v13 = vpop.f32.mrb[29].mxu1 }
 0x22a   :  { %2334 = vst [vmem:[#allocation9 + $0xc0] sm:$0xff] %v3235_v4  ;;  %v3252_v19 = vadd.f32 %v1817_v13, %v3750_v18 }
 0x22b   :  { %2336 = vst [vmem:[#allocation9 + $0xd0] sm:$0xff] %v3251_v8  ;;  %2335 = vst [vmem:[#allocation9 + $0xc8] sm:$0xff] %v3236_v9  ;;  %v1595_v20 = vpop.f32.mrb[30].mxu0 }
 0x22c   :  { %2337 = vst [vmem:[#allocation9 + $0xd8] sm:$0xff] %v3252_v19  ;;  %v3237_v21 = vadd.f32 %v1595_v20, %v3741_v15  ;;  %v1821_v22 = vpop.f32.mrb[30].mxu1  ;;  %v1597_v23 = vpop.f32.mrb[31].mxu0 }
 0x22d   :  { %v3253_v25 = vadd.f32 %v1821_v22, %v3744_v16  ;;  %v3238_v26 = vadd.f32 %v1597_v23, %v3747_v17  ;;  %v1823_v27 = vpop.f32.mrb[31].mxu1 }
 0x22e   :  { %2338 = vst [vmem:[#allocation9 + $0xe0] sm:$0xff] %v3237_v21  ;;  %v3254_v30 = vadd.f32 %v1823_v27, %v3750_v18 }
 0x22f   :  { %2340 = vst [vmem:[#allocation9 + $0xf0] sm:$0xff] %v3253_v25  ;;  %2339 = vst [vmem:[#allocation9 + $0xe8] sm:$0xff] %v3238_v26 }
 0x230   :  { %2341 = vst [vmem:[#allocation9 + $0xf8] sm:$0xff] %v3254_v30 }
 0x231   :  { %3534 = shalt.err (!%p3531_p0)
}
 0x232   :  { %s3535_s12 = scalar_lea.hbm %s3888_s4, 4096 }
 0x233   :  { %p3536_p1 = scmp.ne.s32.totalorder %s3888_s4, %s3535_s12  ;;  %p3539_p2 = scmp.lt.u32.totalorder %s3535_s12, %s3888_s4 }
 0x235   :  { %p3541_p3 = pnand %p3539_p2, %p3536_p1 }
 0x237   :  { %3544 = shalt.err (!%p3541_p3)
}
 0x238   :  { %2397 = dma.vmem_to_hbm [thread:$0]  %s2392_s6, 4096, %s3888_s4, [#allocation10], %s3601_s1, %s3601_s1, %s3602_s17  }
 0x239   :  { %s3545_s20 = scalar_lea.vmem %s3784_s8, 4096  ;;  %p3550_p5 = scmp.lt.s32.totalorder %s3784_s8, %s3784_s8 }
 0x23a   :  { %p3546_p4 = scmp.ne.s32.totalorder %s3784_s8, %s3545_s20  ;;  %p3551_p6 = scmp.lt.s32.totalorder %s3545_s20, %s3545_s20 }
 0x23c   :  { %p3552_p7 = por %p3551_p6, %p3550_p5 }
 0x23e   :  { %p3553_p8 = pnand %p3552_p7, %p3546_p4 }
 0x240   :  { %3556 = shalt.err (!%p3553_p8)
}
 0x241   :  { %s3557_s23 = scalar_lea.hbm %s3887_s3, 4096 }
 0x242   :  { %p3558_p9 = scmp.ne.s32.totalorder %s3887_s3, %s3557_s23  ;;  %p3561_p10 = scmp.lt.u32.totalorder %s3557_s23, %s3887_s3 }
 0x244   :  { %p3563_p11 = pnand %p3561_p10, %p3558_p9 }
 0x246   :  { %3566 = shalt.err (!%p3563_p11)
}
 0x247   :  { %2385 = dma.vmem_to_hbm [thread:$0]  %s3784_s8, 4096, %s3887_s3, [#allocation4], %s3601_s1, %s3601_s1, %s3602_s17   ;;  %v859_v15 = vld [vmem:[#allocation7 + $0x8] sm:$0xf] }
 0x248   :  { %v3823_v16 = vrot.slane %v859_v15, %v864_v5  ;;  %v3827_v17 = vrot.slane %v859_v15, %v872_v11  ;;  %v3831_v18 = vrot.slane %v859_v15, %v868_v12  ;;  %v3835_v10 = vrot.slane %v859_v15, %v876_v14  ;;  %s3606_s3 = smov [#allocation11]  }
 0x249   :  { %s2403_s29 = sshll.u32 %s3606_s3, 4  ;;  %s2404_s29 = int_to_ptr.vmem [resolvable:$true] %s2403_s29 }
 0x24a   :  { %s3567_s0 = scalar_lea.vmem %s2404_s29, 4096  ;;  %p3572_p13 = scmp.lt.s32.totalorder %s2404_s29, %s2404_s29 }
 0x24b   :  { %p3568_p12 = scmp.ne.s32.totalorder %s2404_s29, %s3567_s0  ;;  %p3573_p0 = scmp.lt.s32.totalorder %s3567_s0, %s3567_s0 }
 0x24d   :  { %p3574_p1 = por %p3573_p0, %p3572_p13 }
 0x24f   :  { %p3575_p2 = pnand %p3574_p1, %p3568_p12 }
 0x28f   :  { %v2005_v32 = vpop.f32.mrb[32].mxu0 }
 0x290   :  { %v3255_v33 = vadd.f32 %v2005_v32, %v3823_v16  ;;  %v2231_v34 = vpop.f32.mrb[32].mxu1  ;;  %v2007_v35 = vpop.f32.mrb[33].mxu0 }
 0x291   :  { %v3271_v5 = vadd.f32 %v2231_v34, %v3827_v17  ;;  %v3256_v36 = vadd.f32 %v2007_v35, %v3831_v18  ;;  %v2233_v37 = vpop.f32.mrb[33].mxu1 }
 0x292   :  { %2342 = vst [vmem:[#allocation11] sm:$0xff] %v3255_v33  ;;  %v3272_v11 = vadd.f32 %v2233_v37, %v3835_v10 }
 0x293   :  { %2344 = vst [vmem:[#allocation11 + $0x10] sm:$0xff] %v3271_v5  ;;  %2343 = vst [vmem:[#allocation11 + $0x8] sm:$0xff] %v3256_v36  ;;  %v2011_v12 = vpop.f32.mrb[34].mxu0 }
 0x294   :  { %2345 = vst [vmem:[#allocation11 + $0x18] sm:$0xff] %v3272_v11  ;;  %v3257_v56 = vadd.f32 %v2011_v12, %v3823_v16  ;;  %v2237_v14 = vpop.f32.mrb[34].mxu1  ;;  %v2013_v38 = vpop.f32.mrb[35].mxu0 }
 0x295   :  { %v3273_v39 = vadd.f32 %v2237_v14, %v3827_v17  ;;  %v3258_v24 = vadd.f32 %v2013_v38, %v3831_v18  ;;  %v2239_v40 = vpop.f32.mrb[35].mxu1 }
 0x296   :  { %2346 = vst [vmem:[#allocation11 + $0x20] sm:$0xff] %v3257_v56  ;;  %v3274_v41 = vadd.f32 %v2239_v40, %v3835_v10 }
 0x297   :  { %2348 = vst [vmem:[#allocation11 + $0x30] sm:$0xff] %v3273_v39  ;;  %2347 = vst [vmem:[#allocation11 + $0x28] sm:$0xff] %v3258_v24  ;;  %v2017_v28 = vpop.f32.mrb[36].mxu0 }
 0x298   :  { %2349 = vst [vmem:[#allocation11 + $0x38] sm:$0xff] %v3274_v41  ;;  %v3259_v42 = vadd.f32 %v2017_v28, %v3823_v16  ;;  %v2243_v29 = vpop.f32.mrb[36].mxu1  ;;  %v2019_v43 = vpop.f32.mrb[37].mxu0 }
 0x299   :  { %v3275_v44 = vadd.f32 %v2243_v29, %v3827_v17  ;;  %v3260_v45 = vadd.f32 %v2019_v43, %v3831_v18  ;;  %v2245_v31 = vpop.f32.mrb[37].mxu1 }
 0x29a   :  { %2350 = vst [vmem:[#allocation11 + $0x40] sm:$0xff] %v3259_v42  ;;  %v3276_v46 = vadd.f32 %v2245_v31, %v3835_v10 }
 0x29b   :  { %2352 = vst [vmem:[#allocation11 + $0x50] sm:$0xff] %v3275_v44  ;;  %2351 = vst [vmem:[#allocation11 + $0x48] sm:$0xff] %v3260_v45  ;;  %v2023_v47 = vpop.f32.mrb[38].mxu0 }
 0x29c   :  { %2353 = vst [vmem:[#allocation11 + $0x58] sm:$0xff] %v3276_v46  ;;  %v3261_v48 = vadd.f32 %v2023_v47, %v3823_v16  ;;  %v2249_v49 = vpop.f32.mrb[38].mxu1  ;;  %v2025_v50 = vpop.f32.mrb[39].mxu0 }
 0x29d   :  { %v3277_v51 = vadd.f32 %v2249_v49, %v3827_v17  ;;  %v3262_v52 = vadd.f32 %v2025_v50, %v3831_v18  ;;  %v2251_v53 = vpop.f32.mrb[39].mxu1 }
 0x29e   :  { %2354 = vst [vmem:[#allocation11 + $0x60] sm:$0xff] %v3261_v48  ;;  %v3278_v54 = vadd.f32 %v2251_v53, %v3835_v10 }
 0x29f   :  { %2356 = vst [vmem:[#allocation11 + $0x70] sm:$0xff] %v3277_v51  ;;  %2355 = vst [vmem:[#allocation11 + $0x68] sm:$0xff] %v3262_v52  ;;  %v2029_v55 = vpop.f32.mrb[40].mxu0 }
 0x2a0   :  { %2357 = vst [vmem:[#allocation11 + $0x78] sm:$0xff] %v3278_v54  ;;  %v3263_v57 = vadd.f32 %v2029_v55, %v3823_v16  ;;  %v2255_v58 = vpop.f32.mrb[40].mxu1  ;;  %v2031_v59 = vpop.f32.mrb[41].mxu0 }
 0x2a1   :  { %v3279_v60 = vadd.f32 %v2255_v58, %v3827_v17  ;;  %v3264_v61 = vadd.f32 %v2031_v59, %v3831_v18  ;;  %v2257_v62 = vpop.f32.mrb[41].mxu1 }
 0x2a2   :  { %2358 = vst [vmem:[#allocation11 + $0x80] sm:$0xff] %v3263_v57  ;;  %v3280_v63 = vadd.f32 %v2257_v62, %v3835_v10 }
 0x2a3   :  { %2360 = vst [vmem:[#allocation11 + $0x90] sm:$0xff] %v3279_v60  ;;  %2359 = vst [vmem:[#allocation11 + $0x88] sm:$0xff] %v3264_v61  ;;  %v2035_v0 = vpop.f32.mrb[42].mxu0 }
 0x2a4   :  { %2361 = vst [vmem:[#allocation11 + $0x98] sm:$0xff] %v3280_v63  ;;  %v3265_v1 = vadd.f32 %v2035_v0, %v3823_v16  ;;  %v2261_v2 = vpop.f32.mrb[42].mxu1  ;;  %v2037_v3 = vpop.f32.mrb[43].mxu0 }
 0x2a5   :  { %v3281_v4 = vadd.f32 %v2261_v2, %v3827_v17  ;;  %v3266_v6 = vadd.f32 %v2037_v3, %v3831_v18  ;;  %v2263_v7 = vpop.f32.mrb[43].mxu1 }
 0x2a6   :  { %2362 = vst [vmem:[#allocation11 + $0xa0] sm:$0xff] %v3265_v1  ;;  %v3282_v8 = vadd.f32 %v2263_v7, %v3835_v10 }
 0x2a7   :  { %2364 = vst [vmem:[#allocation11 + $0xb0] sm:$0xff] %v3281_v4  ;;  %2363 = vst [vmem:[#allocation11 + $0xa8] sm:$0xff] %v3266_v6  ;;  %v2041_v9 = vpop.f32.mrb[44].mxu0 }
 0x2a8   :  { %2365 = vst [vmem:[#allocation11 + $0xb8] sm:$0xff] %v3282_v8  ;;  %v3267_v13 = vadd.f32 %v2041_v9, %v3823_v16  ;;  %v2267_v19 = vpop.f32.mrb[44].mxu1  ;;  %v2043_v20 = vpop.f32.mrb[45].mxu0 }
 0x2a9   :  { %v3283_v21 = vadd.f32 %v2267_v19, %v3827_v17  ;;  %v3268_v22 = vadd.f32 %v2043_v20, %v3831_v18  ;;  %v2269_v23 = vpop.f32.mrb[45].mxu1 }
 0x2aa   :  { %2366 = vst [vmem:[#allocation11 + $0xc0] sm:$0xff] %v3267_v13  ;;  %v3284_v25 = vadd.f32 %v2269_v23, %v3835_v10 }
 0x2ab   :  { %2368 = vst [vmem:[#allocation11 + $0xd0] sm:$0xff] %v3283_v21  ;;  %2367 = vst [vmem:[#allocation11 + $0xc8] sm:$0xff] %v3268_v22  ;;  %v2047_v26 = vpop.f32.mrb[46].mxu0 }
 0x2ac   :  { %2369 = vst [vmem:[#allocation11 + $0xd8] sm:$0xff] %v3284_v25  ;;  %v3269_v27 = vadd.f32 %v2047_v26, %v3823_v16  ;;  %v2273_v30 = vpop.f32.mrb[46].mxu1  ;;  %v2049_v15 = vpop.f32.mrb[47].mxu0 }
 0x2ad   :  { %v3285_v32 = vadd.f32 %v2273_v30, %v3827_v17  ;;  %v3270_v33 = vadd.f32 %v2049_v15, %v3831_v18  ;;  %v2275_v34 = vpop.f32.mrb[47].mxu1 }
 0x2ae   :  { %2370 = vst [vmem:[#allocation11 + $0xe0] sm:$0xff] %v3269_v27  ;;  %v3286_v35 = vadd.f32 %v2275_v34, %v3835_v10 }
 0x2af   :  { %2372 = vst [vmem:[#allocation11 + $0xf0] sm:$0xff] %v3285_v32  ;;  %2371 = vst [vmem:[#allocation11 + $0xe8] sm:$0xff] %v3270_v33 }
 0x2b0   :  { %2373 = vst [vmem:[#allocation11 + $0xf8] sm:$0xff] %v3286_v35 }
 0x2b1   :  { %3578 = shalt.err (!%p3575_p2)
}
 0x2b2   :  { %s3579_s6 = scalar_lea.hbm %s3889_s5, 4096 }
 0x2b3   :  { %p3580_p3 = scmp.ne.s32.totalorder %s3889_s5, %s3579_s6  ;;  %p3583_p4 = scmp.lt.u32.totalorder %s3579_s6, %s3889_s5 }
 0x2b5   :  { %p3585_p5 = pnand %p3583_p4, %p3580_p3 }
 0x2b7   :  { %3588 = shalt.err (!%p3585_p5)
}
 0x2b8   :  { %2409 = dma.vmem_to_hbm [thread:$0]  %s2404_s29, 4096, %s3889_s5, [#allocation10], %s3601_s1, %s3601_s1, %s3602_s17  }
 0x2b9   :  { %3593 = dma.done.wait [#allocation4], 4096  }
 0x2ba   :  { %3594 = vsyncadd [#allocation4], 4294963200 }
 0x2bb   :  { %3595 = dma.done.wait [#allocation10], 8192  }
 0x2bc   :  { %3596 = vsyncadd [#allocation10], 4294959104 }
 0x2bd   :  { %2419 = vsyncpa [#allocation3], 1 }
 0x2be   :  { %2420 = vsyncpa [#allocation6], 1 }
 0x2bf   :  { %2421 = vsyncpa [#allocation4], 1 }
 0x2c0   :  { %2422 = vsyncpa [#allocation10], 1 }

</bundles_post_ra>
